<compile_context>
chip_gen: v7x
topology: tpu7x:2x2x1
jax: 0.10.0
libtpu: 0.0.40
codegen_flags: <defaults>
</compile_context>

<pallas_src>
import functools
import math

import numpy as np

import jax
import jax.numpy as jnp
from jax.experimental import pallas as pl
from jax.experimental.pallas import tpu as pltpu

EPS = 1e-5        # PyTorch BatchNorm2d default eps
COUT_PAD = 8      # pad the tiny output-channel dim (3) to one sublane group


# --------------------------------------------------------------------------- static (host) helpers
def _tconv_to_matmul_weight(w_t, row_pad=None):
    """PyTorch ConvTranspose2d weight (Cin, Cout, kH, kW) -> (Cout, 9*Cin) matmul
    weight of the equivalent 3x3 'same' conv (spatial flip + in/out channel swap).
    Column index is tap*Cin + ci with tap = ky*3 + kx (matches _im2col)."""
    wf = jnp.flip(w_t.astype(jnp.float32), axis=(2, 3))        # (Ci, Co, kH, kW)
    wc = jnp.transpose(wf, (1, 2, 3, 0))                       # (Co, kH, kW, Ci)
    co, kh, kw, ci = wc.shape
    w = wc.reshape(co, kh * kw * ci)
    if row_pad is not None and row_pad > co:
        w = jnp.concatenate(
            [w, jnp.zeros((row_pad - co, kh * kw * ci), jnp.float32)], axis=0)
    return w


def _tap_masks_packed(N, H, W):
    """(9, N*H*W) 0/1 mask over the batch-packed lane axis (lane = n*H*W + y*W + x);
    tap t = ky*3+kx is valid where neighbour (y+ky-1, x+kx-1) lies inside the image
    (implements zero padding AND isolates images from each other)."""
    P = H * W
    m = np.zeros((9, P), np.float32)
    for tap in range(9):
        dy, dx = tap // 3 - 1, tap % 3 - 1
        for p in range(P):
            y, x = p // W, p % W
            if 0 <= y + dy < H and 0 <= x + dx < W:
                m[tap, p] = 1.0
    return np.tile(m, (1, N))                                  # (9, N*P)


def _bilinear_mat1d(n_in, n_out):
    """(n_out, n_in) 1-D bilinear interpolation matrix, align_corners=True."""
    A = np.zeros((n_out, n_in), np.float64)
    for i in range(n_out):
        s = i * (n_in - 1) / (n_out - 1) if n_out > 1 else 0.0
        i0 = min(int(math.floor(s)), n_in - 1)
        i1 = min(i0 + 1, n_in - 1)
        f = s - i0
        A[i, i0] += 1.0 - f
        A[i, i1] += f
    return A.astype(np.float32)


def _upsample_matrix_packed(N, H, W):
    """Block-diagonal (N*H*W, N*2H*2W) matrix M so that, for the batch-packed
    channel-major activation a (C, N*H*W),  a @ M  is the bilinear x2 upsample
    (align_corners=True) of every image independently."""
    A = np.kron(_bilinear_mat1d(H, 2 * H), _bilinear_mat1d(W, 2 * W)).T   # (P, P2)
    P, P2 = A.shape
    M = np.zeros((N * P, N * P2), np.float32)
    for n in range(N):
        M[n * P:(n + 1) * P, n * P2:(n + 1) * P2] = A
    return M


# --------------------------------------------------------------------------- in-kernel helper
def _im2col(x, masks, W, out_dtype):
    """x: (C, L) batch-packed channel-major activation -> (9*C, L) im2col matrix;
    row tap*C + ci holds channel ci shifted by (ky-1, kx-1) within each image,
    zeroed outside the image by `masks`.  Shifts are XLU lane rolls, not copies."""
    L = x.shape[-1]
    cols = []
    for tap in range(9):
        off = (tap // 3 - 1) * W + (tap % 3 - 1)
        shifted = x if off % L == 0 else pltpu.roll(x, (-off) % L, 1)
        cols.append(shifted * masks[tap:tap + 1, :])
    return jnp.concatenate(cols, axis=0).astype(out_dtype)


# --------------------------------------------------------------------------- the fused kernel
def _decoder_kernel(N, W, W2, Cout, P, P2, inv_cnt,
                    x_ref, w1_ref, b1_ref, m1_ref, g_ref, bt_ref,
                    up_ref, m2_ref, w2_ref, b2_ref, o_ref):
    # ---- pack the batch into the lane dimension: (C, N*P) = (64, 128) ----
    x = jnp.concatenate([x_ref[n] for n in range(N)], axis=1)            # f32

    # ---- deconv1 (== 3x3 'same' conv, single K = 9*C matmul) + bias + ReLU ----
    xcol = _im2col(x, m1_ref[...], W, jnp.bfloat16)                      # (9C, N*P)
    y = jnp.dot(w1_ref[...], xcol,
                preferred_element_type=jnp.float32) + b1_ref[...]
    y = jnp.maximum(y, 0.0)                                              # (C, N*P) f32

    # ---- BatchNorm2d (training mode): batch stats reduced fully in-register ----
    mean = jnp.sum(y, axis=1, keepdims=True) * inv_cnt                   # (C, 1)
    var = jnp.sum(y * y, axis=1, keepdims=True) * inv_cnt - mean * mean
    scale = g_ref[...] * jax.lax.rsqrt(var + EPS)
    shift = bt_ref[...] - mean * scale
    yb = (y * scale + shift).astype(jnp.bfloat16)                        # (C, N*P)

    # ---- bilinear x2, align_corners=True: one block-diagonal matmul ----
    up = jnp.dot(yb, up_ref[...], preferred_element_type=jnp.float32)    # (C, N*P2)

    # ---- deconv2 (K = 9*C matmul) + bias + sigmoid ----
    ucol = _im2col(up, m2_ref[...], W2, jnp.bfloat16)                    # (9C, N*P2)
    out = jnp.dot(w2_ref[...], ucol,
                  preferred_element_type=jnp.float32) + b2_ref[...]
    out = jax.nn.sigmoid(out)                                            # (8, N*P2)

    # ---- unpack batch: lane-dense per-image (Cout, P2) stores ----
    for n in range(N):
        o_ref[n] = out[:Cout, n * P2:(n + 1) * P2]


# --------------------------------------------------------------------------- wrapper
def decoder_forward(x_nchw, params):
    N, C, H, W = x_nchw.shape
    P, H2, W2 = H * W, 2 * H, 2 * W
    P2 = H2 * W2
    Cout = params["w2"].shape[1]
    K = 9 * C
    L1, L2 = N * P, N * P2

    x = x_nchw.astype(jnp.float32).reshape(N, C, P)                      # free reshape

    w1r = _tconv_to_matmul_weight(params["w1"]).astype(jnp.bfloat16)     # (C, 9C)
    b1 = params["b1"].astype(jnp.float32).reshape(C, 1)
    w2r = _tconv_to_matmul_weight(params["w2"], COUT_PAD).astype(jnp.bfloat16)
    b2 = jnp.zeros((COUT_PAD, 1), jnp.float32).at[:Cout, 0].set(
        params["b2"].astype(jnp.float32))
    gamma = params["gamma"].astype(jnp.float32).reshape(C, 1)
    beta = params["beta"].astype(jnp.float32).reshape(C, 1)

    m1 = jnp.asarray(_tap_masks_packed(N, H, W), jnp.float32)            # (9, L1)
    m2 = jnp.asarray(_tap_masks_packed(N, H2, W2), jnp.float32)          # (9, L2)
    up = jnp.asarray(_upsample_matrix_packed(N, H, W), jnp.bfloat16)     # (L1, L2)

    inv_cnt = 1.0 / float(N * H * W)

    out = pl.pallas_call(
        functools.partial(_decoder_kernel, N, W, W2, Cout, P, P2, inv_cnt),
        out_shape=jax.ShapeDtypeStruct((N, Cout, P2), jnp.float32),
        grid_spec=pltpu.PrefetchScalarGridSpec(
            num_scalar_prefetch=0, grid=(1,),
            in_specs=[
                pl.BlockSpec((N, C, P), lambda i: (0, 0, 0)),      # x (all images)
                pl.BlockSpec((C, K), lambda i: (0, 0)),            # w1
                pl.BlockSpec((C, 1), lambda i: (0, 0)),            # b1
                pl.BlockSpec((9, L1), lambda i: (0, 0)),           # conv1 tap masks
                pl.BlockSpec((C, 1), lambda i: (0, 0)),            # gamma
                pl.BlockSpec((C, 1), lambda i: (0, 0)),            # beta
                pl.BlockSpec((L1, L2), lambda i: (0, 0)),          # upsample matrix
                pl.BlockSpec((9, L2), lambda i: (0, 0)),           # conv2 tap masks
                pl.BlockSpec((COUT_PAD, K), lambda i: (0, 0)),     # w2 (row-padded)
                pl.BlockSpec((COUT_PAD, 1), lambda i: (0, 0)),     # b2 (row-padded)
            ],
            out_specs=pl.BlockSpec((N, Cout, P2), lambda i: (0, 0, 0))),
        compiler_params=pltpu.CompilerParams(
            dimension_semantics=("arbitrary",)),
    )(x, w1r, b1, m1, gamma, beta, up, m2, w2r, b2)

    # TODO(synk): BatchNorm running_mean/running_var buffer updates are a training-time
    # side effect only and are not modeled (output matches PyTorch training-mode fwd).
    return out.reshape(N, Cout, H2, W2)                                  # NCHW (free)


# --------------------------------------------------------------------------- pure-JAX reference
def _reference_decoder(x, params):
    """Plain-XLA reference of the PyTorch Decoder forward (training mode, f32)."""
    def tconv_as_conv(w):  # (Ci, Co, kh, kw) -> cross-corr weight (Co, Ci, kh, kw)
        return jnp.transpose(jnp.flip(w.astype(jnp.float32), (2, 3)), (1, 0, 2, 3))
    dn = ("NCHW", "OIHW", "NCHW")
    y = jax.lax.conv_general_dilated(
        x.astype(jnp.float32), tconv_as_conv(params["w1"]),
        (1, 1), [(1, 1), (1, 1)], dimension_numbers=dn)
    y = y + params["b1"].reshape(1, -1, 1, 1)
    y = jnp.maximum(y, 0.0)
    mean = jnp.mean(y, axis=(0, 2, 3), keepdims=True)
    var = jnp.mean(jnp.square(y - mean), axis=(0, 2, 3), keepdims=True)
    y = (y - mean) * jax.lax.rsqrt(var + EPS)
    y = y * params["gamma"].reshape(1, -1, 1, 1) + params["beta"].reshape(1, -1, 1, 1)
    H, W = y.shape[2], y.shape[3]
    AH = jnp.asarray(_bilinear_mat1d(H, 2 * H))
    AW = jnp.asarray(_bilinear_mat1d(W, 2 * W))
    y = jnp.einsum("nchw,yh,xw->ncyx", y, AH, AW)
    z = jax.lax.conv_general_dilated(
        y, tconv_as_conv(params["w2"]),
        (1, 1), [(1, 1), (1, 1)], dimension_numbers=dn)
    z = z + params["b2"].reshape(1, -1, 1, 1)
    return jax.nn.sigmoid(z)


# --------------------------------------------------------------------------- main
if __name__ == "__main__":
    key = jax.random.PRNGKey(0)
    kx, k1, k2, k3, k4, k5, k6 = jax.random.split(key, 7)

    N, C, H, W = 2, 64, 8, 8                 # channels fixed at 64 by the module
    x = jax.random.normal(kx, (N, C, H, W), jnp.float32)

    params = {
        # PyTorch ConvTranspose2d weight layout: (in_ch, out_ch, kH, kW)
        "w1": 0.05 * jax.random.normal(k1, (64, 64, 3, 3), jnp.float32),
        "b1": 0.05 * jax.random.normal(k2, (64,), jnp.float32),
        "w2": 0.05 * jax.random.normal(k3, (64, 3, 3, 3), jnp.float32),
        "b2": 0.05 * jax.random.normal(k4, (3,), jnp.float32),
        "gamma": 1.0 + 0.1 * jax.random.normal(k5, (64,), jnp.float32),
        "beta": 0.1 * jax.random.normal(k6, (64,), jnp.float32),
    }

    out = jax.jit(decoder_forward)(x, params)
    out = jax.block_until_ready(out)

    assert out.shape == (N, 3, 2 * H, 2 * W), out.shape
    assert out.dtype == jnp.float32
    assert bool(jnp.all(jnp.isfinite(out)))
    assert bool(jnp.all((out >= 0.0) & (out <= 1.0)))   # post-sigmoid range

    # numerical check against a plain-XLA f32 reference (bf16 MXU operands -> loose tol)
    ref = jax.block_until_ready(jax.jit(_reference_decoder)(x, params))
    assert float(jnp.max(jnp.abs(out - ref))) < 5e-2

    print("KERNEL_OK")
</pallas_src>

<mosaic_0001>
module attributes {stable_mosaic.version = 11 : i64} {
  func.func @_decoder_kernel(%arg0: i32, %arg1: memref<2x64x64xf32, #tpu.memory_space<vmem>>, %arg2: memref<64x576xbf16, #tpu.memory_space<vmem>>, %arg3: memref<64x1xf32, #tpu.memory_space<vmem>>, %arg4: memref<9x128xf32, #tpu.memory_space<vmem>>, %arg5: memref<64x1xf32, #tpu.memory_space<vmem>>, %arg6: memref<64x1xf32, #tpu.memory_space<vmem>>, %arg7: memref<128x512xbf16, #tpu.memory_space<vmem>>, %arg8: memref<9x512xf32, #tpu.memory_space<vmem>>, %arg9: memref<8x576xbf16, #tpu.memory_space<vmem>>, %arg10: memref<8x1xf32, #tpu.memory_space<vmem>>, %arg11: memref<2x3x256xf32, #tpu.memory_space<vmem>>) attributes {dimension_semantics = [#tpu.dimension_semantics<arbitrary>], iteration_bounds = array<i64: 1>, scalar_prefetch = 0 : i64, scratch_operands = 0 : i64, tpu.core_type = #tpu.core_type<tc>, window_params = [{pipeline_mode = #tpu.pipeline_mode<synchronous>, transform_indices = @transform_0, window_bounds = array<i64: 2, 64, 64>}, {pipeline_mode = #tpu.pipeline_mode<synchronous>, transform_indices = @transform_1, window_bounds = array<i64: 64, 576>}, {pipeline_mode = #tpu.pipeline_mode<synchronous>, transform_indices = @transform_2, window_bounds = array<i64: 64, 1>}, {pipeline_mode = #tpu.pipeline_mode<synchronous>, transform_indices = @transform_3, window_bounds = array<i64: 9, 128>}, {pipeline_mode = #tpu.pipeline_mode<synchronous>, transform_indices = @transform_4, window_bounds = array<i64: 64, 1>}, {pipeline_mode = #tpu.pipeline_mode<synchronous>, transform_indices = @transform_5, window_bounds = array<i64: 64, 1>}, {pipeline_mode = #tpu.pipeline_mode<synchronous>, transform_indices = @transform_6, window_bounds = array<i64: 128, 512>}, {pipeline_mode = #tpu.pipeline_mode<synchronous>, transform_indices = @transform_7, window_bounds = array<i64: 9, 512>}, {pipeline_mode = #tpu.pipeline_mode<synchronous>, transform_indices = @transform_8, window_bounds = array<i64: 8, 576>}, {pipeline_mode = #tpu.pipeline_mode<synchronous>, transform_indices = @transform_9, window_bounds = array<i64: 8, 1>}, {pipeline_mode = #tpu.pipeline_mode<synchronous>, transform_indices = @transform_10, window_bounds = array<i64: 2, 3, 256>}]} {
    %c0 = arith.constant 0 : index
    %c0_0 = arith.constant 0 : index
    %c0_1 = arith.constant 0 : index
    %0 = vector.load %arg1[%c0, %c0_0, %c0_1] : memref<2x64x64xf32, #tpu.memory_space<vmem>>, vector<1x64x64xf32>
    %1 = vector.shape_cast %0 : vector<1x64x64xf32> to vector<64x64xf32>
    %c1 = arith.constant 1 : index
    %c0_2 = arith.constant 0 : index
    %c0_3 = arith.constant 0 : index
    %2 = vector.load %arg1[%c1, %c0_2, %c0_3] : memref<2x64x64xf32, #tpu.memory_space<vmem>>, vector<1x64x64xf32>
    %3 = vector.shape_cast %2 : vector<1x64x64xf32> to vector<64x64xf32>
    %4 = tpu.concatenate %1, %3 in 1 : vector<64x64xf32>, vector<64x64xf32> -> vector<64x128xf32>
    %c0_4 = arith.constant 0 : index
    %c0_5 = arith.constant 0 : index
    %5 = vector.load %arg4[%c0_4, %c0_5] : memref<9x128xf32, #tpu.memory_space<vmem>>, vector<9x128xf32>
    %c9_i32 = arith.constant 9 : i32
    %6 = tpu.dynamic_rotate %4 by %c9_i32 dim 1 : vector<64x128xf32>, i32 -> vector<64x128xf32>
    %7 = vector.extract_strided_slice %5 {offsets = [0, 0], sizes = [1, 128], strides = [1, 1]} : vector<9x128xf32> to vector<1x128xf32>
    %8 = vector.broadcast %7 : vector<1x128xf32> to vector<64x128xf32>
    %9 = arith.mulf %6, %8 : vector<64x128xf32>
    %c8_i32 = arith.constant 8 : i32
    %10 = tpu.dynamic_rotate %4 by %c8_i32 dim 1 : vector<64x128xf32>, i32 -> vector<64x128xf32>
    %11 = vector.extract_strided_slice %5 {offsets = [1, 0], sizes = [1, 128], strides = [1, 1]} : vector<9x128xf32> to vector<1x128xf32>
    %12 = vector.broadcast %11 : vector<1x128xf32> to vector<64x128xf32>
    %13 = arith.mulf %10, %12 : vector<64x128xf32>
    %c7_i32 = arith.constant 7 : i32
    %14 = tpu.dynamic_rotate %4 by %c7_i32 dim 1 : vector<64x128xf32>, i32 -> vector<64x128xf32>
    %15 = vector.extract_strided_slice %5 {offsets = [2, 0], sizes = [1, 128], strides = [1, 1]} : vector<9x128xf32> to vector<1x128xf32>
    %16 = vector.broadcast %15 : vector<1x128xf32> to vector<64x128xf32>
    %17 = arith.mulf %14, %16 : vector<64x128xf32>
    %c1_i32 = arith.constant 1 : i32
    %18 = tpu.dynamic_rotate %4 by %c1_i32 dim 1 : vector<64x128xf32>, i32 -> vector<64x128xf32>
    %19 = vector.extract_strided_slice %5 {offsets = [3, 0], sizes = [1, 128], strides = [1, 1]} : vector<9x128xf32> to vector<1x128xf32>
    %20 = vector.broadcast %19 : vector<1x128xf32> to vector<64x128xf32>
    %21 = arith.mulf %18, %20 : vector<64x128xf32>
    %22 = vector.extract_strided_slice %5 {offsets = [4, 0], sizes = [1, 128], strides = [1, 1]} : vector<9x128xf32> to vector<1x128xf32>
    %23 = vector.broadcast %22 : vector<1x128xf32> to vector<64x128xf32>
    %24 = arith.mulf %4, %23 : vector<64x128xf32>
    %c127_i32 = arith.constant 127 : i32
    %25 = tpu.dynamic_rotate %4 by %c127_i32 dim 1 : vector<64x128xf32>, i32 -> vector<64x128xf32>
    %26 = vector.extract_strided_slice %5 {offsets = [5, 0], sizes = [1, 128], strides = [1, 1]} : vector<9x128xf32> to vector<1x128xf32>
    %27 = vector.broadcast %26 : vector<1x128xf32> to vector<64x128xf32>
    %28 = arith.mulf %25, %27 : vector<64x128xf32>
    %c121_i32 = arith.constant 121 : i32
    %29 = tpu.dynamic_rotate %4 by %c121_i32 dim 1 : vector<64x128xf32>, i32 -> vector<64x128xf32>
    %30 = vector.extract_strided_slice %5 {offsets = [6, 0], sizes = [1, 128], strides = [1, 1]} : vector<9x128xf32> to vector<1x128xf32>
    %31 = vector.broadcast %30 : vector<1x128xf32> to vector<64x128xf32>
    %32 = arith.mulf %29, %31 : vector<64x128xf32>
    %c120_i32 = arith.constant 120 : i32
    %33 = tpu.dynamic_rotate %4 by %c120_i32 dim 1 : vector<64x128xf32>, i32 -> vector<64x128xf32>
    %34 = vector.extract_strided_slice %5 {offsets = [7, 0], sizes = [1, 128], strides = [1, 1]} : vector<9x128xf32> to vector<1x128xf32>
    %35 = vector.broadcast %34 : vector<1x128xf32> to vector<64x128xf32>
    %36 = arith.mulf %33, %35 : vector<64x128xf32>
    %c119_i32 = arith.constant 119 : i32
    %37 = tpu.dynamic_rotate %4 by %c119_i32 dim 1 : vector<64x128xf32>, i32 -> vector<64x128xf32>
    %38 = vector.extract_strided_slice %5 {offsets = [8, 0], sizes = [1, 128], strides = [1, 1]} : vector<9x128xf32> to vector<1x128xf32>
    %39 = vector.broadcast %38 : vector<1x128xf32> to vector<64x128xf32>
    %40 = arith.mulf %37, %39 : vector<64x128xf32>
    %41 = tpu.concatenate %9, %13, %17, %21, %24, %28, %32, %36, %40 in 0 : vector<64x128xf32>, vector<64x128xf32>, vector<64x128xf32>, vector<64x128xf32>, vector<64x128xf32>, vector<64x128xf32>, vector<64x128xf32>, vector<64x128xf32>, vector<64x128xf32> -> vector<576x128xf32>
    %42 = arith.truncf %41 : vector<576x128xf32> to vector<576x128xbf16>
    %c0_6 = arith.constant 0 : index
    %c0_7 = arith.constant 0 : index
    %43 = vector.load %arg2[%c0_6, %c0_7] : memref<64x576xbf16, #tpu.memory_space<vmem>>, vector<64x576xbf16>
    %cst = arith.constant dense<0.000000e+00> : vector<64x128xf32>
    %44 = tpu.matmul %43, %42, %cst {dimension_numbers = #tpu.dot_dimension_numbers<[1], [0], [0], [1], [0, 0, 1, 1], [], []>} : vector<64x576xbf16>, vector<576x128xbf16>, vector<64x128xf32> -> vector<64x128xf32>
    %c0_8 = arith.constant 0 : index
    %c0_9 = arith.constant 0 : index
    %45 = vector.load %arg3[%c0_8, %c0_9] : memref<64x1xf32, #tpu.memory_space<vmem>>, vector<64x1xf32>
    %46 = vector.broadcast %45 : vector<64x1xf32> to vector<64x128xf32>
    %47 = arith.addf %44, %46 : vector<64x128xf32>
    %cst_10 = arith.constant 0.000000e+00 : f32
    %48 = vector.broadcast %cst_10 : f32 to vector<64x128xf32>
    %49 = arith.maximumf %47, %48 : vector<64x128xf32>
    %cst_11 = arith.constant dense<0.000000e+00> : vector<64xf32>
    %50 = vector.multi_reduction <add>, %49, %cst_11 [1] : vector<64x128xf32> to vector<64xf32>
    %51 = vector.shape_cast %50 : vector<64xf32> to vector<64x1xf32>
    %cst_12 = arith.constant 7.812500e-03 : f32
    %52 = vector.broadcast %cst_12 : f32 to vector<64x1xf32>
    %53 = arith.mulf %51, %52 : vector<64x1xf32>
    %54 = arith.mulf %49, %49 : vector<64x128xf32>
    %cst_13 = arith.constant dense<0.000000e+00> : vector<64xf32>
    %55 = vector.multi_reduction <add>, %54, %cst_13 [1] : vector<64x128xf32> to vector<64xf32>
    %56 = vector.shape_cast %55 : vector<64xf32> to vector<64x1xf32>
    %cst_14 = arith.constant 7.812500e-03 : f32
    %57 = vector.broadcast %cst_14 : f32 to vector<64x1xf32>
    %58 = arith.mulf %56, %57 : vector<64x1xf32>
    %59 = arith.mulf %53, %53 : vector<64x1xf32>
    %60 = arith.subf %58, %59 : vector<64x1xf32>
    %c0_15 = arith.constant 0 : index
    %c0_16 = arith.constant 0 : index
    %61 = vector.load %arg5[%c0_15, %c0_16] : memref<64x1xf32, #tpu.memory_space<vmem>>, vector<64x1xf32>
    %cst_17 = arith.constant 9.99999974E-6 : f32
    %62 = vector.broadcast %cst_17 : f32 to vector<64x1xf32>
    %63 = arith.addf %60, %62 : vector<64x1xf32>
    %64 = math.rsqrt %63 : vector<64x1xf32>
    %65 = arith.mulf %61, %64 : vector<64x1xf32>
    %c0_18 = arith.constant 0 : index
    %c0_19 = arith.constant 0 : index
    %66 = vector.load %arg6[%c0_18, %c0_19] : memref<64x1xf32, #tpu.memory_space<vmem>>, vector<64x1xf32>
    %67 = arith.mulf %53, %65 : vector<64x1xf32>
    %68 = arith.subf %66, %67 : vector<64x1xf32>
    %69 = vector.broadcast %65 : vector<64x1xf32> to vector<64x128xf32>
    %70 = arith.mulf %49, %69 : vector<64x128xf32>
    %71 = vector.broadcast %68 : vector<64x1xf32> to vector<64x128xf32>
    %72 = arith.addf %70, %71 : vector<64x128xf32>
    %73 = arith.truncf %72 : vector<64x128xf32> to vector<64x128xbf16>
    %c0_20 = arith.constant 0 : index
    %c0_21 = arith.constant 0 : index
    %74 = vector.load %arg7[%c0_20, %c0_21] : memref<128x512xbf16, #tpu.memory_space<vmem>>, vector<128x512xbf16>
    %cst_22 = arith.constant dense<0.000000e+00> : vector<64x512xf32>
    %75 = tpu.matmul %73, %74, %cst_22 {dimension_numbers = #tpu.dot_dimension_numbers<[1], [0], [0], [1], [0, 0, 1, 1], [], []>} : vector<64x128xbf16>, vector<128x512xbf16>, vector<64x512xf32> -> vector<64x512xf32>
    %c0_23 = arith.constant 0 : index
    %c0_24 = arith.constant 0 : index
    %76 = vector.load %arg8[%c0_23, %c0_24] : memref<9x512xf32, #tpu.memory_space<vmem>>, vector<9x512xf32>
    %c17_i32 = arith.constant 17 : i32
    %77 = tpu.dynamic_rotate %75 by %c17_i32 dim 1 : vector<64x512xf32>, i32 -> vector<64x512xf32>
    %78 = vector.extract_strided_slice %76 {offsets = [0, 0], sizes = [1, 512], strides = [1, 1]} : vector<9x512xf32> to vector<1x512xf32>
    %79 = vector.broadcast %78 : vector<1x512xf32> to vector<64x512xf32>
    %80 = arith.mulf %77, %79 : vector<64x512xf32>
    %c16_i32 = arith.constant 16 : i32
    %81 = tpu.dynamic_rotate %75 by %c16_i32 dim 1 : vector<64x512xf32>, i32 -> vector<64x512xf32>
    %82 = vector.extract_strided_slice %76 {offsets = [1, 0], sizes = [1, 512], strides = [1, 1]} : vector<9x512xf32> to vector<1x512xf32>
    %83 = vector.broadcast %82 : vector<1x512xf32> to vector<64x512xf32>
    %84 = arith.mulf %81, %83 : vector<64x512xf32>
    %c15_i32 = arith.constant 15 : i32
    %85 = tpu.dynamic_rotate %75 by %c15_i32 dim 1 : vector<64x512xf32>, i32 -> vector<64x512xf32>
    %86 = vector.extract_strided_slice %76 {offsets = [2, 0], sizes = [1, 512], strides = [1, 1]} : vector<9x512xf32> to vector<1x512xf32>
    %87 = vector.broadcast %86 : vector<1x512xf32> to vector<64x512xf32>
    %88 = arith.mulf %85, %87 : vector<64x512xf32>
    %c1_i32_25 = arith.constant 1 : i32
    %89 = tpu.dynamic_rotate %75 by %c1_i32_25 dim 1 : vector<64x512xf32>, i32 -> vector<64x512xf32>
    %90 = vector.extract_strided_slice %76 {offsets = [3, 0], sizes = [1, 512], strides = [1, 1]} : vector<9x512xf32> to vector<1x512xf32>
    %91 = vector.broadcast %90 : vector<1x512xf32> to vector<64x512xf32>
    %92 = arith.mulf %89, %91 : vector<64x512xf32>
    %93 = vector.extract_strided_slice %76 {offsets = [4, 0], sizes = [1, 512], strides = [1, 1]} : vector<9x512xf32> to vector<1x512xf32>
    %94 = vector.broadcast %93 : vector<1x512xf32> to vector<64x512xf32>
    %95 = arith.mulf %75, %94 : vector<64x512xf32>
    %c511_i32 = arith.constant 511 : i32
    %96 = tpu.dynamic_rotate %75 by %c511_i32 dim 1 : vector<64x512xf32>, i32 -> vector<64x512xf32>
    %97 = vector.extract_strided_slice %76 {offsets = [5, 0], sizes = [1, 512], strides = [1, 1]} : vector<9x512xf32> to vector<1x512xf32>
    %98 = vector.broadcast %97 : vector<1x512xf32> to vector<64x512xf32>
    %99 = arith.mulf %96, %98 : vector<64x512xf32>
    %c497_i32 = arith.constant 497 : i32
    %100 = tpu.dynamic_rotate %75 by %c497_i32 dim 1 : vector<64x512xf32>, i32 -> vector<64x512xf32>
    %101 = vector.extract_strided_slice %76 {offsets = [6, 0], sizes = [1, 512], strides = [1, 1]} : vector<9x512xf32> to vector<1x512xf32>
    %102 = vector.broadcast %101 : vector<1x512xf32> to vector<64x512xf32>
    %103 = arith.mulf %100, %102 : vector<64x512xf32>
    %c496_i32 = arith.constant 496 : i32
    %104 = tpu.dynamic_rotate %75 by %c496_i32 dim 1 : vector<64x512xf32>, i32 -> vector<64x512xf32>
    %105 = vector.extract_strided_slice %76 {offsets = [7, 0], sizes = [1, 512], strides = [1, 1]} : vector<9x512xf32> to vector<1x512xf32>
    %106 = vector.broadcast %105 : vector<1x512xf32> to vector<64x512xf32>
    %107 = arith.mulf %104, %106 : vector<64x512xf32>
    %c495_i32 = arith.constant 495 : i32
    %108 = tpu.dynamic_rotate %75 by %c495_i32 dim 1 : vector<64x512xf32>, i32 -> vector<64x512xf32>
    %109 = vector.extract_strided_slice %76 {offsets = [8, 0], sizes = [1, 512], strides = [1, 1]} : vector<9x512xf32> to vector<1x512xf32>
    %110 = vector.broadcast %109 : vector<1x512xf32> to vector<64x512xf32>
    %111 = arith.mulf %108, %110 : vector<64x512xf32>
    %112 = tpu.concatenate %80, %84, %88, %92, %95, %99, %103, %107, %111 in 0 : vector<64x512xf32>, vector<64x512xf32>, vector<64x512xf32>, vector<64x512xf32>, vector<64x512xf32>, vector<64x512xf32>, vector<64x512xf32>, vector<64x512xf32>, vector<64x512xf32> -> vector<576x512xf32>
    %113 = arith.truncf %112 : vector<576x512xf32> to vector<576x512xbf16>
    %c0_26 = arith.constant 0 : index
    %c0_27 = arith.constant 0 : index
    %114 = vector.load %arg9[%c0_26, %c0_27] : memref<8x576xbf16, #tpu.memory_space<vmem>>, vector<8x576xbf16>
    %cst_28 = arith.constant dense<0.000000e+00> : vector<8x512xf32>
    %115 = tpu.matmul %114, %113, %cst_28 {dimension_numbers = #tpu.dot_dimension_numbers<[1], [0], [0], [1], [0, 0, 1, 1], [], []>} : vector<8x576xbf16>, vector<576x512xbf16>, vector<8x512xf32> -> vector<8x512xf32>
    %c0_29 = arith.constant 0 : index
    %c0_30 = arith.constant 0 : index
    %116 = vector.load %arg10[%c0_29, %c0_30] : memref<8x1xf32, #tpu.memory_space<vmem>>, vector<8x1xf32>
    %117 = vector.broadcast %116 : vector<8x1xf32> to vector<8x512xf32>
    %118 = arith.addf %115, %117 : vector<8x512xf32>
    %119 = arith.negf %118 : vector<8x512xf32>
    %120 = math.exp %119 : vector<8x512xf32>
    %cst_31 = arith.constant 1.000000e+00 : f32
    %121 = vector.broadcast %cst_31 : f32 to vector<8x512xf32>
    %122 = arith.addf %121, %120 : vector<8x512xf32>
    %123 = arith.divf %121, %122 : vector<8x512xf32>
    %124 = vector.extract_strided_slice %123 {offsets = [0, 0], sizes = [3, 256], strides = [1, 1]} : vector<8x512xf32> to vector<3x256xf32>
    %c0_32 = arith.constant 0 : index
    %c0_33 = arith.constant 0 : index
    %c0_34 = arith.constant 0 : index
    %125 = vector.load %arg11[%c0_32, %c0_33, %c0_34] : memref<2x3x256xf32, #tpu.memory_space<vmem>>, vector<1x3x256xf32>
    %126 = vector.shape_cast %125 : vector<1x3x256xf32> to vector<3x256xf32>
    %127 = vector.shape_cast %124 : vector<3x256xf32> to vector<1x3x256xf32>
    tpu.vector_store %arg11[%c0_32, %c0_33, %c0_34], %127 {strides = array<i32>} : memref<2x3x256xf32, #tpu.memory_space<vmem>>, vector<1x3x256xf32>,
    %128 = vector.extract_strided_slice %123 {offsets = [0, 256], sizes = [3, 256], strides = [1, 1]} : vector<8x512xf32> to vector<3x256xf32>
    %c1_35 = arith.constant 1 : index
    %c0_36 = arith.constant 0 : index
    %c0_37 = arith.constant 0 : index
    %129 = vector.load %arg11[%c1_35, %c0_36, %c0_37] : memref<2x3x256xf32, #tpu.memory_space<vmem>>, vector<1x3x256xf32>
    %130 = vector.shape_cast %129 : vector<1x3x256xf32> to vector<3x256xf32>
    %131 = vector.shape_cast %128 : vector<3x256xf32> to vector<1x3x256xf32>
    tpu.vector_store %arg11[%c1_35, %c0_36, %c0_37], %131 {strides = array<i32>} : memref<2x3x256xf32, #tpu.memory_space<vmem>>, vector<1x3x256xf32>,
    return
  }
  func.func @transform_0(%arg0: i32) -> (i32, i32, i32) {
    %c0_i32 = arith.constant 0 : i32
    %c0_i32_0 = arith.constant 0 : i32
    %c0_i32_1 = arith.constant 0 : i32
    %c0_i32_2 = arith.constant 0 : i32
    return %c0_i32, %c0_i32_0, %c0_i32_1 : i32, i32, i32
  }
  func.func @transform_1(%arg0: i32) -> (i32, i32) {
    %c0_i32 = arith.constant 0 : i32
    %c0_i32_0 = arith.constant 0 : i32
    %c0_i32_1 = arith.constant 0 : i32
    return %c0_i32, %c0_i32_0 : i32, i32
  }
  func.func @transform_2(%arg0: i32) -> (i32, i32) {
    %c0_i32 = arith.constant 0 : i32
    %c0_i32_0 = arith.constant 0 : i32
    %c0_i32_1 = arith.constant 0 : i32
    return %c0_i32, %c0_i32_0 : i32, i32
  }
  func.func @transform_3(%arg0: i32) -> (i32, i32) {
    %c0_i32 = arith.constant 0 : i32
    %c0_i32_0 = arith.constant 0 : i32
    %c0_i32_1 = arith.constant 0 : i32
    return %c0_i32, %c0_i32_0 : i32, i32
  }
  func.func @transform_4(%arg0: i32) -> (i32, i32) {
    %c0_i32 = arith.constant 0 : i32
    %c0_i32_0 = arith.constant 0 : i32
    %c0_i32_1 = arith.constant 0 : i32
    return %c0_i32, %c0_i32_0 : i32, i32
  }
  func.func @transform_5(%arg0: i32) -> (i32, i32) {
    %c0_i32 = arith.constant 0 : i32
    %c0_i32_0 = arith.constant 0 : i32
    %c0_i32_1 = arith.constant 0 : i32
    return %c0_i32, %c0_i32_0 : i32, i32
  }
  func.func @transform_6(%arg0: i32) -> (i32, i32) {
    %c0_i32 = arith.constant 0 : i32
    %c0_i32_0 = arith.constant 0 : i32
    %c0_i32_1 = arith.constant 0 : i32
    return %c0_i32, %c0_i32_0 : i32, i32
  }
  func.func @transform_7(%arg0: i32) -> (i32, i32) {
    %c0_i32 = arith.constant 0 : i32
    %c0_i32_0 = arith.constant 0 : i32
    %c0_i32_1 = arith.constant 0 : i32
    return %c0_i32, %c0_i32_0 : i32, i32
  }
  func.func @transform_8(%arg0: i32) -> (i32, i32) {
    %c0_i32 = arith.constant 0 : i32
    %c0_i32_0 = arith.constant 0 : i32
    %c0_i32_1 = arith.constant 0 : i32
    return %c0_i32, %c0_i32_0 : i32, i32
  }
  func.func @transform_9(%arg0: i32) -> (i32, i32) {
    %c0_i32 = arith.constant 0 : i32
    %c0_i32_0 = arith.constant 0 : i32
    %c0_i32_1 = arith.constant 0 : i32
    return %c0_i32, %c0_i32_0 : i32, i32
  }
  func.func @transform_10(%arg0: i32) -> (i32, i32, i32) {
    %c0_i32 = arith.constant 0 : i32
    %c0_i32_0 = arith.constant 0 : i32
    %c0_i32_1 = arith.constant 0 : i32
    %c0_i32_2 = arith.constant 0 : i32
    return %c0_i32, %c0_i32_0, %c0_i32_1 : i32, i32, i32
  }
}

</mosaic_0001>

<bundles_post_ra>
// kernel: decoder_forward.1
= control target key start
LH: loop header
LB: loop body
LE: loop exit
PB: predicated region body
PF: predicated region fallthrough
CT: control target
= control target key end

     0   :  { %s3339_s17 = smov 64   ;;  %vm85_vm0 = vcmask 523264   ;;  %s3340_s12 = smov 7   ;;  %v7007_v33 = vlaneseq  ;;  %s6994_s0 = inlined_call_operand.vmem [shape: f32[2,64,64], index: 0, kind: input, shape index: {}]   ;;  %s6995_s1 = inlined_call_operand.vmem [shape: bf16[64,576], index: 1, kind: input, shape index: {}]   ;;  %s6996_s3 = inlined_call_operand.vmem [shape: f32[9,128], index: 3, kind: input, shape index: {}]   ;;  %s6997_s2 = inlined_call_operand.vmem [shape: f32[64,1], index: 2, kind: input, shape index: {}]   ;;  %s6998_s6 = inlined_call_operand.vmem [shape: bf16[128,512], index: 6, kind: input, shape index: {}]   ;;  %s6999_s4 = inlined_call_operand.vmem [shape: f32[64,1], index: 4, kind: input, shape index: {}]   ;;  %s7000_s5 = inlined_call_operand.vmem [shape: f32[64,1], index: 5, kind: input, shape index: {}]   ;;  %s7001_s7 = inlined_call_operand.vmem [shape: f32[9,512], index: 7, kind: input, shape index: {}]   ;;  %s7002_s8 = inlined_call_operand.vmem [shape: bf16[8,576], index: 8, kind: input, shape index: {}]   ;;  %s7003_s9 = inlined_call_operand.vmem [shape: f32[8,1], index: 9, kind: input, shape index: {}]   ;;  %s7004_s10 = inlined_call_operand.vmem [shape: f32[2,3,256], index: 10, kind: output, shape index: {}]  }
   0x1   :  { %v2997_v0 = vld [vmem:[%s6994_s0 + $0x40] sm:$0xff]  ;;  %v2999_v1 = vld [vmem:[%s6994_s0 + $0x50] sm:$0xff]  ;;  %v2998_v2 = vld [vmem:[%s6994_s0 + $0x48] sm:$0xff]  ;;  %s3342_s28 = smov 1   ;;  %s3344_s29 = smov 121  }
   0x2   :  { %61 = vrot.lane.b32.xlu0 %v2997_v0, %s3339_s17  ;;  %65 = vrot.lane.b32.xlu1 %v2999_v1, %s3339_s17  ;;  %v3000_v3 = vld [vmem:[%s6994_s0 + $0x58] sm:$0xff]  ;;  %v3001_v4 = vld [vmem:[%s6994_s0 + $0x60] sm:$0xff]  ;;  %s3345_s30 = smov 120   ;;  %s3346_s11 = smov 127   ;;  %v3572_v34 = vshrl.u32 %v7007_v33, 7 }
   0x3   :  { %v3002_v5 = vld [vmem:[%s6994_s0 + $0x68] sm:$0xff]  ;;  %v3003_v6 = vld [vmem:[%s6994_s0 + $0x70] sm:$0xff]  ;;  %v3004_v7 = vld [vmem:[%s6994_s0 + $0x78] sm:$0xff]  ;;  %s3347_s14 = smov 119   ;;  %s3349_s23 = smov 17  }
   0x4   :  { %v36_v8 = vld [vmem:[%s6994_s0] sm:$0xff]  ;;  %v37_v11 = vld [vmem:[%s6994_s0 + $0x8] sm:$0xff]  ;;  %v38_v13 = vld [vmem:[%s6994_s0 + $0x10] sm:$0xff]  ;;  %v3575_v35 = vsub.s32 2, %v3572_v34  ;;  %v3589_v39 = vsub.s32 0, %v3572_v34  ;;  %s3350_s24 = smov 16  }
   0x5   :  { %v39_v18 = vld [vmem:[%s6994_s0 + $0x18] sm:$0xff]  ;;  %v40_v20 = vld [vmem:[%s6994_s0 + $0x20] sm:$0xff]  ;;  %v41_v24 = vld [vmem:[%s6994_s0 + $0x28] sm:$0xff]  ;;  %s3351_s25 = smov 15   ;;  %s3352_s26 = smov 113  }
   0x6   :  { %63 = vrot.lane.b32.xlu0 %v2998_v2, %s3339_s17  ;;  %67 = vrot.lane.b32.xlu1 %v3000_v3, %s3339_s17  ;;  %v42_v27 = vld [vmem:[%s6994_s0 + $0x30] sm:$0xff]  ;;  %v43_v30 = vld [vmem:[%s6994_s0 + $0x38] sm:$0xff]  ;;  %s3343_s0 = smov 8   ;;  %s3353_s27 = smov 112  }
   0x7   :  { %v3220_v32 = vld [vmem:[%s6995_s1 + $0x4] ss:$20 sps:$4 sm:$0xff]   ;;  %v3232_v40 = vld [vmem:[%s6995_s1 + $0xc] ss:$20 sps:$4 sm:$0xff]  }
   0x8   :  { %584 = vmatprep.mubr.bf16.mxu0 %v3220_v32  ;;  %v3584_v36 = vld [vmem:[%s6996_s3] sm:$0xff]  ;;  %649 = vmatprep.mubr.bf16.mxu1 %v3232_v40  ;;  %v3630_v32 = vsub.s32 1, %v3572_v34 }
   0x9   :  { %v171_v38 = vrot.slane %v3584_v36, %v3575_v35  ;;  %v115_v45 = vrot.slane %v3584_v36, %v3589_v39 }
   0xa   :  { %69 = vrot.lane.b32.xlu0 %v3001_v4, %s3339_s17  ;;  %71 = vrot.lane.b32.xlu1 %v3002_v5, %s3339_s17 }
   0xe   :  { %73 = vrot.lane.b32.xlu0 %v3003_v6, %s3339_s17  ;;  %75 = vrot.lane.b32.xlu1 %v3004_v7, %s3339_s17  ;;  %s3341_s17 = smov 9  }
  0x74   :  { %v62_v9 = vpop.permute.xlu0 %61  ;;  %v66_v12 = vpop.permute.xlu1 %65 }
  0x75   :  { %v3438_v10 = vsel %vm85_vm0, %v36_v8, %v62_v9  ;;  %v3455_v16 = vsel %vm85_vm0, %v38_v13, %v66_v12  ;;  %v3611_v13 = vsub.s32 3, %v3572_v34 }
  0x76   :  { %152 = vrot.lane.b32.xlu0 %v3438_v10, %s3340_s12 }
  0x78   :  { %v64_v14 = vpop.permute.xlu0 %63  ;;  %v68_v17 = vpop.permute.xlu1 %67 }
  0x79   :  { %v3449_v15 = vsel %vm85_vm0, %v37_v11, %v64_v14  ;;  %v3467_v21 = vsel %vm85_vm0, %v39_v18, %v68_v17  ;;  %v7005_v14 = vmov 0   ;;  %v393_v17 = vld [vmem:[%s6997_s2 + $0x8] sm:$0xff]  ;;  %v392_v18 = vld [vmem:[%s6997_s2] sm:$0xff] }
  0x7a   :  { %154 = vrot.lane.b32.xlu1 %v3449_v15, %s3340_s12  ;;  %96 = vrot.lane.b32.xlu0 %v3438_v10, %s3341_s17 }
  0x7b   :  { %3217 = vset.pattern.permute.xlu1 %v7005_v14  ;;  %3216 = vset.pattern.permute.xlu0 %v7005_v14 }
  0x7c   :  { %v70_v19 = vpop.permute.xlu0 %69  ;;  %v72_v23 = vpop.permute.xlu1 %71 }
  0x7d   :  { %v3473_v22 = vsel %vm85_vm0, %v40_v20, %v70_v19  ;;  %v3482_v25 = vsel %vm85_vm0, %v41_v24, %v72_v23  ;;  %v394_v20 = vld [vmem:[%s6997_s2 + $0x10] sm:$0xff] }
  0x7e   :  { %98 = vrot.lane.b32.xlu1 %v3449_v15, %s3341_s17  ;;  %156 = vrot.lane.b32.xlu0 %v3455_v16, %s3340_s12 }
  0x80   :  { %v74_v26 = vpop.permute.xlu0 %73  ;;  %v76_v29 = vpop.permute.xlu1 %75 }
  0x81   :  { %v3491_v28 = vsel %vm85_vm0, %v42_v27, %v74_v26  ;;  %v3500_v31 = vsel %vm85_vm0, %v43_v30, %v76_v29  ;;  %v395_v26 = vld [vmem:[%s6997_s2 + $0x18] sm:$0xff]  ;;  %v199_v30 = vrot.slane %v3584_v36, %v3611_v13 }
  0x82   :  { %158 = vrot.lane.b32.xlu1 %v3467_v21, %s3340_s12  ;;  %100 = vrot.lane.b32.xlu0 %v3455_v16, %s3341_s17 }
  0x86   :  { %102 = vrot.lane.b32.xlu1 %v3467_v21, %s3341_s17  ;;  %160 = vrot.lane.b32.xlu0 %v3473_v22, %s3340_s12 }
  0x8a   :  { %162 = vrot.lane.b32.xlu1 %v3482_v25, %s3340_s12  ;;  %104 = vrot.lane.b32.xlu0 %v3473_v22, %s3341_s17 }
  0x8e   :  { %106 = vrot.lane.b32.xlu1 %v3482_v25, %s3341_s17  ;;  %164 = vrot.lane.b32.xlu0 %v3491_v28, %s3340_s12 }
  0x92   :  { %166 = vrot.lane.b32.xlu1 %v3500_v31, %s3340_s12  ;;  %108 = vrot.lane.b32.xlu0 %v3491_v28, %s3341_s17 }
  0x96   :  { %110 = vrot.lane.b32.xlu1 %v3500_v31, %s3341_s17  ;;  %180 = vrot.lane.b32.xlu0 %v3438_v10, %s3342_s28 }
  0x9a   :  { %182 = vrot.lane.b32.xlu1 %v3449_v15, %s3342_s28  ;;  %124 = vrot.lane.b32.xlu0 %v3438_v10, %s3343_s0 }
  0x9e   :  { %126 = vrot.lane.b32.xlu1 %v3449_v15, %s3343_s0  ;;  %184 = vrot.lane.b32.xlu0 %v3455_v16, %s3342_s28 }
  0xa2   :  { %186 = vrot.lane.b32.xlu1 %v3467_v21, %s3342_s28  ;;  %128 = vrot.lane.b32.xlu0 %v3455_v16, %s3343_s0 }
  0xa6   :  { %130 = vrot.lane.b32.xlu1 %v3467_v21, %s3343_s0  ;;  %188 = vrot.lane.b32.xlu0 %v3473_v22, %s3342_s28 }
  0xaa   :  { %190 = vrot.lane.b32.xlu1 %v3482_v25, %s3342_s28  ;;  %132 = vrot.lane.b32.xlu0 %v3473_v22, %s3343_s0 }
  0xae   :  { %134 = vrot.lane.b32.xlu1 %v3482_v25, %s3343_s0  ;;  %192 = vrot.lane.b32.xlu0 %v3491_v28, %s3342_s28 }
  0xb2   :  { %194 = vrot.lane.b32.xlu1 %v3500_v31, %s3342_s28  ;;  %248 = vrot.lane.b32.xlu0 %v3438_v10, %s3344_s29 }
  0xb6   :  { %250 = vrot.lane.b32.xlu1 %v3449_v15, %s3344_s29  ;;  %136 = vrot.lane.b32.xlu0 %v3491_v28, %s3343_s0 }
  0xba   :  { %138 = vrot.lane.b32.xlu1 %v3500_v31, %s3343_s0  ;;  %252 = vrot.lane.b32.xlu0 %v3455_v16, %s3344_s29  ;;  %s3354_s0 = smov 111  }
  0xbe   :  { %254 = vrot.lane.b32.xlu1 %v3467_v21, %s3344_s29  ;;  %256 = vrot.lane.b32.xlu0 %v3473_v22, %s3344_s29 }
  0xc2   :  { %258 = vrot.lane.b32.xlu1 %v3482_v25, %s3344_s29  ;;  %260 = vrot.lane.b32.xlu0 %v3491_v28, %s3344_s29 }
  0xc6   :  { %262 = vrot.lane.b32.xlu1 %v3500_v31, %s3344_s29  ;;  %276 = vrot.lane.b32.xlu0 %v3438_v10, %s3345_s30 }
  0xca   :  { %278 = vrot.lane.b32.xlu1 %v3449_v15, %s3345_s30  ;;  %220 = vrot.lane.b32.xlu0 %v3438_v10, %s3346_s11 }
  0xce   :  { %222 = vrot.lane.b32.xlu1 %v3449_v15, %s3346_s11  ;;  %280 = vrot.lane.b32.xlu0 %v3455_v16, %s3345_s30 }
  0xd2   :  { %282 = vrot.lane.b32.xlu1 %v3467_v21, %s3345_s30  ;;  %304 = vrot.lane.b32.xlu0 %v3438_v10, %s3347_s14 }
  0xd6   :  { %306 = vrot.lane.b32.xlu1 %v3449_v15, %s3347_s14  ;;  %224 = vrot.lane.b32.xlu0 %v3455_v16, %s3346_s11 }
  0xda   :  { %226 = vrot.lane.b32.xlu1 %v3467_v21, %s3346_s11  ;;  %284 = vrot.lane.b32.xlu0 %v3473_v22, %s3345_s30 }
  0xde   :  { %286 = vrot.lane.b32.xlu1 %v3482_v25, %s3345_s30  ;;  %308 = vrot.lane.b32.xlu0 %v3455_v16, %s3347_s14 }
  0xe2   :  { %310 = vrot.lane.b32.xlu1 %v3467_v21, %s3347_s14  ;;  %228 = vrot.lane.b32.xlu0 %v3473_v22, %s3346_s11 }
  0xe6   :  { %230 = vrot.lane.b32.xlu1 %v3482_v25, %s3346_s11  ;;  %288 = vrot.lane.b32.xlu0 %v3491_v28, %s3345_s30 }
  0xe8   :  { %v153_v37 = vpop.permute.xlu0 %152 }
  0xe9   :  { %v172_v43 = vmul.f32 %v171_v38, %v153_v37 }
  0xea   :  { %290 = vrot.lane.b32.xlu1 %v3500_v31, %s3345_s30  ;;  %312 = vrot.lane.b32.xlu0 %v3473_v22, %s3347_s14 }
  0xec   :  { %v155_v41 = vpop.permute.xlu1 %154  ;;  %v97_v42 = vpop.permute.xlu0 %96 }
  0xed   :  { %v173_v44 = vmul.f32 %v171_v38, %v155_v41  ;;  %v116_v49 = vmul.f32 %v115_v45, %v97_v42  ;;  %v397_v42 = vld [vmem:[%s6997_s2 + $0x28] sm:$0xff] }
  0xee   :  { %314 = vrot.lane.b32.xlu1 %v3482_v25, %s3347_s14  ;;  %232 = vrot.lane.b32.xlu0 %v3491_v28, %s3346_s11 }
  0xef   :  { %v340_v46 = vpack.c.bf16 %v173_v44, %v172_v43 }
  0xf0   :  { %v99_v47 = vpop.permute.xlu1 %98  ;;  %v157_v48 = vpop.permute.xlu0 %156 }
  0xf1   :  { %v117_v50 = vmul.f32 %v115_v45, %v99_v47  ;;  %3078 = vmatprep.subr.bf16.mxu0 %v340_v46  ;;  %v174_v54 = vmul.f32 %v171_v38, %v157_v48  ;;  %v398_v47 = vld [vmem:[%s6997_s2 + $0x30] sm:$0xff] }
  0xf2   :  { %234 = vrot.lane.b32.xlu1 %v3500_v31, %s3346_s11  ;;  %316 = vrot.lane.b32.xlu0 %v3491_v28, %s3347_s14 }
  0xf3   :  { %v332_v51 = vpack.c.bf16 %v117_v50, %v116_v49  ;;  %v399_v50 = vld [vmem:[%s6997_s2 + $0x38] sm:$0xff] }
  0xf4   :  { %v159_v52 = vpop.permute.xlu1 %158  ;;  %v101_v53 = vpop.permute.xlu0 %100 }
  0xf5   :  { %v175_v55 = vmul.f32 %v171_v38, %v159_v52  ;;  %3079 = vmatpush3.bf16.msra.mxu0 %v332_v51  ;;  %v118_v59 = vmul.f32 %v115_v45, %v101_v53 }
  0xf6   :  { %318 = vrot.lane.b32.xlu1 %v3500_v31, %s3347_s14  ;;  %402 = vperm.xlu0 %3216, %v392_v18  }
  0xf7   :  { %v341_v56 = vpack.c.bf16 %v175_v55, %v174_v54 }
  0xf8   :  { %v103_v57 = vpop.permute.xlu1 %102  ;;  %v161_v58 = vpop.permute.xlu0 %160 }
  0xf9   :  { %v119_v60 = vmul.f32 %v115_v45, %v103_v57  ;;  %3080 = vmatprep.subr.bf16.mxu0 %v341_v56  ;;  %v176_v62 = vmul.f32 %v171_v38, %v161_v58 }
  0xfa   :  { %407 = vperm.xlu1 %3217, %v393_v17   ;;  %417 = vperm.xlu0 %3216, %v395_v26  }
  0xfb   :  { %v333_v61 = vpack.c.bf16 %v119_v60, %v118_v59 }
  0xfc   :  { %v163_v63 = vpop.permute.xlu1 %162  ;;  %v105_v0 = vpop.permute.xlu0 %104 }
  0xfd   :  { %v177_v1 = vmul.f32 %v171_v38, %v163_v63  ;;  %3081 = vmatpush3.bf16.msra.mxu0 %v333_v61  ;;  %v120_v5 = vmul.f32 %v115_v45, %v105_v0 }
  0xfe   :  { %412 = vperm.xlu1 %3217, %v394_v20   ;;  %427 = vperm.xlu0 %3216, %v397_v42  }
  0xff   :  { %v342_v2 = vpack.c.bf16 %v177_v1, %v176_v62 }
 0x100   :  { %v107_v3 = vpop.permute.xlu1 %106  ;;  %v165_v4 = vpop.permute.xlu0 %164 }
 0x101   :  { %v121_v6 = vmul.f32 %v115_v45, %v107_v3  ;;  %3082 = vmatprep.subr.bf16.mxu0 %v342_v2  ;;  %v178_v8 = vmul.f32 %v171_v38, %v165_v4 }
 0x102   :  { %437 = vperm.xlu0 %3216, %v399_v50  }
 0x103   :  { %v334_v7 = vpack.c.bf16 %v121_v6, %v120_v5 }
 0x104   :  { %v167_v9 = vpop.permute.xlu1 %166  ;;  %v109_v11 = vpop.permute.xlu0 %108 }
 0x105   :  { %v179_v12 = vmul.f32 %v171_v38, %v167_v9  ;;  %3083 = vmatpush3.bf16.msra.mxu0 %v334_v7  ;;  %v122_v27 = vmul.f32 %v115_v45, %v109_v11  ;;  %v396_v38 = vld [vmem:[%s6997_s2 + $0x20] sm:$0xff]  ;;  %v3647_v9 = vsub.s32 6, %v3572_v34  ;;  %v3650_v11 = vsub.s32 4, %v3572_v34 }
 0x106   :  { %422 = vperm.xlu1 %3217, %v396_v38  }
 0x107   :  { %v343_v19 = vpack.c.bf16 %v179_v12, %v178_v8  ;;  %7250 = vst [vmem:[#allocation2_spill] sm:$0xff] %v3647_v9 }
 0x108   :  { %v111_v23 = vpop.permute.xlu1 %110  ;;  %v181_v24 = vpop.permute.xlu0 %180 }
 0x109   :  { %v123_v29 = vmul.f32 %v115_v45, %v111_v23  ;;  %3084 = vmatprep.subr.bf16.mxu0 %v343_v19  ;;  %v200_v43 = vmul.f32 %v199_v30, %v181_v24  ;;  %v143_v45 = vrot.slane %v3584_v36, %v3630_v32  ;;  %v267_v23 = vrot.slane %v3584_v36, %v3647_v9 }
 0x10a   :  { %432 = vperm.xlu1 %3217, %v398_v47   ;;  %v211_v24 = vrot.slane %v3584_v36, %v3650_v11 }
 0x10b   :  { %v335_v37 = vpack.c.bf16 %v123_v29, %v122_v27 }
 0x10c   :  { %v183_v40 = vpop.permute.xlu1 %182  ;;  %v125_v41 = vpop.permute.xlu0 %124 }
 0x10d   :  { %v201_v44 = vmul.f32 %v199_v30, %v183_v40  ;;  %3085 = vmatpush3.bf16.msra.mxu0 %v335_v37  ;;  %v144_v51 = vmul.f32 %v143_v45, %v125_v41  ;;  %v213_v37 = vmul.f32 %v211_v24, %v3449_v15  ;;  %v212_v41 = vmul.f32 %v211_v24, %v3438_v10 }
 0x10e   :  { %v215_v15 = vmul.f32 %v211_v24, %v3467_v21 }
 0x10f   :  { %v344_v46 = vpack.c.bf16 %v201_v44, %v200_v43  ;;  %v348_v44 = vpack.c.bf16 %v213_v37, %v212_v41  ;;  %v3005_v41 = vld [vmem:[%s6996_s3 + $0x8] ss:$0 sm:$0xff] }
 0x110   :  { %v127_v48 = vpop.permute.xlu1 %126  ;;  %v185_v49 = vpop.permute.xlu0 %184 }
 0x111   :  { %v145_v52 = vmul.f32 %v143_v45, %v127_v48  ;;  %3086 = vmatprep.subr.bf16.mxu0 %v344_v46  ;;  %v202_v56 = vmul.f32 %v199_v30, %v185_v49 }
 0x113   :  { %v336_v53 = vpack.c.bf16 %v145_v52, %v144_v51  ;;  %v214_v51 = vmul.f32 %v211_v24, %v3455_v16  ;;  %v3218_v52 = vld [vmem:[%s6995_s1] ss:$20 sps:$4 sm:$0xff]   ;;  %v217_v16 = vmul.f32 %v211_v24, %v3482_v25 }
 0x114   :  { %v187_v54 = vpop.permute.xlu1 %186  ;;  %v129_v55 = vpop.permute.xlu0 %128 }
 0x115   :  { %v203_v57 = vmul.f32 %v199_v30, %v187_v54  ;;  %3087 = vmatpush3.bf16.msra.mxu0 %v336_v53  ;;  %v146_v61 = vmul.f32 %v143_v45, %v129_v55 }
 0x117   :  { %v345_v58 = vpack.c.bf16 %v203_v57, %v202_v56  ;;  %v349_v57 = vpack.c.bf16 %v215_v15, %v214_v51 }
 0x118   :  { %v131_v59 = vpop.permute.xlu1 %130  ;;  %v189_v60 = vpop.permute.xlu0 %188 }
 0x119   :  { %v147_v62 = vmul.f32 %v143_v45, %v131_v59  ;;  %3088 = vmatprep.subr.bf16.mxu0 %v345_v58  ;;  %v204_v2 = vmul.f32 %v199_v30, %v189_v60  ;;  %v216_v58 = vmul.f32 %v211_v24, %v3473_v22  ;;  %v3669_v60 = vsub.s32 7, %v3572_v34  ;;  %v3223_v22 = vld [vmem:[%s6995_s1 + $0x28] ss:$20 sps:$4 sm:$0xff]  }
 0x11b   :  { %v337_v63 = vpack.c.bf16 %v147_v62, %v146_v61  ;;  %7251 = vst [vmem:[#allocation3_spill] sm:$0xff] %v3669_v60 }
 0x11c   :  { %v191_v0 = vpop.permute.xlu1 %190  ;;  %v133_v1 = vpop.permute.xlu0 %132 }
 0x11d   :  { %v205_v3 = vmul.f32 %v199_v30, %v191_v0  ;;  %3089 = vmatpush3.bf16.msra.mxu0 %v337_v63  ;;  %v148_v7 = vmul.f32 %v143_v45, %v133_v1  ;;  %v350_v0 = vpack.c.bf16 %v217_v16, %v216_v58  ;;  %v218_v1 = vmul.f32 %v211_v24, %v3491_v28  ;;  %v3224_v28 = vld [vmem:[%s6995_s1 + $0x54] ss:$20 sps:$4 sm:$0xff]  }
 0x11f   :  { %v346_v4 = vpack.c.bf16 %v205_v3, %v204_v2  ;;  %v219_v2 = vmul.f32 %v211_v24, %v3500_v31 }
 0x120   :  { %v135_v5 = vpop.permute.xlu1 %134  ;;  %v193_v6 = vpop.permute.xlu0 %192 }
 0x121   :  { %v149_v8 = vmul.f32 %v143_v45, %v135_v5  ;;  %3090 = vmatprep.subr.bf16.mxu0 %v346_v4  ;;  %v206_v19 = vmul.f32 %v199_v30, %v193_v6  ;;  %v3678_v4 = vrot.slane %v3584_v36, %v3669_v60  ;;  %v3681_v5 = vsub.s32 5, %v3572_v34 }
 0x123   :  { %v338_v12 = vpack.c.bf16 %v149_v8, %v148_v7  ;;  %7252 = vst [vmem:[#allocation4_spill] sm:$0xff] %v3681_v5  ;;  %v351_v8 = vpack.c.bf16 %v219_v2, %v218_v1 }
 0x124   :  { %v195_v17 = vpop.permute.xlu1 %194  ;;  %v249_v18 = vpop.permute.xlu0 %248 }
 0x125   :  { %v207_v20 = vmul.f32 %v199_v30, %v195_v17  ;;  %3091 = vmatpush3.bf16.msra.mxu0 %v338_v12  ;;  %v268_v38 = vmul.f32 %v267_v23, %v249_v18  ;;  %v3690_v18 = vrot.slane %v3584_v36, %v3681_v5  ;;  %v3227_v36 = vld [vmem:[%s6995_s1 + $0x7c] ss:$20 sps:$4 sm:$0xff]  }
 0x127   :  { %v347_v26 = vpack.c.bf16 %v207_v20, %v206_v19 }
 0x128   :  { %v251_v27 = vpop.permute.xlu1 %250  ;;  %v137_v29 = vpop.permute.xlu0 %136 }
 0x129   :  { %v269_v40 = vmul.f32 %v267_v23, %v251_v27  ;;  %3092 = vmatprep.subr.bf16.mxu0 %v347_v26  ;;  %v150_v46 = vmul.f32 %v143_v45, %v137_v29 }
 0x12b   :  { %v356_v42 = vpack.c.bf16 %v269_v40, %v268_v38 }
 0x12c   :  { %v139_v43 = vpop.permute.xlu1 %138  ;;  %v253_v30 = vpop.permute.xlu0 %252 }
 0x12d   :  { %v151_v47 = vmul.f32 %v143_v45, %v139_v43  ;;  %3118 = vmatprep.subr.bf16.mxu1 %v356_v42  ;;  %v270_v10 = vmul.f32 %v267_v23, %v253_v30  ;;  %v3221_v45 = vld [vmem:[%s6995_s1 + $0x2c] ss:$20 sps:$4 sm:$0xff]  }
 0x12e   :  { %3119 = vmatpush3.bf16.msra.mxu1 %v348_v44  ;;  %v3229_v44 = vld [vmem:[%s6995_s1 + $0x78] ss:$20 sps:$4 sm:$0xff]  }
 0x12f   :  { %v339_v48 = vpack.c.bf16 %v151_v47, %v150_v46 }
 0x130   :  { %v255_v49 = vpop.permute.xlu1 %254  ;;  %v257_v50 = vpop.permute.xlu0 %256 }
 0x131   :  { %v271_v53 = vmul.f32 %v267_v23, %v255_v49  ;;  %3093 = vmatpush3.bf16.msra.mxu0 %v339_v48  ;;  %v272_v21 = vmul.f32 %v267_v23, %v257_v50  ;;  %v3233_v48 = vld [vmem:[%s6995_s1 + $0x10] ss:$20 sps:$4 sm:$0xff]  }
 0x133   :  { %v357_v54 = vpack.c.bf16 %v271_v53, %v270_v10 }
 0x134   :  { %v259_v55 = vpop.permute.xlu1 %258  ;;  %v261_v56 = vpop.permute.xlu0 %260  ;;  %585 = vmatmul.mubr.bf16.vlgmr.msra.gmra.mrb[0].mxu0 %v3218_v52 }
 0x135   :  { %v273_v59 = vmul.f32 %v267_v23, %v259_v55  ;;  %3120 = vmatprep.subr.bf16.mxu1 %v357_v54  ;;  %592 = vmatprep.mubr.bf16.mxu0 %v3221_v45  ;;  %v274_v25 = vmul.f32 %v267_v23, %v261_v56 }
 0x136   :  { %3121 = vmatpush3.bf16.msra.mxu1 %v349_v57 }
 0x137   :  { %v358_v61 = vpack.c.bf16 %v273_v59, %v272_v21 }
 0x138   :  { %v263_v62 = vpop.permute.xlu1 %262  ;;  %v277_v63 = vpop.permute.xlu0 %276 }
 0x139   :  { %v275_v3 = vmul.f32 %v267_v23, %v263_v62  ;;  %3122 = vmatprep.subr.bf16.mxu1 %v358_v61  ;;  %v296_v12 = vmul.f32 %v3678_v4, %v277_v63  ;;  %v3226_v23 = vld [vmem:[%s6995_s1 + $0x50] ss:$20 sps:$4 sm:$0xff]  }
 0x13a   :  { %3123 = vmatpush3.bf16.msra.mxu1 %v350_v0 }
 0x13b   :  { %v359_v31 = vpack.c.bf16 %v275_v3, %v274_v25 }
 0x13c   :  { %v279_v6 = vpop.permute.xlu1 %278  ;;  %v221_v7 = vpop.permute.xlu0 %220  ;;  %593 = vmatmul.mubr.bf16.gmra.mrb[4].mxu0 %v3223_v22 }
 0x13d   :  { %v297_v17 = vmul.f32 %v3678_v4, %v279_v6  ;;  %3124 = vmatprep.subr.bf16.mxu1 %v359_v31  ;;  %600 = vmatprep.mubr.bf16.mxu0 %v3224_v28  ;;  %v240_v24 = vmul.f32 %v3690_v18, %v221_v7 }
 0x13e   :  { %3125 = vmatpush3.bf16.msra.mxu1 %v351_v8 }
 0x13f   :  { %v360_v34 = vpack.c.bf16 %v297_v17, %v296_v12 }
 0x140   :  { %v223_v19 = vpop.permute.xlu1 %222  ;;  %v281_v20 = vpop.permute.xlu0 %280 }
 0x141   :  { %v241_v26 = vmul.f32 %v3690_v18, %v223_v19  ;;  %3126 = vmatprep.subr.bf16.mxu1 %v360_v34  ;;  %v298_v38 = vmul.f32 %v3678_v4, %v281_v20 }
 0x143   :  { %v352_v27 = vpack.c.bf16 %v241_v26, %v240_v24 }
 0x144   :  { %v283_v29 = vpop.permute.xlu1 %282  ;;  %v305_v37 = vpop.permute.xlu0 %304  ;;  %601 = vmatmul.mubr.bf16.gmra.mrb[8].mxu0 %v3226_v23 }
 0x145   :  { %v299_v40 = vmul.f32 %v3678_v4, %v283_v29  ;;  %3127 = vmatpush3.bf16.msra.mxu1 %v352_v27  ;;  %608 = vmatprep.mubr.bf16.mxu0 %v3227_v36  ;;  %v324_v46 = vmul.f32 %v3005_v41, %v305_v37  ;;  %v3235_v27 = vld [vmem:[%s6995_s1 + $0x34] ss:$20 sps:$4 sm:$0xff]  }
 0x146   :  { %v3241_v37 = vld [vmem:[%s6995_s1 + $0x60] ss:$20 sps:$4 sm:$0xff]  }
 0x147   :  { %v361_v42 = vpack.c.bf16 %v299_v40, %v298_v38  ;;  %v3237_v38 = vld [vmem:[%s6995_s1 + $0x30] ss:$20 sps:$4 sm:$0xff]  }
 0x148   :  { %v307_v43 = vpop.permute.xlu1 %306  ;;  %v225_v30 = vpop.permute.xlu0 %224  ;;  %v3238_v40 = vld [vmem:[%s6995_s1 + $0x5c] ss:$20 sps:$4 sm:$0xff]  }
 0x149   :  { %v325_v47 = vmul.f32 %v3005_v41, %v307_v43  ;;  %3128 = vmatprep.subr.bf16.mxu1 %v361_v42  ;;  %v242_v15 = vmul.f32 %v3690_v18, %v225_v30  ;;  %v3240_v42 = vld [vmem:[%s6995_s1 + $0x58] ss:$20 sps:$4 sm:$0xff]   ;;  %v3245_v30 = vld [vmem:[%s6995_s1 + $0x80] ss:$20 sps:$4 sm:$0xff]  }
 0x14a   :  { %v3243_v43 = vld [vmem:[%s6995_s1 + $0x84] ss:$20 sps:$4 sm:$0xff]  }
 0x14b   :  { %v364_v49 = vpack.c.bf16 %v325_v47, %v324_v46 }
 0x14c   :  { %v227_v50 = vpop.permute.xlu1 %226  ;;  %v285_v51 = vpop.permute.xlu0 %284  ;;  %609 = vmatmul.mubr.bf16.gmra.mrb[12].mxu0 %v3229_v44 }
 0x14d   :  { %v243_v52 = vmul.f32 %v3690_v18, %v227_v50  ;;  %3166 = vmatprep.subr.bf16.mxu0 %v364_v49  ;;  %3174 = vmatprep.mubr.msk.bf16.mxu0 %vm85_vm0, %v3233_v48  ;;  %v300_v54 = vmul.f32 %v3678_v4, %v285_v51 }
 0x14e   :  { %3167 = vmatpush3.bf16.msra.mxu0 %v364_v49 }
 0x14f   :  { %v353_v10 = vpack.c.bf16 %v243_v52, %v242_v15 }
 0x150   :  { %v287_v53 = vpop.permute.xlu1 %286  ;;  %v309_v45 = vpop.permute.xlu0 %308 }
 0x151   :  { %v301_v55 = vmul.f32 %v3678_v4, %v287_v53  ;;  %3129 = vmatpush3.bf16.msra.mxu1 %v353_v10  ;;  %v326_v16 = vmul.f32 %v3005_v41, %v309_v45 }
 0x153   :  { %v362_v56 = vpack.c.bf16 %v301_v55, %v300_v54 }
 0x154   :  { %v311_v57 = vpop.permute.xlu1 %310  ;;  %v229_v58 = vpop.permute.xlu0 %228 }
 0x155   :  { %v327_v21 = vmul.f32 %v3005_v41, %v311_v57  ;;  %3130 = vmatprep.subr.bf16.mxu1 %v362_v56  ;;  %v244_v63 = vmul.f32 %v3690_v18, %v229_v58 }
 0x157   :  { %v365_v59 = vpack.c.bf16 %v327_v21, %v326_v16 }
 0x158   :  { %v231_v61 = vpop.permute.xlu1 %230  ;;  %v289_v62 = vpop.permute.xlu0 %288 }
 0x159   :  { %v245_v0 = vmul.f32 %v3690_v18, %v231_v61  ;;  %3168 = vmatprep.subr.bf16.mxu0 %v365_v59  ;;  %v302_v25 = vmul.f32 %v3678_v4, %v289_v62 }
 0x15a   :  { %3169 = vmatpush3.bf16.msra.mxu0 %v365_v59 }
 0x15b   :  { %v354_v1 = vpack.c.bf16 %v245_v0, %v244_v63 }
 0x15c   :  { %v291_v2 = vpop.permute.xlu1 %290  ;;  %v313_v22 = vpop.permute.xlu0 %312 }
 0x15d   :  { %v303_v3 = vmul.f32 %v3678_v4, %v291_v2  ;;  %3131 = vmatpush3.bf16.msra.mxu1 %v354_v1  ;;  %v328_v7 = vmul.f32 %v3005_v41, %v313_v22  ;;  %v3230_v4 = vld [vmem:[%s6995_s1 + $0x8] ss:$20 sps:$4 sm:$0xff]  }
 0x15f   :  { %v363_v28 = vpack.c.bf16 %v303_v3, %v302_v25 }
 0x160   :  { %v315_v31 = vpop.permute.xlu1 %314  ;;  %v233_v6 = vpop.permute.xlu0 %232 }
 0x161   :  { %v329_v8 = vmul.f32 %v3005_v41, %v315_v31  ;;  %3132 = vmatprep.subr.bf16.mxu1 %v363_v28  ;;  %v246_v34 = vmul.f32 %v3690_v18, %v233_v6 }
 0x163   :  { %v366_v12 = vpack.c.bf16 %v329_v8, %v328_v7 }
 0x164   :  { %v235_v17 = vpop.permute.xlu1 %234  ;;  %v317_v20 = vpop.permute.xlu0 %316 }
 0x165   :  { %v247_v19 = vmul.f32 %v3690_v18, %v235_v17  ;;  %3170 = vmatprep.subr.bf16.mxu0 %v366_v12  ;;  %v330_v26 = vmul.f32 %v3005_v41, %v317_v20  ;;  %v3234_v18 = vld [vmem:[%s6995_s1 + $0x38] ss:$20 sps:$4 sm:$0xff]  }
 0x166   :  { %3171 = vmatpush3.bf16.msra.mxu0 %v366_v12 }
 0x167   :  { %v355_v23 = vpack.c.bf16 %v247_v19, %v246_v34 }
 0x168   :  { %v319_v24 = vpop.permute.xlu1 %318 }
 0x169   :  { %v331_v36 = vmul.f32 %v3005_v41, %v319_v24  ;;  %3133 = vmatpush3.bf16.msra.mxu1 %v355_v23  ;;  %v3242_v41 = vld [vmem:[%s6995_s1 + $0x88] ss:$20 sps:$4 sm:$0xff]  }
 0x16b   :  { %v367_v29 = vpack.c.bf16 %v331_v36, %v330_v26 }
 0x16c   :  { %650 = vmatmul.mubr.bf16.vlgmr.msra.gmra.mrb[0].mxu1 %v3230_v4 }
 0x16d   :  { %3172 = vmatprep.subr.bf16.mxu0 %v367_v29  ;;  %657 = vmatprep.mubr.bf16.mxu1 %v3235_v27 }
 0x16e   :  { %3173 = vmatpush3.bf16.msra.mxu0 %v367_v29 }
 0x171   :  { %3175 = vmatmul.mubr.msk.bf16.vlgmr.msra.gmra.mrb[16].mxu0 %vm85_vm0, %v3234_v18 }
 0x172   :  { %3178 = vmatprep.mubr.msk.bf16.mxu0 %vm85_vm0, %v3241_v37 }
 0x174   :  { %658 = vmatmul.mubr.bf16.gmra.mrb[4].mxu1 %v3237_v38 }
 0x175   :  { %665 = vmatprep.mubr.bf16.mxu1 %v3238_v40  ;;  %v403_v1 = vpop.permute.xlu0 %402 }
 0x179   :  { %3179 = vmatmul.mubr.msk.bf16.gmra.mrb[20].mxu0 %vm85_vm0, %v3242_v41  ;;  %v408_v22 = vpop.permute.xlu1 %407  ;;  %v418_v36 = vpop.permute.xlu0 %417 }
 0x17a   :  { %1280 = vmatprep.mubr.bf16.mxu0 %v7005_v14 }
 0x17c   :  { %666 = vmatmul.mubr.bf16.gmra.mrb[8].mxu1 %v3240_v42 }
 0x17d   :  { %673 = vmatprep.mubr.bf16.mxu1 %v3243_v43  ;;  %v413_v20 = vpop.permute.xlu1 %412 }
 0x184   :  { %674 = vmatmul.mubr.bf16.gmra.mrb[12].mxu1 %v3245_v30 }
 0x185   :  { %1207 = vmatprep.mubr.bf16.mxu1 %v7005_v14 }
 0x207   :  { %v3094_v44 = vpop.f32.mrb[0].mxu0 }
 0x208   :  { %v3095_v46 = vpop.f32.mrb[1].mxu0 }
 0x209   :  { %v3096_v47 = vadd.f32 %v3095_v46, %v3094_v44  ;;  %v3097_v48 = vpop.f32.mrb[2].mxu0 }
 0x20a   :  { %v3098_v49 = vpop.f32.mrb[3].mxu0 }
 0x20b   :  { %v3099_v50 = vadd.f32 %v3098_v49, %v3097_v48  ;;  %v587_v3 = vadd.f32 %v3096_v47, %v403_v1  ;;  %v423_v49 = vpop.permute.xlu1 %422 }
 0x20d   :  { %v590_v7 = vadd.f32 %v3099_v50, %v408_v22 }
 0x20f   :  { %v3100_v51 = vpop.f32.mrb[4].mxu0 }
 0x210   :  { %v3101_v15 = vpop.f32.mrb[5].mxu0 }
 0x211   :  { %v3102_v52 = vadd.f32 %v3101_v15, %v3100_v51  ;;  %v3103_v10 = vpop.f32.mrb[6].mxu0 }
 0x212   :  { %v3104_v53 = vpop.f32.mrb[7].mxu0 }
 0x213   :  { %v3105_v45 = vadd.f32 %v3104_v53, %v3103_v10  ;;  %v595_v37 = vadd.f32 %v3102_v52, %v413_v20  ;;  %v428_v52 = vpop.permute.xlu0 %427 }
 0x215   :  { %v598_v42 = vadd.f32 %v3105_v45, %v418_v36 }
 0x217   :  { %v3106_v54 = vpop.f32.mrb[8].mxu0 }
 0x218   :  { %v3107_v55 = vpop.f32.mrb[9].mxu0 }
 0x219   :  { %v3108_v56 = vadd.f32 %v3107_v55, %v3106_v54  ;;  %v3109_v57 = vpop.f32.mrb[10].mxu0 }
 0x21a   :  { %v3110_v58 = vpop.f32.mrb[11].mxu0 }
 0x21b   :  { %v3111_v16 = vadd.f32 %v3110_v58, %v3109_v57  ;;  %v603_v55 = vadd.f32 %v3108_v56, %v423_v49  ;;  %v3257_v49 = vld [vmem:[%s6998_s6 + $0x2c] ss:$16 sps:$4 sm:$0xff]  }
 0x21f   :  { %v3112_v21 = vpop.f32.mrb[12].mxu0 }
 0x220   :  { %v3113_v59 = vpop.f32.mrb[13].mxu0 }
 0x221   :  { %v3757_v61 = vadd.f32 %v3113_v59, %v3112_v21  ;;  %v3115_v62 = vpop.f32.mrb[14].mxu0  ;;  %v606_v59 = vadd.f32 %v3111_v16, %v428_v52  ;;  %v438_v16 = vpop.permute.xlu0 %437 }
 0x222   :  { %v3116_v63 = vpop.f32.mrb[15].mxu0 }
 0x223   :  { %v3759_v0 = vadd.f32 %v3116_v63, %v3115_v62 }
 0x23f   :  { %v3134_v2 = vpop.f32.mrb[0].mxu1 }
 0x240   :  { %v3135_v25 = vpop.f32.mrb[1].mxu1 }
 0x241   :  { %v3136_v28 = vadd.f32 %v3135_v25, %v3134_v2  ;;  %v3137_v31 = vpop.f32.mrb[2].mxu1 }
 0x242   :  { %v3138_v6 = vpop.f32.mrb[3].mxu1 }
 0x243   :  { %v3139_v8 = vadd.f32 %v3138_v6, %v3137_v31  ;;  %v652_v12 = vadd.f32 %v3136_v28, %v587_v3  ;;  %v433_v3 = vpop.permute.xlu1 %432 }
 0x244   :  { %v3176_v17 = vpop.f32.mrb[16].mxu0 }
 0x245   :  { %v716_v34 = vpop.f32.mrb[17].mxu0  ;;  %v655_v19 = vadd.f32 %v3139_v8, %v590_v7  ;;  %v611_v7 = vadd.f32 %v3757_v61, %v433_v3 }
 0x246   :  { %v717_v23 = vadd.f32 %v716_v34, %v652_v12  ;;  %v3177_v24 = vpop.f32.mrb[18].mxu0 }
 0x247   :  { %v3140_v4 = vpop.f32.mrb[4].mxu1  ;;  %v719_v26 = vpop.f32.mrb[19].mxu0 }
 0x248   :  { %v3761_v27 = vmax.f32 %v717_v23, 0.0  ;;  %v720_v29 = vadd.f32 %v719_v26, %v655_v19  ;;  %v3141_v18 = vpop.f32.mrb[5].mxu1  ;;  %v614_v19 = vadd.f32 %v3759_v0, %v438_v16 }
 0x249   :  { %v3142_v38 = vadd.f32 %v3141_v18, %v3140_v4  ;;  %v3143_v40 = vpop.f32.mrb[6].mxu1 }
 0x24a   :  { %v3144_v41 = vpop.f32.mrb[7].mxu1  ;;  %755 = vadd.xlane.f32.xlu1 %v3761_v27  ;;  %v3772_v2 = vmax.f32 %v720_v29, 0.0 }
 0x24b   :  { %v660_v43 = vadd.f32 %v3142_v38, %v595_v37  ;;  %v3145_v30 = vadd.f32 %v3144_v41, %v3143_v40 }
 0x24c   :  { %v3180_v44 = vpop.f32.mrb[20].mxu0 }
 0x24d   :  { %v663_v46 = vadd.f32 %v3145_v30, %v598_v42  ;;  %v725_v47 = vadd.f32 %v3176_v17, %v660_v43  ;;  %v732_v48 = vpop.f32.mrb[21].mxu0  ;;  %v780_v17 = vmul.f32 %v3772_v2, %v3772_v2  ;;  %v3246_v42 = vld [vmem:[%s6998_s6] ss:$16 sps:$4 sm:$0xff]   ;;  %v3248_v43 = vld [vmem:[%s6998_s6 + $0x4] ss:$16 sps:$4 sm:$0xff]  }
 0x24e   :  { %v3181_v50 = vpop.f32.mrb[22].mxu0  ;;  %v3249_v30 = vld [vmem:[%s6998_s6 + $0x8] ss:$16 sps:$4 sm:$0xff]   ;;  %1175 = vmatprep.subr.bf16.mxu1 %v3248_v43 }
 0x24f   :  { %v3146_v51 = vpop.f32.mrb[8].mxu1  ;;  %v3764_v15 = vmax.f32 %v725_v47, 0.0  ;;  %v728_v10 = vadd.f32 %v3177_v24, %v663_v46  ;;  %v735_v53 = vpop.f32.mrb[23].mxu0  ;;  %v779_v24 = vmul.f32 %v3761_v27, %v3761_v27  ;;  %v3252_v46 = vld [vmem:[%s6998_s6 + $0x20] ss:$16 sps:$4 sm:$0xff]   ;;  %1176 = vmatpush1.bf16.msra.mxu1 %v3246_v42 }
 0x250   :  { %v3147_v54 = vpop.f32.mrb[9].mxu1  ;;  %v3254_v47 = vld [vmem:[%s6998_s6 + $0x24] ss:$16 sps:$4 sm:$0xff]   ;;  %v3263_v42 = vld [vmem:[%s6998_s6 + $0x4c] ss:$16 sps:$4 sm:$0xff]  }
 0x251   :  { %v3148_v57 = vadd.f32 %v3147_v54, %v3146_v51  ;;  %v3149_v58 = vpop.f32.mrb[10].mxu1  ;;  %759 = vadd.xlane.f32.xlu0 %v3764_v15  ;;  %v3767_v45 = vmax.f32 %v728_v10, 0.0  ;;  %v781_v1 = vmul.f32 %v3764_v15, %v3764_v15  ;;  %1177 = vmatprep.subr.bf16.mxu1 %v3254_v47  ;;  %v3260_v51 = vld [vmem:[%s6998_s6 + $0x44] ss:$16 sps:$4 sm:$0xff]   ;;  %v3264_v47 = vld [vmem:[%s6998_s6 + $0x60] ss:$16 sps:$4 sm:$0xff]  }
 0x252   :  { %v3150_v21 = vpop.f32.mrb[11].mxu1 }
 0x253   :  { %v3151_v62 = vadd.f32 %v3150_v21, %v3149_v58  ;;  %761 = vadd.xlane.f32.xlu1 %v3767_v45  ;;  %v668_v63 = vadd.f32 %v3148_v57, %v603_v55  ;;  %v782_v25 = vmul.f32 %v3767_v45, %v3767_v45  ;;  %1178 = vmatpush1.bf16.msra.mxu1 %v3252_v46  ;;  %v828_v46 = vld [vmem:[%s6999_s4 + $0x8] sm:$0xff] }
 0x254   :  { %1179 = vmatprep.subr.bf16.mxu1 %v3260_v51 }
 0x255   :  { %v733_v22 = vadd.f32 %v732_v48, %v668_v63  ;;  %791 = vadd.xlane.f32.xlu0 %v781_v1  ;;  %v671_v56 = vadd.f32 %v3151_v62, %v606_v59  ;;  %v3255_v48 = vld [vmem:[%s6998_s6 + $0x28] ss:$16 sps:$4 sm:$0xff]  }
 0x257   :  { %v736_v28 = vadd.f32 %v735_v53, %v671_v56  ;;  %v3152_v31 = vpop.f32.mrb[12].mxu1  ;;  %793 = vadd.xlane.f32.xlu1 %v782_v25  ;;  %v3788_v18 = vmax.f32 %v733_v22, 0.0 }
 0x258   :  { %v3153_v6 = vpop.f32.mrb[13].mxu1 }
 0x259   :  { %v3154_v8 = vadd.f32 %v3153_v6, %v3152_v31  ;;  %v3155_v12 = vpop.f32.mrb[14].mxu1  ;;  %757 = vadd.xlane.f32.xlu0 %v3772_v2  ;;  %v3791_v0 = vmax.f32 %v736_v28, 0.0  ;;  %v783_v40 = vmul.f32 %v3788_v18, %v3788_v18 }
 0x25a   :  { %v3156_v34 = vpop.f32.mrb[15].mxu1 }
 0x25b   :  { %v676_v20 = vadd.f32 %v3154_v8, %v611_v7  ;;  %v3157_v23 = vadd.f32 %v3156_v34, %v3155_v12  ;;  %789 = vadd.xlane.f32.xlu1 %v780_v17  ;;  %v784_v41 = vmul.f32 %v3791_v0, %v3791_v0 }
 0x25d   :  { %v679_v4 = vadd.f32 %v3157_v23, %v614_v19  ;;  %787 = vadd.xlane.f32.xlu0 %v779_v24  ;;  %v741_v26 = vadd.f32 %v3180_v44, %v676_v20  ;;  %v3251_v44 = vld [vmem:[%s6998_s6 + $0xc] ss:$16 sps:$4 sm:$0xff]  }
 0x25e   :  { %1248 = vmatprep.subr.bf16.mxu0 %v3251_v44 }
 0x25f   :  { %v3783_v61 = vmax.f32 %v741_v26, 0.0  ;;  %v744_v36 = vadd.f32 %v3181_v50, %v679_v4  ;;  %1249 = vmatpush1.bf16.msra.mxu0 %v3249_v30  ;;  %v3258_v50 = vld [vmem:[%s6998_s6 + $0x40] ss:$16 sps:$4 sm:$0xff]   ;;  %v3261_v30 = vld [vmem:[%s6998_s6 + $0x48] ss:$16 sps:$4 sm:$0xff]  }
 0x260   :  { %1250 = vmatprep.subr.bf16.mxu0 %v3257_v49  ;;  %1180 = vmatpush1.bf16.msra.mxu1 %v3258_v50  ;;  %v829_v26 = vld [vmem:[%s6999_s4 + $0x10] sm:$0xff] }
 0x261   :  { %767 = vadd.xlane.f32.xlu0 %v3783_v61  ;;  %v3786_v29 = vmax.f32 %v744_v36, 0.0  ;;  %v785_v37 = vmul.f32 %v3783_v61, %v3783_v61 }
 0x263   :  { %769 = vadd.xlane.f32.xlu1 %v3786_v29  ;;  %v786_v38 = vmul.f32 %v3786_v29, %v3786_v29  ;;  %1251 = vmatpush1.bf16.msra.mxu0 %v3255_v48  ;;  %v3266_v48 = vld [vmem:[%s6998_s6 + $0x64] ss:$16 sps:$4 sm:$0xff]  }
 0x264   :  { %1252 = vmatprep.subr.bf16.mxu0 %v3263_v42  ;;  %1181 = vmatprep.subr.bf16.mxu1 %v3266_v48  ;;  %v3276_v48 = vld [vmem:[%s6998_s6 + $0xa0] ss:$16 sps:$4 sm:$0xff]  }
 0x265   :  { %763 = vadd.xlane.f32.xlu0 %v3788_v18  ;;  %1182 = vmatpush1.bf16.msra.mxu1 %v3264_v47 }
 0x267   :  { %765 = vadd.xlane.f32.xlu1 %v3791_v0  ;;  %1253 = vmatpush1.bf16.msra.mxu0 %v3261_v30 }
 0x269   :  { %799 = vadd.xlane.f32.xlu0 %v785_v37 }
 0x26b   :  { %801 = vadd.xlane.f32.xlu1 %v786_v38 }
 0x26d   :  { %795 = vadd.xlane.f32.xlu0 %v783_v40 }
 0x26f   :  { %797 = vadd.xlane.f32.xlu1 %v784_v41 }
 0x2d7   :  { %v756_v10 = vpop.xlane.xlu1 %755 }
 0x2d8   :  { %v3841_v56 = vmul.f32 0.0078125, %v756_v10  ;;  %v3267_v10 = vld [vmem:[%s6998_s6 + $0x68] ss:$16 sps:$4 sm:$0xff]  }
 0x2da   :  { %v811_v12 = vmul.f32 %v3841_v56, %v3841_v56 }
 0x2de   :  { %v760_v53 = vpop.xlane.xlu0 %759 }
 0x2df   :  { %v3833_v52 = vmul.f32 0.0078125, %v760_v53  ;;  %v3269_v53 = vld [vmem:[%s6998_s6 + $0x6c] ss:$16 sps:$4 sm:$0xff]  }
 0x2e0   :  { %v762_v54 = vpop.xlane.xlu1 %761  ;;  %1254 = vmatprep.subr.bf16.mxu0 %v3269_v53 }
 0x2e1   :  { %v3835_v55 = vmul.f32 0.0078125, %v762_v54  ;;  %v813_v58 = vmul.f32 %v3833_v52, %v3833_v52  ;;  %1255 = vmatpush1.bf16.msra.mxu0 %v3267_v10  ;;  %v862_v10 = vld [vmem:[%s7000_s5 + $0x18] sm:$0xff] }
 0x2e2   :  { %v792_v57 = vpop.xlane.xlu0 %791 }
 0x2e3   :  { %v805_v21 = vmul.f32 0.0078125, %v792_v57  ;;  %v814_v62 = vmul.f32 %v3835_v55, %v3835_v55 }
 0x2e4   :  { %v794_v59 = vpop.xlane.xlu1 %793 }
 0x2e5   :  { %v821_v63 = vsub.f32 %v805_v21, %v813_v58  ;;  %v806_v1 = vmul.f32 0.0078125, %v794_v59 }
 0x2e6   :  { %v758_v22 = vpop.xlane.xlu0 %757 }
 0x2e7   :  { %v837_v25 = vadd.f32 1e-05, %v821_v63  ;;  %v822_v3 = vsub.f32 %v806_v1, %v814_v62  ;;  %v3843_v28 = vmul.f32 0.0078125, %v758_v22  ;;  %v827_v1 = vld [vmem:[%s6999_s4] sm:$0xff]  ;;  %v830_v22 = vld [vmem:[%s6999_s4 + $0x18] sm:$0xff] }
 0x2e8   :  { %v790_v31 = vpop.xlane.xlu1 %789 }
 0x2e9   :  { %3299 = vrsqrt.f32 %v837_v25  ;;  %v812_v16 = vmul.f32 %v3843_v28, %v3843_v28  ;;  %v804_v6 = vmul.f32 0.0078125, %v790_v31  ;;  %v838_v7 = vadd.f32 1e-05, %v822_v3 }
 0x2ea   :  { %v788_v8 = vpop.xlane.xlu0 %787 }
 0x2eb   :  { %v820_v17 = vsub.f32 %v804_v6, %v812_v16  ;;  %v803_v34 = vmul.f32 0.0078125, %v788_v8  ;;  %3301 = vrsqrt.f32 %v838_v7 }
 0x2ed   :  { %v836_v19 = vadd.f32 1e-05, %v820_v17  ;;  %v819_v20 = vsub.f32 %v803_v34, %v811_v12  ;;  %v861_v17 = vld [vmem:[%s7000_s5 + $0x10] sm:$0xff] }
 0x2ee   :  { %v768_v23 = vpop.xlane.xlu0 %767 }
 0x2ef   :  { %3303 = vrsqrt.f32 %v836_v19  ;;  %v835_v24 = vadd.f32 1e-05, %v819_v20  ;;  %v3852_v38 = vmul.f32 0.0078125, %v768_v23  ;;  %v3270_v23 = vld [vmem:[%s6998_s6 + $0x80] ss:$16 sps:$4 sm:$0xff]  }
 0x2f0   :  { %v770_v4 = vpop.xlane.xlu1 %769 }
 0x2f1   :  { %3305 = vrsqrt.f32 %v835_v24  ;;  %v3857_v43 = vmul.f32 0.0078125, %v770_v4  ;;  %v817_v49 = vmul.f32 %v3852_v38, %v3852_v38  ;;  %v3272_v24 = vld [vmem:[%s6998_s6 + $0x84] ss:$16 sps:$4 sm:$0xff]   ;;  %v3275_v4 = vld [vmem:[%s6998_s6 + $0x8c] ss:$16 sps:$4 sm:$0xff]  }
 0x2f2   :  { %v764_v36 = vpop.xlane.xlu0 %763  ;;  %1183 = vmatprep.subr.bf16.mxu1 %v3272_v24  ;;  %1256 = vmatprep.subr.bf16.mxu0 %v3275_v4  ;;  %v832_v24 = vld [vmem:[%s6999_s4 + $0x28] sm:$0xff]  ;;  %v865_v4 = vld [vmem:[%s7000_s5 + $0x30] sm:$0xff] }
 0x2f3   :  { %v3300_v37 = vpop.eup %3299  ;;  %v3873_v50 = vmul.f32 0.0078125, %v764_v36  ;;  %v818_v59 = vmul.f32 %v3857_v43, %v3857_v43  ;;  %1184 = vmatpush1.bf16.msra.mxu1 %v3270_v23 }
 0x2f4   :  { %v766_v40 = vpop.xlane.xlu1 %765  ;;  %v853_v41 = vmul.f32 %v3300_v37, %v829_v26 }
 0x2f5   :  { %v3302_v54 = vpop.eup %3301  ;;  %v3881_v57 = vmul.f32 0.0078125, %v766_v40  ;;  %v815_v6 = vmul.f32 %v3873_v50, %v3873_v50  ;;  %v3273_v40 = vld [vmem:[%s6998_s6 + $0x88] ss:$16 sps:$4 sm:$0xff]  }
 0x2f6   :  { %895 = vperm.xlu1 %3217, %v853_v41   ;;  %v800_v44 = vpop.xlane.xlu0 %799  ;;  %v869_v25 = vmul.f32 %v853_v41, %v3833_v52  ;;  %v854_v20 = vmul.f32 %v3302_v54, %v830_v22  ;;  %1257 = vmatpush1.bf16.msra.mxu0 %v3273_v40 }
 0x2f7   :  { %v809_v51 = vmul.f32 0.0078125, %v800_v44  ;;  %v816_v34 = vmul.f32 %v3881_v57, %v3881_v57 }
 0x2f8   :  { %v802_v58 = vpop.xlane.xlu1 %801  ;;  %v877_v42 = vsub.f32 %v861_v17, %v869_v25  ;;  %v870_v47 = vmul.f32 %v854_v20, %v3835_v55  ;;  %v3279_v55 = vld [vmem:[%s6998_s6 + $0xa8] ss:$16 sps:$4 sm:$0xff]  }
 0x2f9   :  { %v3304_v21 = vpop.eup %3303  ;;  %v825_v62 = vsub.f32 %v809_v51, %v817_v49  ;;  %v810_v63 = vmul.f32 0.0078125, %v802_v58  ;;  %v3281_v49 = vld [vmem:[%s6998_s6 + $0xac] ss:$16 sps:$4 sm:$0xff]   ;;  %v3291_v17 = vld [vmem:[%s6998_s6 + $0xe8] ss:$16 sps:$4 sm:$0xff]  }
 0x2fa   :  { %v796_v3 = vpop.xlane.xlu0 %795  ;;  %v852_v31 = vmul.f32 %v3304_v21, %v828_v46  ;;  %v859_v46 = vld [vmem:[%s7000_s5] sm:$0xff]  ;;  %1258 = vmatprep.subr.bf16.mxu0 %v3281_v49  ;;  %v878_v54 = vsub.f32 %v862_v10, %v870_v47 }
 0x2fb   :  { %v3306_v16 = vpop.eup %3305  ;;  %v841_v7 = vadd.f32 1e-05, %v825_v62  ;;  %v826_v8 = vsub.f32 %v810_v63, %v818_v59  ;;  %v807_v12 = vmul.f32 0.0078125, %v796_v3  ;;  %1259 = vmatpush1.bf16.msra.mxu0 %v3279_v55  ;;  %v3282_v21 = vld [vmem:[%s6998_s6 + $0xc0] ss:$16 sps:$4 sm:$0xff]   ;;  %v860_v63 = vld [vmem:[%s7000_s5 + $0x8] sm:$0xff] }
 0x2fc   :  { %890 = vperm.xlu1 %3217, %v852_v31   ;;  %v798_v19 = vpop.xlane.xlu1 %797  ;;  %v851_v52 = vmul.f32 %v3306_v16, %v827_v1  ;;  %v868_v58 = vmul.f32 %v852_v31, %v3843_v28  ;;  %v3284_v59 = vld [vmem:[%s6998_s6 + $0xc4] ss:$16 sps:$4 sm:$0xff]   ;;  %v3287_v62 = vld [vmem:[%s6998_s6 + $0xcc] ss:$16 sps:$4 sm:$0xff]   ;;  %v3285_v1 = vld [vmem:[%s6998_s6 + $0xc8] ss:$16 sps:$4 sm:$0xff]  }
 0x2fd   :  { %3307 = vrsqrt.f32 %v841_v7  ;;  %v842_v26 = vadd.f32 1e-05, %v826_v8  ;;  %v823_v36 = vsub.f32 %v807_v12, %v815_v6  ;;  %v808_v37 = vmul.f32 0.0078125, %v798_v19  ;;  %v833_v28 = vld [vmem:[%s6999_s4 + $0x30] sm:$0xff]  ;;  %1260 = vmatprep.subr.bf16.mxu0 %v3287_v62  ;;  %v3293_v6 = vld [vmem:[%s6998_s6 + $0xec] ss:$16 sps:$4 sm:$0xff]  }
 0x2fe   :  { %885 = vperm.xlu0 %3216, %v851_v52   ;;  %v867_v41 = vmul.f32 %v851_v52, %v3841_v56  ;;  %v3278_v56 = vld [vmem:[%s6998_s6 + $0xa4] ss:$16 sps:$4 sm:$0xff]   ;;  %v876_v25 = vsub.f32 %v860_v63, %v868_v58  ;;  %v3288_v31 = vld [vmem:[%s6998_s6 + $0xe0] ss:$16 sps:$4 sm:$0xff]   ;;  %v834_v8 = vld [vmem:[%s6999_s4 + $0x38] sm:$0xff] }
 0x2ff   :  { %3309 = vrsqrt.f32 %v842_v26  ;;  %v839_v30 = vadd.f32 1e-05, %v823_v36  ;;  %v824_v44 = vsub.f32 %v808_v37, %v816_v34  ;;  %1185 = vmatprep.subr.bf16.mxu1 %v3278_v56  ;;  %1261 = vmatpush1.bf16.msra.mxu0 %v3285_v1  ;;  %v3290_v16 = vld [vmem:[%s6998_s6 + $0xe4] ss:$16 sps:$4 sm:$0xff]  }
 0x300   :  { %943 = vperm.xlu1 %3217, %v877_v42   ;;  %v875_v53 = vsub.f32 %v859_v46, %v867_v41  ;;  %1186 = vmatpush1.bf16.msra.mxu1 %v3276_v48  ;;  %v831_v12 = vld [vmem:[%s6999_s4 + $0x20] sm:$0xff] }
 0x301   :  { %3311 = vrsqrt.f32 %v839_v30  ;;  %v840_v51 = vadd.f32 1e-05, %v824_v44  ;;  %1187 = vmatprep.subr.bf16.mxu1 %v3284_v59  ;;  %1262 = vmatprep.subr.bf16.mxu0 %v3293_v6  ;;  %v863_v41 = vld [vmem:[%s7000_s5 + $0x20] sm:$0xff] }
 0x302   :  { %900 = vperm.xlu0 %3216, %v854_v20  }
 0x303   :  { %3313 = vrsqrt.f32 %v840_v51  ;;  %1263 = vmatpush1.bf16.msra.mxu0 %v3291_v17 }
 0x304   :  { %933 = vperm.xlu1 %3217, %v875_v53   ;;  %1188 = vmatpush1.bf16.msra.mxu1 %v3282_v21 }
 0x305   :  { %1189 = vmatprep.subr.bf16.mxu1 %v3290_v16 }
 0x306   :  { %948 = vperm.xlu0 %3216, %v878_v54  }
 0x307   :  { %v3308_v22 = vpop.eup %3307 }
 0x308   :  { %v857_v3 = vmul.f32 %v3308_v22, %v833_v28  ;;  %1190 = vmatpush1.bf16.msra.mxu1 %v3288_v31 }
 0x309   :  { %v3310_v7 = vpop.eup %3309 }
 0x30a   :  { %938 = vperm.xlu0 %3216, %v876_v25   ;;  %915 = vperm.xlu1 %3217, %v857_v3   ;;  %v858_v19 = vmul.f32 %v3310_v7, %v834_v8  ;;  %v873_v20 = vmul.f32 %v857_v3, %v3852_v38  ;;  %v866_v38 = vld [vmem:[%s7000_s5 + $0x38] sm:$0xff] }
 0x30b   :  { %v3312_v34 = vpop.eup %3311 }
 0x30c   :  { %v855_v52 = vmul.f32 %v3312_v34, %v831_v12  ;;  %v881_v36 = vsub.f32 %v865_v4, %v873_v20  ;;  %v874_v37 = vmul.f32 %v858_v19, %v3857_v43  ;;  %v864_v43 = vld [vmem:[%s7000_s5 + $0x28] sm:$0xff] }
 0x30d   :  { %v3314_v23 = vpop.eup %3313 }
 0x30e   :  { %920 = vperm.xlu0 %3216, %v858_v19   ;;  %905 = vperm.xlu1 %3217, %v855_v52   ;;  %v856_v26 = vmul.f32 %v3314_v23, %v832_v24  ;;  %v871_v40 = vmul.f32 %v855_v52, %v3873_v50  ;;  %v882_v42 = vsub.f32 %v866_v38, %v874_v37 }
 0x310   :  { %v879_v30 = vsub.f32 %v863_v41, %v871_v40  ;;  %v872_v44 = vmul.f32 %v856_v26, %v3881_v57 }
 0x312   :  { %910 = vperm.xlu0 %3216, %v856_v26   ;;  %963 = vperm.xlu1 %3217, %v881_v36   ;;  %v880_v50 = vsub.f32 %v864_v43, %v872_v44 }
 0x316   :  { %968 = vperm.xlu0 %3216, %v882_v42   ;;  %953 = vperm.xlu1 %3217, %v879_v30  }
 0x31a   :  { %958 = vperm.xlu0 %3216, %v880_v50  }
 0x375   :  { %v896_v46 = vpop.permute.xlu1 %895 }
 0x376   :  { %v925_v1 = vmul.f32 %v896_v46, %v3764_v15 }
 0x37b   :  { %v891_v47 = vpop.permute.xlu1 %890 }
 0x37c   :  { %v924_v55 = vmul.f32 %v891_v47, %v3772_v2 }
 0x37d   :  { %v886_v48 = vpop.permute.xlu0 %885 }
 0x37e   :  { %v923_v53 = vmul.f32 %v886_v48, %v3761_v27 }
 0x37f   :  { %v944_v56 = vpop.permute.xlu1 %943 }
 0x380   :  { %v973_v25 = vadd.f32 %v944_v56, %v925_v1 }
 0x381   :  { %v901_v49 = vpop.permute.xlu0 %900 }
 0x382   :  { %v926_v28 = vmul.f32 %v901_v49, %v3767_v45 }
 0x383   :  { %v934_v51 = vpop.permute.xlu1 %933 }
 0x384   :  { %v971_v58 = vadd.f32 %v934_v51, %v923_v53 }
 0x385   :  { %v949_v10 = vpop.permute.xlu0 %948 }
 0x386   :  { %v974_v2 = vadd.f32 %v949_v10, %v926_v28 }
 0x388   :  { %v980_v3 = vpack.c.bf16 %v974_v2, %v973_v25 }
 0x389   :  { %v916_v57 = vpop.permute.xlu1 %915  ;;  %v939_v54 = vpop.permute.xlu0 %938 }
 0x38a   :  { %v972_v21 = vadd.f32 %v939_v54, %v924_v55  ;;  %v929_v34 = vmul.f32 %v916_v57, %v3783_v61  ;;  %v4019_v61 = vld [vmem:[%s7001_s7 + $0x18] sm:$0xff] }
 0x38b   :  { %v4039_v37 = vrot.slane %v4019_v61, %v3650_v11 }
 0x38c   :  { %v979_v59 = vpack.c.bf16 %v972_v21, %v971_v58 }
 0x38d   :  { %v906_v62 = vpop.permute.xlu1 %905  ;;  %v921_v63 = vpop.permute.xlu0 %920 }
 0x38e   :  { %1208 = vmatmul.mubr.bf16.vlgmr.msra.gmra.mrb[16].mxu1 %v979_v59  ;;  %1281 = vmatmul.mubr.bf16.vlgmr.msra.gmra.mrb[24].mxu0 %v979_v59  ;;  %v927_v45 = vmul.f32 %v906_v62, %v3788_v18  ;;  %v930_v17 = vmul.f32 %v921_v63, %v3786_v29  ;;  %v4004_v18 = vld [vmem:[%s7001_s7 + $0x10] sm:$0xff]  ;;  %v4009_v29 = vld [vmem:[%s7001_s7] sm:$0xff] }
 0x38f   :  { %1217 = vmatprep.mubr.bf16.mxu1 %v7005_v14  ;;  %1290 = vmatprep.mubr.bf16.mxu0 %v7005_v14  ;;  %v4023_v23 = vrot.slane %v4009_v29, %v3650_v11  ;;  %v4027_v24 = vrot.slane %v4004_v18, %v3650_v11 }
 0x391   :  { %v964_v22 = vpop.permute.xlu1 %963  ;;  %v911_v27 = vpop.permute.xlu0 %910 }
 0x392   :  { %v928_v6 = vmul.f32 %v911_v27, %v3791_v0  ;;  %v977_v52 = vadd.f32 %v964_v22, %v929_v34  ;;  %v4014_v0 = vld [vmem:[%s7001_s7 + $0x8] sm:$0xff] }
 0x393   :  { %v4035_v36 = vrot.slane %v4014_v0, %v3650_v11 }
 0x395   :  { %v969_v31 = vpop.permute.xlu0 %968  ;;  %v954_v16 = vpop.permute.xlu1 %953 }
 0x396   :  { %1218 = vmatmul.mubr.bf16.gmra.mrb[20].mxu1 %v980_v3  ;;  %1291 = vmatmul.mubr.bf16.gmra.mrb[28].mxu0 %v980_v3  ;;  %v975_v8 = vadd.f32 %v954_v16, %v927_v45  ;;  %v978_v19 = vadd.f32 %v969_v31, %v930_v17 }
 0x397   :  { %1227 = vmatprep.mubr.bf16.mxu1 %v7005_v14  ;;  %1300 = vmatprep.mubr.bf16.mxu0 %v7005_v14 }
 0x398   :  { %v982_v20 = vpack.c.bf16 %v978_v19, %v977_v52 }
 0x399   :  { %v959_v7 = vpop.permute.xlu0 %958 }
 0x39a   :  { %v976_v15 = vadd.f32 %v959_v7, %v928_v6 }
 0x39c   :  { %v981_v12 = vpack.c.bf16 %v976_v15, %v975_v8 }
 0x39e   :  { %1228 = vmatmul.mubr.bf16.gmra.mrb[24].mxu1 %v981_v12  ;;  %1301 = vmatmul.mubr.bf16.gmra.mrb[32].mxu0 %v981_v12 }
 0x39f   :  { %1237 = vmatprep.mubr.bf16.mxu1 %v7005_v14  ;;  %1310 = vmatprep.mubr.bf16.mxu0 %v7005_v14 }
 0x3a6   :  { %1238 = vmatmul.mubr.bf16.gmra.mrb[28].mxu1 %v982_v20  ;;  %1311 = vmatmul.mubr.bf16.gmra.mrb[36].mxu0 %v982_v20 }
 0x461   :  { %v4029_v4 = vpop.f32.mrb[16].mxu1  ;;  %v4031_v26 = vpop.f32.mrb[24].mxu0 }
 0x462   :  { %v4041_v40 = vpop.f32.mrb[25].mxu0  ;;  %1329 = vrot.lane.b32.xlu1 %v4029_v4, %s3349_s23  ;;  %v4045_v38 = vpop.f32.mrb[17].mxu1  ;;  %v4059_v11 = vmul.f32 %v4023_v23, %v4029_v4  ;;  %v4067_v50 = vmul.f32 %v4027_v24, %v4031_v26 }
 0x463   :  { %v4047_v41 = vpop.f32.mrb[18].mxu1  ;;  %v4049_v42 = vpop.f32.mrb[26].mxu0  ;;  %v4075_v47 = vmul.f32 %v4035_v36, %v4045_v38  ;;  %v4083_v56 = vmul.f32 %v4039_v37, %v4041_v40 }
 0x464   :  { %v4051_v30 = vpop.f32.mrb[27].mxu0  ;;  %1331 = vrot.lane.b32.xlu0 %v4047_v41, %s3349_s23  ;;  %v4055_v44 = vpop.f32.mrb[19].mxu1  ;;  %7253 = vst [vmem:[#allocation5_spill] sm:$0xff] %v4059_v11  ;;  %v4063_v43 = vmul.f32 %v4023_v23, %v4047_v41  ;;  %7255 = vst [vmem:[#allocation7_spill] sm:$0xff] %v4067_v50  ;;  %v4071_v46 = vmul.f32 %v4027_v24, %v4049_v42 }
 0x465   :  { %7257 = vst [vmem:[#allocation9_spill] sm:$0xff] %v4075_v47  ;;  %v4079_v48 = vmul.f32 %v4035_v36, %v4055_v44  ;;  %7259 = vst [vmem:[#allocation11_spill] sm:$0xff] %v4083_v56  ;;  %v4087_v49 = vmul.f32 %v4039_v37, %v4051_v30  ;;  %v7307_v47 = vlaneseq }
 0x466   :  { %7254 = vst [vmem:[#allocation6_spill] sm:$0xff] %v4063_v43  ;;  %7256 = vst [vmem:[#allocation8_spill] sm:$0xff] %v4071_v46  ;;  %1361 = vrot.lane.b32.xlu1 %v4031_v26, %s3349_s23 }
 0x467   :  { %7258 = vst [vmem:[#allocation10_spill] sm:$0xff] %v4079_v48  ;;  %7260 = vst [vmem:[#allocation12_spill] sm:$0xff] %v4087_v49  ;;  %v4476_v48 = vand.u32 127, %v7307_v47  ;;  %v4493_v47 = vrot.slane %v4014_v0, %v3589_v39  ;;  %v4507_v0 = vrot.slane %v4009_v29, %v3589_v39  ;;  %v4522_v29 = vrot.slane %v4004_v18, %v3589_v39 }
 0x468   :  { %1363 = vrot.lane.b32.xlu0 %v4049_v42, %s3349_s23 }
 0x469   :  { %v4101_v57 = vpop.f32.mrb[20].mxu1  ;;  %v4103_v54 = vpop.f32.mrb[28].mxu0  ;;  %vm1395_vm1 = vcmp.lt.s32.totalorder %v4476_v48, 17  ;;  %7311 = vst [vmem:[#allocation62_spill] sm:$0xff] %v4493_v47  ;;  %vm1540_vm2 = vcmp.lt.s32.totalorder %v4476_v48, 16  ;;  %vm1685_vm3 = vcmp.lt.s32.totalorder %v4476_v48, 15 }
 0x46a   :  { %v4105_v58 = vpop.f32.mrb[29].mxu0  ;;  %1476 = vrot.lane.b32.xlu1 %v4029_v4, %s3350_s24  ;;  %v4109_v21 = vpop.f32.mrb[21].mxu1  ;;  %v4123_v1 = vmul.f32 %v4023_v23, %v4101_v57  ;;  %v4131_v22 = vmul.f32 %v4027_v24, %v4103_v54  ;;  %vm1830_vm4 = vcmp.lt.s32.totalorder %v4476_v48, 1  ;;  %vm2168_vm5 = vcmp.lt.s32.totalorder %v4476_v48, 113 }
 0x46b   :  { %v4111_v59 = vpop.f32.mrb[22].mxu1  ;;  %v4113_v62 = vpop.f32.mrb[30].mxu0  ;;  %v4139_v25 = vmul.f32 %v4035_v36, %v4109_v21  ;;  %v4147_v31 = vmul.f32 %v4039_v37, %v4105_v58  ;;  %vm2023_vm6 = vcmp.lt.s32.totalorder %v4476_v48, 127  ;;  %vm2458_vm7 = vcmp.lt.s32.totalorder %v4476_v48, 111 }
 0x46c   :  { %v4115_v63 = vpop.f32.mrb[31].mxu0  ;;  %1478 = vrot.lane.b32.xlu0 %v4047_v41, %s3350_s24  ;;  %v4119_v28 = vpop.f32.mrb[23].mxu1  ;;  %7261 = vst [vmem:[#allocation13_spill] sm:$0xff] %v4123_v1  ;;  %v4127_v2 = vmul.f32 %v4023_v23, %v4111_v59  ;;  %7263 = vst [vmem:[#allocation15_spill] sm:$0xff] %v4131_v22  ;;  %v4135_v27 = vmul.f32 %v4027_v24, %v4113_v62  ;;  %vm2313_vm8 = vcmp.lt.s32.totalorder %v4476_v48, 112 }
 0x46d   :  { %7265 = vst [vmem:[#allocation17_spill] sm:$0xff] %v4139_v25  ;;  %v4143_v3 = vmul.f32 %v4035_v36, %v4119_v28  ;;  %7267 = vst [vmem:[#allocation19_spill] sm:$0xff] %v4147_v31  ;;  %v4151_v16 = vmul.f32 %v4039_v37, %v4115_v63 }
 0x46e   :  { %7262 = vst [vmem:[#allocation14_spill] sm:$0xff] %v4127_v2  ;;  %7264 = vst [vmem:[#allocation16_spill] sm:$0xff] %v4135_v27  ;;  %1621 = vrot.lane.b32.xlu1 %v4029_v4, %s3351_s25 }
 0x46f   :  { %7266 = vst [vmem:[#allocation18_spill] sm:$0xff] %v4143_v3  ;;  %7268 = vst [vmem:[#allocation20_spill] sm:$0xff] %v4151_v16 }
 0x470   :  { %1623 = vrot.lane.b32.xlu0 %v4047_v41, %s3351_s25 }
 0x471   :  { %v4165_v15 = vpop.f32.mrb[24].mxu1  ;;  %v4167_v12 = vpop.f32.mrb[32].mxu0 }
 0x472   :  { %7269 = vst [vmem:[#allocation21_spill] sm:$0xff] %v4165_v15  ;;  %1508 = vrot.lane.b32.xlu1 %v4031_v26, %s3350_s24  ;;  %v4171_v17 = vpop.f32.mrb[25].mxu1  ;;  %v4173_v34 = vpop.f32.mrb[33].mxu0  ;;  %v4187_v6 = vmul.f32 %v4023_v23, %v4165_v15  ;;  %v4195_v8 = vmul.f32 %v4027_v24, %v4167_v12 }
 0x473   :  { %7270 = vst [vmem:[#allocation22_spill] sm:$0xff] %v4173_v34  ;;  %v4175_v19 = vpop.f32.mrb[26].mxu1  ;;  %v4177_v52 = vpop.f32.mrb[34].mxu0  ;;  %v4203_v7 = vmul.f32 %v4035_v36, %v4171_v17  ;;  %v4211_v53 = vmul.f32 %v4039_v37, %v4173_v34 }
 0x474   :  { %1510 = vrot.lane.b32.xlu0 %v4049_v42, %s3350_s24  ;;  %v4181_v20 = vpop.f32.mrb[27].mxu1  ;;  %v4183_v14 = vpop.f32.mrb[35].mxu0  ;;  %7272 = vst [vmem:[#allocation24_spill] sm:$0xff] %v4187_v6  ;;  %v4191_v45 = vmul.f32 %v4023_v23, %v4175_v19  ;;  %7274 = vst [vmem:[#allocation26_spill] sm:$0xff] %v4195_v8  ;;  %v4199_v10 = vmul.f32 %v4027_v24, %v4177_v52 }
 0x475   :  { %7271 = vst [vmem:[#allocation23_spill] sm:$0xff] %v4183_v14  ;;  %7276 = vst [vmem:[#allocation28_spill] sm:$0xff] %v4203_v7  ;;  %v4207_v51 = vmul.f32 %v4035_v36, %v4181_v20  ;;  %v4215_v55 = vmul.f32 %v4039_v37, %v4183_v14 }
 0x476   :  { %7273 = vst [vmem:[#allocation25_spill] sm:$0xff] %v4191_v45  ;;  %7275 = vst [vmem:[#allocation27_spill] sm:$0xff] %v4199_v10  ;;  %1766 = vrot.lane.b32.xlu1 %v4029_v4, %s3342_s28 }
 0x477   :  { %7277 = vst [vmem:[#allocation29_spill] sm:$0xff] %v4207_v51  ;;  %7278 = vst [vmem:[#allocation30_spill] sm:$0xff] %v4211_v53 }
 0x478   :  { %7279 = vst [vmem:[#allocation31_spill] sm:$0xff] %v4215_v55  ;;  %1768 = vrot.lane.b32.xlu0 %v4047_v41, %s3342_s28 }
 0x479   :  { %v4229_v1 = vpop.f32.mrb[28].mxu1  ;;  %v4231_v2 = vpop.f32.mrb[36].mxu0 }
 0x47a   :  { %7280 = vst [vmem:[#allocation32_spill] sm:$0xff] %v4231_v2  ;;  %1653 = vrot.lane.b32.xlu1 %v4031_v26, %s3351_s25  ;;  %v4235_v33 = vpop.f32.mrb[29].mxu1  ;;  %v4237_v6 = vpop.f32.mrb[37].mxu0  ;;  %v4251_v10 = vmul.f32 %v4023_v23, %v4229_v1  ;;  %v4259_v53 = vmul.f32 %v4027_v24, %v4231_v2 }
 0x47b   :  { %7281 = vst [vmem:[#allocation33_spill] sm:$0xff] %v4237_v6  ;;  %v4239_v60 = vpop.f32.mrb[30].mxu1  ;;  %v4241_v22 = vpop.f32.mrb[38].mxu0  ;;  %v4267_v7 = vmul.f32 %v4035_v36, %v4235_v33 }
 0x47c   :  { %1655 = vrot.lane.b32.xlu0 %v4049_v42, %s3351_s25  ;;  %v4245_v27 = vpop.f32.mrb[31].mxu1  ;;  %v4247_v8 = vpop.f32.mrb[39].mxu0  ;;  %7282 = vst [vmem:[#allocation34_spill] sm:$0xff] %v4251_v10  ;;  %v4255_v45 = vmul.f32 %v4023_v23, %v4239_v60  ;;  %7284 = vst [vmem:[#allocation36_spill] sm:$0xff] %v4259_v53  ;;  %v4263_v55 = vmul.f32 %v4027_v24, %v4241_v22  ;;  %v4275_v23 = vmul.f32 %v4039_v37, %v4237_v6 }
 0x47d   :  { %7286 = vst [vmem:[#allocation38_spill] sm:$0xff] %v4267_v7  ;;  %v4271_v51 = vmul.f32 %v4035_v36, %v4245_v27  ;;  %v4279_v31 = vmul.f32 %v4039_v37, %v4247_v8 }
 0x47e   :  { %7283 = vst [vmem:[#allocation35_spill] sm:$0xff] %v4255_v45  ;;  %7285 = vst [vmem:[#allocation37_spill] sm:$0xff] %v4263_v55  ;;  %1798 = vrot.lane.b32.xlu1 %v4031_v26, %s3342_s28 }
 0x47f   :  { %7287 = vst [vmem:[#allocation39_spill] sm:$0xff] %v4271_v51  ;;  %7288 = vst [vmem:[#allocation40_spill] sm:$0xff] %v4275_v23 }
 0x480   :  { %7289 = vst [vmem:[#allocation41_spill] sm:$0xff] %v4279_v31  ;;  %1800 = vrot.lane.b32.xlu0 %v4049_v42, %s3342_s28 }
 0x482   :  { %1991 = vrot.lane.b32.xlu1 %v4031_v26, %s3346_s11 }
 0x484   :  { %1993 = vrot.lane.b32.xlu0 %v4049_v42, %s3346_s11 }
 0x486   :  { %1959 = vrot.lane.b32.xlu1 %v4029_v4, %s3346_s11 }
 0x488   :  { %1961 = vrot.lane.b32.xlu0 %v4047_v41, %s3346_s11 }
 0x48a   :  { %2136 = vrot.lane.b32.xlu1 %v4031_v26, %s3352_s26 }
 0x48c   :  { %2138 = vrot.lane.b32.xlu0 %v4049_v42, %s3352_s26 }
 0x48e   :  { %2104 = vrot.lane.b32.xlu1 %v4029_v4, %s3352_s26 }
 0x490   :  { %2106 = vrot.lane.b32.xlu0 %v4047_v41, %s3352_s26 }
 0x492   :  { %2281 = vrot.lane.b32.xlu1 %v4031_v26, %s3353_s27 }
 0x494   :  { %2283 = vrot.lane.b32.xlu0 %v4049_v42, %s3353_s27 }
 0x496   :  { %2249 = vrot.lane.b32.xlu1 %v4029_v4, %s3353_s27 }
 0x498   :  { %2251 = vrot.lane.b32.xlu0 %v4047_v41, %s3353_s27 }
 0x49a   :  { %1345 = vrot.lane.b32.xlu1 %v4045_v38, %s3349_s23 }
 0x49c   :  { %1347 = vrot.lane.b32.xlu0 %v4055_v44, %s3349_s23 }
 0x49e   :  { %1377 = vrot.lane.b32.xlu1 %v4041_v40, %s3349_s23 }
 0x4a0   :  { %1379 = vrot.lane.b32.xlu0 %v4051_v30, %s3349_s23 }
 0x4a2   :  { %1492 = vrot.lane.b32.xlu1 %v4045_v38, %s3350_s24 }
 0x4a4   :  { %1494 = vrot.lane.b32.xlu0 %v4055_v44, %s3350_s24 }
 0x4a6   :  { %1524 = vrot.lane.b32.xlu1 %v4041_v40, %s3350_s24 }
 0x4a8   :  { %1526 = vrot.lane.b32.xlu0 %v4051_v30, %s3350_s24 }
 0x4aa   :  { %1637 = vrot.lane.b32.xlu1 %v4045_v38, %s3351_s25 }
 0x4ac   :  { %1639 = vrot.lane.b32.xlu0 %v4055_v44, %s3351_s25 }
 0x4ae   :  { %1669 = vrot.lane.b32.xlu1 %v4041_v40, %s3351_s25 }
 0x4b0   :  { %1671 = vrot.lane.b32.xlu0 %v4051_v30, %s3351_s25 }
 0x4b2   :  { %1782 = vrot.lane.b32.xlu1 %v4045_v38, %s3342_s28 }
 0x4b4   :  { %1784 = vrot.lane.b32.xlu0 %v4055_v44, %s3342_s28 }
 0x4b6   :  { %1814 = vrot.lane.b32.xlu1 %v4041_v40, %s3342_s28 }
 0x4b8   :  { %1816 = vrot.lane.b32.xlu0 %v4051_v30, %s3342_s28 }
 0x4ba   :  { %1975 = vrot.lane.b32.xlu1 %v4045_v38, %s3346_s11 }
 0x4bc   :  { %1977 = vrot.lane.b32.xlu0 %v4055_v44, %s3346_s11 }
 0x4be   :  { %2120 = vrot.lane.b32.xlu1 %v4045_v38, %s3352_s26 }
 0x4c0   :  { %2122 = vrot.lane.b32.xlu0 %v4055_v44, %s3352_s26 }
 0x4c2   :  { %2007 = vrot.lane.b32.xlu1 %v4041_v40, %s3346_s11 }
 0x4c4   :  { %2009 = vrot.lane.b32.xlu0 %v4051_v30, %s3346_s11 }
 0x4c6   :  { %2265 = vrot.lane.b32.xlu1 %v4045_v38, %s3353_s27 }
 0x4c8   :  { %2267 = vrot.lane.b32.xlu0 %v4055_v44, %s3353_s27 }
 0x4ca   :  { %1333 = vrot.lane.b32.xlu1 %v4101_v57, %s3349_s23 }
 0x4cc   :  { %1335 = vrot.lane.b32.xlu0 %v4111_v59, %s3349_s23 }
 0x4ce   :  { %1365 = vrot.lane.b32.xlu1 %v4103_v54, %s3349_s23 }
 0x4d0   :  { %1367 = vrot.lane.b32.xlu0 %v4113_v62, %s3349_s23 }
 0x4d2   :  { %1480 = vrot.lane.b32.xlu1 %v4101_v57, %s3350_s24 }
 0x4d4   :  { %v4375_v37 = vpop.permute.xlu1 %1329  ;;  %1482 = vrot.lane.b32.xlu0 %v4111_v59, %s3350_s24 }
 0x4d6   :  { %1625 = vrot.lane.b32.xlu1 %v4101_v57, %s3351_s25  ;;  %v4381_v16 = vpop.permute.xlu0 %1331 }
 0x4d8   :  { %v4383_v24 = vpop.permute.xlu1 %1361  ;;  %1627 = vrot.lane.b32.xlu0 %v4111_v59, %s3351_s25 }
 0x4da   :  { %1512 = vrot.lane.b32.xlu1 %v4103_v54, %s3350_s24  ;;  %v4389_v50 = vpop.permute.xlu0 %1363 }
 0x4dc   :  { %v4391_v36 = vpop.permute.xlu1 %1476  ;;  %1514 = vrot.lane.b32.xlu0 %v4113_v62, %s3350_s24 }
 0x4de   :  { %1770 = vrot.lane.b32.xlu1 %v4101_v57, %s3342_s28  ;;  %v4397_v53 = vpop.permute.xlu0 %1478 }
 0x4e0   :  { %v4399_v55 = vpop.permute.xlu1 %1621  ;;  %1772 = vrot.lane.b32.xlu0 %v4111_v59, %s3342_s28 }
 0x4e1   :  { %7290 = vst [vmem:[#allocation42_spill] sm:$0xff] %v4399_v55 }
 0x4e2   :  { %1657 = vrot.lane.b32.xlu1 %v4103_v54, %s3351_s25  ;;  %v4405_v10 = vpop.permute.xlu0 %1623 }
 0x4e3   :  { %7291 = vst [vmem:[#allocation43_spill] sm:$0xff] %v4405_v10 }
 0x4e4   :  { %v4407_v45 = vpop.permute.xlu1 %1508  ;;  %1659 = vrot.lane.b32.xlu0 %v4113_v62, %s3351_s25 }
 0x4e6   :  { %1802 = vrot.lane.b32.xlu1 %v4103_v54, %s3342_s28  ;;  %v4413_v23 = vpop.permute.xlu0 %1510 }
 0x4e8   :  { %v4415_v31 = vpop.permute.xlu1 %1766  ;;  %1804 = vrot.lane.b32.xlu0 %v4113_v62, %s3342_s28 }
 0x4e9   :  { %7292 = vst [vmem:[#allocation44_spill] sm:$0xff] %v4415_v31 }
 0x4ea   :  { %1995 = vrot.lane.b32.xlu1 %v4103_v54, %s3346_s11  ;;  %v4421_v7 = vpop.permute.xlu0 %1768 }
 0x4eb   :  { %7293 = vst [vmem:[#allocation45_spill] sm:$0xff] %v4421_v7  ;;  %v4516_v7 = vrot.slane %v4019_v61, %v3589_v39 }
 0x4ec   :  { %v4423_v51 = vpop.permute.xlu1 %1653  ;;  %1997 = vrot.lane.b32.xlu0 %v4113_v62, %s3346_s11 }
 0x4ed   :  { %7294 = vst [vmem:[#allocation46_spill] sm:$0xff] %v4423_v51 }
 0x4ee   :  { %1963 = vrot.lane.b32.xlu1 %v4101_v57, %s3346_s11  ;;  %v4429_v46 = vpop.permute.xlu0 %1655 }
 0x4ef   :  { %7295 = vst [vmem:[#allocation47_spill] sm:$0xff] %v4429_v46 }
 0x4f0   :  { %v4431_v25 = vpop.permute.xlu1 %1798  ;;  %1965 = vrot.lane.b32.xlu0 %v4111_v59, %s3346_s11 }
 0x4f1   :  { %7296 = vst [vmem:[#allocation48_spill] sm:$0xff] %v4431_v25 }
 0x4f2   :  { %2140 = vrot.lane.b32.xlu1 %v4103_v54, %s3352_s26  ;;  %v4437_v3 = vpop.permute.xlu0 %1800 }
 0x4f3   :  { %7297 = vst [vmem:[#allocation49_spill] sm:$0xff] %v4437_v3 }
 0x4f4   :  { %v4439_v5 = vpop.permute.xlu1 %1991  ;;  %2142 = vrot.lane.b32.xlu0 %v4113_v62, %s3352_s26 }
 0x4f5   :  { %7298 = vst [vmem:[#allocation50_spill] sm:$0xff] %v4439_v5 }
 0x4f6   :  { %2108 = vrot.lane.b32.xlu1 %v4101_v57, %s3352_s26  ;;  %v4445_v11 = vpop.permute.xlu0 %1993 }
 0x4f7   :  { %7299 = vst [vmem:[#allocation51_spill] sm:$0xff] %v4445_v11 }
 0x4f8   :  { %v4447_v43 = vpop.permute.xlu1 %1959  ;;  %2110 = vrot.lane.b32.xlu0 %v4111_v59, %s3352_s26 }
 0x4f9   :  { %7300 = vst [vmem:[#allocation52_spill] sm:$0xff] %v4447_v43 }
 0x4fa   :  { %2285 = vrot.lane.b32.xlu1 %v4103_v54, %s3353_s27  ;;  %v4453_v56 = vpop.permute.xlu0 %1961 }
 0x4fb   :  { %7301 = vst [vmem:[#allocation53_spill] sm:$0xff] %v4453_v56 }
 0x4fc   :  { %v4455_v49 = vpop.permute.xlu1 %2136  ;;  %2287 = vrot.lane.b32.xlu0 %v4113_v62, %s3353_s27 }
 0x4fd   :  { %7302 = vst [vmem:[#allocation54_spill] sm:$0xff] %v4455_v49 }
 0x4fe   :  { %2253 = vrot.lane.b32.xlu1 %v4101_v57, %s3353_s27  ;;  %v4461_v5 = vpop.permute.xlu0 %2138 }
 0x4ff   :  { %7303 = vst [vmem:[#allocation55_spill] sm:$0xff] %v4461_v5 }
 0x500   :  { %v4463_v11 = vpop.permute.xlu1 %2104  ;;  %2255 = vrot.lane.b32.xlu0 %v4111_v59, %s3353_s27 }
 0x501   :  { %7304 = vst [vmem:[#allocation56_spill] sm:$0xff] %v4463_v11 }
 0x502   :  { %1349 = vrot.lane.b32.xlu1 %v4109_v21, %s3349_s23  ;;  %v4469_v43 = vpop.permute.xlu0 %2106 }
 0x503   :  { %7305 = vst [vmem:[#allocation57_spill] sm:$0xff] %v4469_v43 }
 0x504   :  { %v4471_v56 = vpop.permute.xlu1 %2281  ;;  %1351 = vrot.lane.b32.xlu0 %v4119_v28, %s3349_s23 }
 0x505   :  { %7306 = vst [vmem:[#allocation58_spill] sm:$0xff] %v4471_v56 }
 0x506   :  { %1381 = vrot.lane.b32.xlu1 %v4105_v58, %s3349_s23  ;;  %v4480_v11 = vpop.permute.xlu0 %2283 }
 0x507   :  { %7308 = vst [vmem:[#allocation59_spill] sm:$0xff] %v4480_v11 }
 0x508   :  { %v4482_v49 = vpop.permute.xlu1 %2249  ;;  %1383 = vrot.lane.b32.xlu0 %v4115_v63, %s3349_s23 }
 0x509   :  { %7309 = vst [vmem:[#allocation60_spill] sm:$0xff] %v4482_v49 }
 0x50a   :  { %1496 = vrot.lane.b32.xlu1 %v4109_v21, %s3350_s24  ;;  %v4489_v56 = vpop.permute.xlu0 %2251 }
 0x50b   :  { %7310 = vst [vmem:[#allocation61_spill] sm:$0xff] %v4489_v56 }
 0x50c   :  { %v1346_v9 = vpop.permute.xlu1 %1345  ;;  %1498 = vrot.lane.b32.xlu0 %v4119_v28, %s3350_s24 }
 0x50d   :  { %v1412_v49 = vsel %vm1395_vm1, %v4375_v37, %v1346_v9  ;;  %v1404_v61 = vsel %vm1395_vm1, %v1346_v9, %v4383_v24 }
 0x50e   :  { %1528 = vrot.lane.b32.xlu1 %v4105_v58, %s3350_s24  ;;  %v1348_v11 = vpop.permute.xlu0 %1347  ;;  %v1445_v43 = vmul.f32 %v4493_v47, %v1412_v49 }
 0x50f   :  { %v1413_v56 = vsel %vm1395_vm1, %v4381_v16, %v1348_v11  ;;  %v1405_v5 = vsel %vm1395_vm1, %v1348_v11, %v4389_v50 }
 0x510   :  { %v1449_v3 = vmul.f32 %v4493_v47, %v1413_v56  ;;  %v1378_v25 = vpop.permute.xlu1 %1377  ;;  %1530 = vrot.lane.b32.xlu0 %v4115_v63, %s3350_s24  ;;  %v1450_v39 = vmul.f32 %v4522_v29, %v1405_v5  ;;  %v1446_v5 = vmul.f32 %v4522_v29, %v1404_v61 }
 0x511   :  { %v1396_v49 = vsel %vm1395_vm1, %v4383_v24, %v1378_v25  ;;  %v1420_v11 = vsel %vm1395_vm1, %v1378_v25, %v4375_v37 }
 0x512   :  { %1641 = vrot.lane.b32.xlu1 %v4109_v21, %s3351_s25  ;;  %v1380_v56 = vpop.permute.xlu0 %1379  ;;  %v2540_v31 = vpack.c.bf16 %v1449_v3, %v1445_v43  ;;  %v1444_v18 = vmul.f32 %v4507_v0, %v1420_v11  ;;  %v1447_v37 = vmul.f32 %v4516_v7, %v1396_v49 }
 0x513   :  { %v1397_v55 = vsel %vm1395_vm1, %v4389_v50, %v1380_v56  ;;  %v1421_v25 = vsel %vm1395_vm1, %v1380_v56, %v4381_v16  ;;  %v2541_v16 = vpack.c.bf16 %v1450_v39, %v1446_v5 }
 0x514   :  { %v1448_v9 = vmul.f32 %v4507_v0, %v1421_v25  ;;  %v1451_v24 = vmul.f32 %v4516_v7, %v1397_v55  ;;  %v4546_v10 = vpop.permute.xlu1 %1492  ;;  %1643 = vrot.lane.b32.xlu0 %v4119_v28, %s3351_s25  ;;  %2712 = vmatprep.subr.bf16.mxu1 %v2540_v31 }
 0x516   :  { %v2539_v43 = vpack.c.bf16 %v1448_v9, %v1444_v18  ;;  %1673 = vrot.lane.b32.xlu1 %v4105_v58, %s3351_s25  ;;  %v4553_v50 = vpop.permute.xlu0 %1494  ;;  %v2542_v3 = vpack.c.bf16 %v1451_v24, %v1447_v37 }
 0x518   :  { %v4555_v49 = vpop.permute.xlu1 %1524  ;;  %1675 = vrot.lane.b32.xlu0 %v4115_v63, %s3351_s25  ;;  %2713 = vmatpush1.bf16.msra.mxu1 %v2539_v43 }
 0x519   :  { %7312 = vst [vmem:[#allocation63_spill] sm:$0xff] %v4555_v49  ;;  %2835 = vmatprep.subr.bf16.mxu0 %v2542_v3 }
 0x51a   :  { %2836 = vmatpush1.bf16.msra.mxu0 %v2541_v16  ;;  %1786 = vrot.lane.b32.xlu1 %v4109_v21, %s3342_s28  ;;  %v4561_v55 = vpop.permute.xlu0 %1526 }
 0x51c   :  { %v4563_v31 = vpop.permute.xlu1 %1637  ;;  %1788 = vrot.lane.b32.xlu0 %v4119_v28, %s3342_s28 }
 0x51d   :  { %7313 = vst [vmem:[#allocation64_spill] sm:$0xff] %v4563_v31 }
 0x51e   :  { %1818 = vrot.lane.b32.xlu1 %v4105_v58, %s3342_s28  ;;  %v4569_v11 = vpop.permute.xlu0 %1639 }
 0x51f   :  { %7314 = vst [vmem:[#allocation65_spill] sm:$0xff] %v4569_v11 }
 0x520   :  { %v4571_v61 = vpop.permute.xlu1 %1669  ;;  %1820 = vrot.lane.b32.xlu0 %v4115_v63, %s3342_s28 }
 0x521   :  { %7315 = vst [vmem:[#allocation66_spill] sm:$0xff] %v4571_v61 }
 0x522   :  { %1979 = vrot.lane.b32.xlu1 %v4109_v21, %s3346_s11  ;;  %v4577_v56 = vpop.permute.xlu0 %1671 }
 0x523   :  { %7316 = vst [vmem:[#allocation67_spill] sm:$0xff] %v4577_v56 }
 0x524   :  { %v4579_v39 = vpop.permute.xlu1 %1782  ;;  %1981 = vrot.lane.b32.xlu0 %v4119_v28, %s3346_s11 }
 0x525   :  { %7317 = vst [vmem:[#allocation68_spill] sm:$0xff] %v4579_v39 }
 0x526   :  { %2124 = vrot.lane.b32.xlu1 %v4109_v21, %s3352_s26  ;;  %v4585_v18 = vpop.permute.xlu0 %1784 }
 0x527   :  { %7318 = vst [vmem:[#allocation69_spill] sm:$0xff] %v4585_v18 }
 0x528   :  { %v4587_v25 = vpop.permute.xlu1 %1814  ;;  %2126 = vrot.lane.b32.xlu0 %v4119_v28, %s3352_s26 }
 0x529   :  { %7319 = vst [vmem:[#allocation70_spill] sm:$0xff] %v4587_v25 }
 0x52a   :  { %2011 = vrot.lane.b32.xlu1 %v4105_v58, %s3346_s11  ;;  %v4593_v37 = vpop.permute.xlu0 %1816 }
 0x52b   :  { %7320 = vst [vmem:[#allocation71_spill] sm:$0xff] %v4593_v37 }
 0x52c   :  { %v4595_v9 = vpop.permute.xlu1 %1975  ;;  %2013 = vrot.lane.b32.xlu0 %v4115_v63, %s3346_s11 }
 0x52d   :  { %7321 = vst [vmem:[#allocation72_spill] sm:$0xff] %v4595_v9 }
 0x52e   :  { %2269 = vrot.lane.b32.xlu1 %v4109_v21, %s3353_s27  ;;  %v4601_v24 = vpop.permute.xlu0 %1977 }
 0x52f   :  { %7322 = vst [vmem:[#allocation73_spill] sm:$0xff] %v4601_v24 }
 0x530   :  { %v4603_v5 = vpop.permute.xlu1 %2120  ;;  %2271 = vrot.lane.b32.xlu0 %v4119_v28, %s3353_s27 }
 0x531   :  { %7323 = vst [vmem:[#allocation74_spill] sm:$0xff] %v4603_v5 }
 0x532   :  { %1337 = vrot.lane.b32.xlu1 %v4165_v15, %s3349_s23  ;;  %v4609_v43 = vpop.permute.xlu0 %2122 }
 0x533   :  { %7324 = vst [vmem:[#allocation75_spill] sm:$0xff] %v4609_v43 }
 0x534   :  { %v4611_v3 = vpop.permute.xlu1 %2007  ;;  %1339 = vrot.lane.b32.xlu0 %v4175_v19, %s3349_s23 }
 0x535   :  { %7325 = vst [vmem:[#allocation76_spill] sm:$0xff] %v4611_v3 }
 0x536   :  { %1369 = vrot.lane.b32.xlu1 %v4167_v12, %s3349_s23  ;;  %v4617_v16 = vpop.permute.xlu0 %2009 }
 0x537   :  { %7326 = vst [vmem:[#allocation77_spill] sm:$0xff] %v4617_v16 }
 0x538   :  { %v4619_v9 = vpop.permute.xlu1 %2265  ;;  %1371 = vrot.lane.b32.xlu0 %v4177_v52, %s3349_s23 }
 0x539   :  { %7327 = vst [vmem:[#allocation78_spill] sm:$0xff] %v4619_v9 }
 0x53a   :  { %1484 = vrot.lane.b32.xlu1 %v4165_v15, %s3350_s24  ;;  %v4625_v5 = vpop.permute.xlu0 %2267 }
 0x53b   :  { %7328 = vst [vmem:[#allocation79_spill] sm:$0xff] %v4625_v5 }
 0x53c   :  { %v4627_v43 = vpop.permute.xlu1 %1333  ;;  %1486 = vrot.lane.b32.xlu0 %v4175_v19, %s3350_s24 }
 0x53e   :  { %1629 = vrot.lane.b32.xlu1 %v4165_v15, %s3351_s25  ;;  %v4633_v3 = vpop.permute.xlu0 %1335 }
 0x540   :  { %v4635_v16 = vpop.permute.xlu1 %1365  ;;  %1631 = vrot.lane.b32.xlu0 %v4175_v19, %s3351_s25 }
 0x542   :  { %1516 = vrot.lane.b32.xlu1 %v4167_v12, %s3350_s24  ;;  %v4641_v9 = vpop.permute.xlu0 %1367 }
 0x544   :  { %v4643_v5 = vpop.permute.xlu1 %1480  ;;  %1518 = vrot.lane.b32.xlu0 %v4177_v52, %s3350_s24 }
 0x545   :  { %7329 = vst [vmem:[#allocation80_spill] sm:$0xff] %v4643_v5 }
 0x546   :  { %1774 = vrot.lane.b32.xlu1 %v4165_v15, %s3342_s28  ;;  %v4649_v24 = vpop.permute.xlu0 %1482 }
 0x547   :  { %7330 = vst [vmem:[#allocation81_spill] sm:$0xff] %v4649_v24 }
 0x548   :  { %v4651_v25 = vpop.permute.xlu1 %1625  ;;  %1776 = vrot.lane.b32.xlu0 %v4175_v19, %s3342_s28 }
 0x549   :  { %7331 = vst [vmem:[#allocation82_spill] sm:$0xff] %v4651_v25 }
 0x54a   :  { %1661 = vrot.lane.b32.xlu1 %v4167_v12, %s3351_s25  ;;  %v4657_v37 = vpop.permute.xlu0 %1627 }
 0x54b   :  { %7332 = vst [vmem:[#allocation83_spill] sm:$0xff] %v4657_v37 }
 0x54c   :  { %v4659_v18 = vpop.permute.xlu1 %1512  ;;  %1663 = vrot.lane.b32.xlu0 %v4177_v52, %s3351_s25 }
 0x54d   :  { %7333 = vst [vmem:[#allocation84_spill] sm:$0xff] %v4659_v18 }
 0x54e   :  { %1806 = vrot.lane.b32.xlu1 %v4167_v12, %s3342_s28  ;;  %v4665_v5 = vpop.permute.xlu0 %1514 }
 0x54f   :  { %7334 = vst [vmem:[#allocation85_spill] sm:$0xff] %v4665_v5 }
 0x550   :  { %v4667_v24 = vpop.permute.xlu1 %1770  ;;  %1808 = vrot.lane.b32.xlu0 %v4177_v52, %s3342_s28 }
 0x551   :  { %7335 = vst [vmem:[#allocation86_spill] sm:$0xff] %v4667_v24 }
 0x552   :  { %1999 = vrot.lane.b32.xlu1 %v4167_v12, %s3346_s11  ;;  %v4673_v25 = vpop.permute.xlu0 %1772 }
 0x553   :  { %7336 = vst [vmem:[#allocation87_spill] sm:$0xff] %v4673_v25 }
 0x554   :  { %v4675_v37 = vpop.permute.xlu1 %1657  ;;  %2001 = vrot.lane.b32.xlu0 %v4177_v52, %s3346_s11 }
 0x555   :  { %7337 = vst [vmem:[#allocation88_spill] sm:$0xff] %v4675_v37 }
 0x556   :  { %1967 = vrot.lane.b32.xlu1 %v4165_v15, %s3346_s11  ;;  %v4681_v18 = vpop.permute.xlu0 %1659 }
 0x557   :  { %7338 = vst [vmem:[#allocation89_spill] sm:$0xff] %v4681_v18 }
 0x558   :  { %v4683_v5 = vpop.permute.xlu1 %1802  ;;  %1969 = vrot.lane.b32.xlu0 %v4175_v19, %s3346_s11 }
 0x559   :  { %7339 = vst [vmem:[#allocation90_spill] sm:$0xff] %v4683_v5 }
 0x55a   :  { %2144 = vrot.lane.b32.xlu1 %v4167_v12, %s3352_s26  ;;  %v4689_v24 = vpop.permute.xlu0 %1804 }
 0x55b   :  { %7340 = vst [vmem:[#allocation91_spill] sm:$0xff] %v4689_v24 }
 0x55c   :  { %v4691_v25 = vpop.permute.xlu1 %1995  ;;  %2146 = vrot.lane.b32.xlu0 %v4177_v52, %s3352_s26 }
 0x55d   :  { %7341 = vst [vmem:[#allocation92_spill] sm:$0xff] %v4691_v25 }
 0x55e   :  { %2112 = vrot.lane.b32.xlu1 %v4165_v15, %s3352_s26  ;;  %v4697_v37 = vpop.permute.xlu0 %1997 }
 0x55f   :  { %7342 = vst [vmem:[#allocation93_spill] sm:$0xff] %v4697_v37 }
 0x560   :  { %v4699_v18 = vpop.permute.xlu1 %1963  ;;  %2114 = vrot.lane.b32.xlu0 %v4175_v19, %s3352_s26 }
 0x561   :  { %7343 = vst [vmem:[#allocation94_spill] sm:$0xff] %v4699_v18 }
 0x562   :  { %2289 = vrot.lane.b32.xlu1 %v4167_v12, %s3353_s27  ;;  %v4705_v5 = vpop.permute.xlu0 %1965 }
 0x563   :  { %7344 = vst [vmem:[#allocation95_spill] sm:$0xff] %v4705_v5 }
 0x564   :  { %v4707_v24 = vpop.permute.xlu1 %2140  ;;  %2291 = vrot.lane.b32.xlu0 %v4177_v52, %s3353_s27 }
 0x565   :  { %7345 = vst [vmem:[#allocation96_spill] sm:$0xff] %v4707_v24 }
 0x566   :  { %2257 = vrot.lane.b32.xlu1 %v4165_v15, %s3353_s27  ;;  %v4713_v25 = vpop.permute.xlu0 %2142 }
 0x567   :  { %7346 = vst [vmem:[#allocation97_spill] sm:$0xff] %v4713_v25 }
 0x568   :  { %v4715_v37 = vpop.permute.xlu1 %2108  ;;  %2259 = vrot.lane.b32.xlu0 %v4175_v19, %s3353_s27 }
 0x569   :  { %7347 = vst [vmem:[#allocation98_spill] sm:$0xff] %v4715_v37 }
 0x56a   :  { %1353 = vrot.lane.b32.xlu1 %v4171_v17, %s3349_s23  ;;  %v4721_v18 = vpop.permute.xlu0 %2110 }
 0x56b   :  { %7348 = vst [vmem:[#allocation99_spill] sm:$0xff] %v4721_v18 }
 0x56c   :  { %v4723_v5 = vpop.permute.xlu1 %2285  ;;  %1355 = vrot.lane.b32.xlu0 %v4181_v20, %s3349_s23 }
 0x56d   :  { %7349 = vst [vmem:[#allocation100_spill] sm:$0xff] %v4723_v5 }
 0x56e   :  { %1385 = vrot.lane.b32.xlu1 %v4173_v34, %s3349_s23  ;;  %v4729_v24 = vpop.permute.xlu0 %2287 }
 0x56f   :  { %7350 = vst [vmem:[#allocation101_spill] sm:$0xff] %v4729_v24 }
 0x570   :  { %v4731_v25 = vpop.permute.xlu1 %2253  ;;  %1387 = vrot.lane.b32.xlu0 %v4183_v14, %s3349_s23 }
 0x571   :  { %7351 = vst [vmem:[#allocation102_spill] sm:$0xff] %v4731_v25 }
 0x572   :  { %1500 = vrot.lane.b32.xlu1 %v4171_v17, %s3350_s24  ;;  %v4737_v37 = vpop.permute.xlu0 %2255 }
 0x573   :  { %7352 = vst [vmem:[#allocation103_spill] sm:$0xff] %v4737_v37 }
 0x574   :  { %v1350_v18 = vpop.permute.xlu1 %1349  ;;  %1502 = vrot.lane.b32.xlu0 %v4181_v20, %s3350_s24 }
 0x575   :  { %v1414_v5 = vsel %vm1395_vm1, %v4627_v43, %v1350_v18 }
 0x576   :  { %1532 = vrot.lane.b32.xlu1 %v4173_v34, %s3350_s24  ;;  %v1352_v24 = vpop.permute.xlu0 %1351  ;;  %v1453_v39 = vmul.f32 %v4493_v47, %v1414_v5  ;;  %v1406_v5 = vsel %vm1395_vm1, %v1350_v18, %v4635_v16 }
 0x577   :  { %v1415_v25 = vsel %vm1395_vm1, %v4633_v3, %v1352_v24  ;;  %v1407_v37 = vsel %vm1395_vm1, %v1352_v24, %v4641_v9 }
 0x578   :  { %v1457_v61 = vmul.f32 %v4493_v47, %v1415_v25  ;;  %v1382_v56 = vpop.permute.xlu1 %1381  ;;  %1534 = vrot.lane.b32.xlu0 %v4183_v14, %s3350_s24  ;;  %v1458_v49 = vmul.f32 %v4522_v29, %v1407_v37 }
 0x579   :  { %v1398_v31 = vsel %vm1395_vm1, %v4635_v16, %v1382_v56  ;;  %v1422_v51 = vsel %vm1395_vm1, %v1382_v56, %v4627_v43 }
 0x57a   :  { %1645 = vrot.lane.b32.xlu1 %v4171_v17, %s3351_s25  ;;  %v1384_v25 = vpop.permute.xlu0 %1383  ;;  %v2544_v24 = vpack.c.bf16 %v1457_v61, %v1453_v39  ;;  %v1452_v15 = vmul.f32 %v4507_v0, %v1422_v51  ;;  %v1455_v43 = vmul.f32 %v4516_v7, %v1398_v31  ;;  %v1454_v51 = vmul.f32 %v4522_v29, %v1406_v5 }
 0x57b   :  { %v1399_v11 = vsel %vm1395_vm1, %v4641_v9, %v1384_v25  ;;  %v1423_v56 = vsel %vm1395_vm1, %v1384_v25, %v4633_v3 }
 0x57c   :  { %v1456_v18 = vmul.f32 %v4507_v0, %v1423_v56  ;;  %v1459_v16 = vmul.f32 %v4516_v7, %v1399_v11  ;;  %v4778_v46 = vpop.permute.xlu1 %1496  ;;  %1647 = vrot.lane.b32.xlu0 %v4181_v20, %s3351_s25  ;;  %2714 = vmatprep.subr.bf16.mxu1 %v2544_v24  ;;  %v2545_v31 = vpack.c.bf16 %v1458_v49, %v1454_v51 }
 0x57e   :  { %v2543_v61 = vpack.c.bf16 %v1456_v18, %v1452_v15  ;;  %1677 = vrot.lane.b32.xlu1 %v4173_v34, %s3351_s25  ;;  %v4785_v39 = vpop.permute.xlu0 %1498  ;;  %v2546_v37 = vpack.c.bf16 %v1459_v16, %v1455_v43 }
 0x580   :  { %v4787_v9 = vpop.permute.xlu1 %1528  ;;  %1679 = vrot.lane.b32.xlu0 %v4183_v14, %s3351_s25  ;;  %2715 = vmatpush1.bf16.msra.mxu1 %v2543_v61 }
 0x581   :  { %7353 = vst [vmem:[#allocation104_spill] sm:$0xff] %v4787_v9  ;;  %2837 = vmatprep.subr.bf16.mxu0 %v2546_v37 }
 0x582   :  { %2838 = vmatpush1.bf16.msra.mxu0 %v2545_v31  ;;  %1790 = vrot.lane.b32.xlu1 %v4171_v17, %s3342_s28  ;;  %v4793_v11 = vpop.permute.xlu0 %1530 }
 0x583   :  { %7354 = vst [vmem:[#allocation105_spill] sm:$0xff] %v4793_v11 }
 0x584   :  { %v4795_v15 = vpop.permute.xlu1 %1641  ;;  %1792 = vrot.lane.b32.xlu0 %v4181_v20, %s3342_s28 }
 0x585   :  { %7355 = vst [vmem:[#allocation106_spill] sm:$0xff] %v4795_v15 }
 0x586   :  { %1822 = vrot.lane.b32.xlu1 %v4173_v34, %s3342_s28  ;;  %v4801_v49 = vpop.permute.xlu0 %1643 }
 0x587   :  { %7356 = vst [vmem:[#allocation107_spill] sm:$0xff] %v4801_v49 }
 0x588   :  { %v4803_v3 = vpop.permute.xlu1 %1673  ;;  %1824 = vrot.lane.b32.xlu0 %v4183_v14, %s3342_s28 }
 0x589   :  { %7357 = vst [vmem:[#allocation108_spill] sm:$0xff] %v4803_v3 }
 0x58a   :  { %1983 = vrot.lane.b32.xlu1 %v4171_v17, %s3346_s11  ;;  %v4809_v5 = vpop.permute.xlu0 %1675 }
 0x58b   :  { %7358 = vst [vmem:[#allocation109_spill] sm:$0xff] %v4809_v5 }
 0x58c   :  { %v4811_v25 = vpop.permute.xlu1 %1786  ;;  %1985 = vrot.lane.b32.xlu0 %v4181_v20, %s3346_s11 }
 0x58d   :  { %7359 = vst [vmem:[#allocation110_spill] sm:$0xff] %v4811_v25 }
 0x58e   :  { %2128 = vrot.lane.b32.xlu1 %v4171_v17, %s3352_s26  ;;  %v4817_v24 = vpop.permute.xlu0 %1788 }
 0x58f   :  { %7360 = vst [vmem:[#allocation111_spill] sm:$0xff] %v4817_v24 }
 0x590   :  { %v4819_v56 = vpop.permute.xlu1 %1818  ;;  %2130 = vrot.lane.b32.xlu0 %v4181_v20, %s3352_s26 }
 0x591   :  { %7361 = vst [vmem:[#allocation112_spill] sm:$0xff] %v4819_v56 }
 0x592   :  { %2015 = vrot.lane.b32.xlu1 %v4173_v34, %s3346_s11  ;;  %v4825_v43 = vpop.permute.xlu0 %1820 }
 0x593   :  { %7362 = vst [vmem:[#allocation113_spill] sm:$0xff] %v4825_v43 }
 0x594   :  { %v4827_v18 = vpop.permute.xlu1 %1979  ;;  %2017 = vrot.lane.b32.xlu0 %v4183_v14, %s3346_s11 }
 0x595   :  { %7363 = vst [vmem:[#allocation114_spill] sm:$0xff] %v4827_v18 }
 0x596   :  { %2273 = vrot.lane.b32.xlu1 %v4171_v17, %s3353_s27  ;;  %v4833_v16 = vpop.permute.xlu0 %1981 }
 0x597   :  { %7364 = vst [vmem:[#allocation115_spill] sm:$0xff] %v4833_v16 }
 0x598   :  { %v4835_v51 = vpop.permute.xlu1 %2124  ;;  %2275 = vrot.lane.b32.xlu0 %v4181_v20, %s3353_s27 }
 0x599   :  { %7365 = vst [vmem:[#allocation116_spill] sm:$0xff] %v4835_v51 }
 0x59a   :  { %1341 = vrot.lane.b32.xlu1 %v4229_v1, %s3349_s23  ;;  %v4841_v61 = vpop.permute.xlu0 %2126 }
 0x59b   :  { %7366 = vst [vmem:[#allocation117_spill] sm:$0xff] %v4841_v61 }
 0x59c   :  { %v4843_v37 = vpop.permute.xlu1 %2011  ;;  %1343 = vrot.lane.b32.xlu0 %v4239_v60, %s3349_s23 }
 0x59d   :  { %7367 = vst [vmem:[#allocation118_spill] sm:$0xff] %v4843_v37 }
 0x59e   :  { %1373 = vrot.lane.b32.xlu1 %v4231_v2, %s3349_s23  ;;  %v4849_v31 = vpop.permute.xlu0 %2013 }
 0x59f   :  { %7368 = vst [vmem:[#allocation119_spill] sm:$0xff] %v4849_v31 }
 0x5a0   :  { %v4851_v18 = vpop.permute.xlu1 %2269  ;;  %1375 = vrot.lane.b32.xlu0 %v4241_v22, %s3349_s23 }
 0x5a1   :  { %7369 = vst [vmem:[#allocation120_spill] sm:$0xff] %v4851_v18 }
 0x5a2   :  { %1488 = vrot.lane.b32.xlu1 %v4229_v1, %s3350_s24  ;;  %v4857_v51 = vpop.permute.xlu0 %2271 }
 0x5a3   :  { %7370 = vst [vmem:[#allocation121_spill] sm:$0xff] %v4857_v51 }
 0x5a4   :  { %v4859_v61 = vpop.permute.xlu1 %1337  ;;  %1490 = vrot.lane.b32.xlu0 %v4239_v60, %s3350_s24 }
 0x5a6   :  { %1633 = vrot.lane.b32.xlu1 %v4229_v1, %s3351_s25  ;;  %v4865_v37 = vpop.permute.xlu0 %1339 }
 0x5a8   :  { %v4867_v31 = vpop.permute.xlu1 %1369  ;;  %1635 = vrot.lane.b32.xlu0 %v4239_v60, %s3351_s25 }
 0x5aa   :  { %1520 = vrot.lane.b32.xlu1 %v4231_v2, %s3350_s24  ;;  %v4873_v18 = vpop.permute.xlu0 %1371 }
 0x5ac   :  { %v4875_v51 = vpop.permute.xlu1 %1484  ;;  %1522 = vrot.lane.b32.xlu0 %v4241_v22, %s3350_s24 }
 0x5ad   :  { %7371 = vst [vmem:[#allocation122_spill] sm:$0xff] %v4875_v51 }
 0x5ae   :  { %1778 = vrot.lane.b32.xlu1 %v4229_v1, %s3342_s28  ;;  %v4881_v16 = vpop.permute.xlu0 %1486 }
 0x5af   :  { %7372 = vst [vmem:[#allocation123_spill] sm:$0xff] %v4881_v16 }
 0x5b0   :  { %v4883_v43 = vpop.permute.xlu1 %1629  ;;  %1780 = vrot.lane.b32.xlu0 %v4239_v60, %s3342_s28 }
 0x5b1   :  { %7373 = vst [vmem:[#allocation124_spill] sm:$0xff] %v4883_v43 }
 0x5b2   :  { %1665 = vrot.lane.b32.xlu1 %v4231_v2, %s3351_s25  ;;  %v4889_v56 = vpop.permute.xlu0 %1631 }
 0x5b3   :  { %7374 = vst [vmem:[#allocation125_spill] sm:$0xff] %v4889_v56 }
 0x5b4   :  { %v4891_v24 = vpop.permute.xlu1 %1516  ;;  %1667 = vrot.lane.b32.xlu0 %v4241_v22, %s3351_s25 }
 0x5b5   :  { %7375 = vst [vmem:[#allocation126_spill] sm:$0xff] %v4891_v24 }
 0x5b6   :  { %1810 = vrot.lane.b32.xlu1 %v4231_v2, %s3342_s28  ;;  %v4897_v25 = vpop.permute.xlu0 %1518 }
 0x5b7   :  { %7376 = vst [vmem:[#allocation127_spill] sm:$0xff] %v4897_v25 }
 0x5b8   :  { %v4899_v51 = vpop.permute.xlu1 %1774  ;;  %1812 = vrot.lane.b32.xlu0 %v4241_v22, %s3342_s28 }
 0x5b9   :  { %7377 = vst [vmem:[#allocation128_spill] sm:$0xff] %v4899_v51 }
 0x5ba   :  { %2003 = vrot.lane.b32.xlu1 %v4231_v2, %s3346_s11  ;;  %v4905_v43 = vpop.permute.xlu0 %1776 }
 0x5bb   :  { %7378 = vst [vmem:[#allocation129_spill] sm:$0xff] %v4905_v43 }
 0x5bc   :  { %v4907_v56 = vpop.permute.xlu1 %1661  ;;  %2005 = vrot.lane.b32.xlu0 %v4241_v22, %s3346_s11 }
 0x5bd   :  { %7379 = vst [vmem:[#allocation130_spill] sm:$0xff] %v4907_v56 }
 0x5be   :  { %1971 = vrot.lane.b32.xlu1 %v4229_v1, %s3346_s11  ;;  %v4913_v24 = vpop.permute.xlu0 %1663 }
 0x5bf   :  { %7380 = vst [vmem:[#allocation131_spill] sm:$0xff] %v4913_v24 }
 0x5c0   :  { %v4915_v5 = vpop.permute.xlu1 %1806  ;;  %1973 = vrot.lane.b32.xlu0 %v4239_v60, %s3346_s11 }
 0x5c1   :  { %7381 = vst [vmem:[#allocation132_spill] sm:$0xff] %v4915_v5 }
 0x5c2   :  { %2148 = vrot.lane.b32.xlu1 %v4231_v2, %s3352_s26  ;;  %v4921_v51 = vpop.permute.xlu0 %1808 }
 0x5c3   :  { %7382 = vst [vmem:[#allocation133_spill] sm:$0xff] %v4921_v51 }
 0x5c4   :  { %v4923_v43 = vpop.permute.xlu1 %1999  ;;  %2150 = vrot.lane.b32.xlu0 %v4241_v22, %s3352_s26 }
 0x5c5   :  { %7383 = vst [vmem:[#allocation134_spill] sm:$0xff] %v4923_v43 }
 0x5c6   :  { %2116 = vrot.lane.b32.xlu1 %v4229_v1, %s3352_s26  ;;  %v4929_v56 = vpop.permute.xlu0 %2001 }
 0x5c7   :  { %7384 = vst [vmem:[#allocation135_spill] sm:$0xff] %v4929_v56 }
 0x5c8   :  { %v4931_v24 = vpop.permute.xlu1 %1967  ;;  %2118 = vrot.lane.b32.xlu0 %v4239_v60, %s3352_s26 }
 0x5c9   :  { %7385 = vst [vmem:[#allocation136_spill] sm:$0xff] %v4931_v24 }
 0x5ca   :  { %1357 = vrot.lane.b32.xlu1 %v4235_v33, %s3349_s23  ;;  %v4937_v5 = vpop.permute.xlu0 %1969 }
 0x5cb   :  { %7386 = vst [vmem:[#allocation137_spill] sm:$0xff] %v4937_v5 }
 0x5cc   :  { %v4939_v51 = vpop.permute.xlu1 %2144  ;;  %1359 = vrot.lane.b32.xlu0 %v4245_v27, %s3349_s23 }
 0x5cd   :  { %7387 = vst [vmem:[#allocation138_spill] sm:$0xff] %v4939_v51 }
 0x5ce   :  { %1389 = vrot.lane.b32.xlu1 %v4237_v6, %s3349_s23  ;;  %v4945_v43 = vpop.permute.xlu0 %2146 }
 0x5cf   :  { %7388 = vst [vmem:[#allocation139_spill] sm:$0xff] %v4945_v43 }
 0x5d0   :  { %v4947_v56 = vpop.permute.xlu1 %2112  ;;  %1391 = vrot.lane.b32.xlu0 %v4247_v8, %s3349_s23 }
 0x5d1   :  { %7389 = vst [vmem:[#allocation140_spill] sm:$0xff] %v4947_v56 }
 0x5d2   :  { %2293 = vrot.lane.b32.xlu1 %v4231_v2, %s3353_s27  ;;  %v4953_v24 = vpop.permute.xlu0 %2114 }
 0x5d3   :  { %7390 = vst [vmem:[#allocation141_spill] sm:$0xff] %v4953_v24 }
 0x5d4   :  { %v4955_v5 = vpop.permute.xlu1 %2289  ;;  %2295 = vrot.lane.b32.xlu0 %v4241_v22, %s3353_s27 }
 0x5d5   :  { %7391 = vst [vmem:[#allocation142_spill] sm:$0xff] %v4955_v5 }
 0x5d6   :  { %1504 = vrot.lane.b32.xlu1 %v4235_v33, %s3350_s24  ;;  %v4961_v51 = vpop.permute.xlu0 %2291 }
 0x5d7   :  { %7392 = vst [vmem:[#allocation143_spill] sm:$0xff] %v4961_v51 }
 0x5d8   :  { %v4963_v43 = vpop.permute.xlu1 %2257  ;;  %2263 = vrot.lane.b32.xlu0 %v4239_v60, %s3353_s27 }
 0x5d9   :  { %7393 = vst [vmem:[#allocation144_spill] sm:$0xff] %v4963_v43 }
 0x5da   :  { %1536 = vrot.lane.b32.xlu1 %v4237_v6, %s3350_s24  ;;  %v4969_v56 = vpop.permute.xlu0 %2259 }
 0x5db   :  { %7394 = vst [vmem:[#allocation145_spill] sm:$0xff] %v4969_v56 }
 0x5dc   :  { %v1354_v24 = vpop.permute.xlu1 %1353  ;;  %1506 = vrot.lane.b32.xlu0 %v4245_v27, %s3350_s24 }
 0x5dd   :  { %v1416_v5 = vsel %vm1395_vm1, %v4859_v61, %v1354_v24 }
 0x5de   :  { %1649 = vrot.lane.b32.xlu1 %v4235_v33, %s3351_s25  ;;  %v1356_v43 = vpop.permute.xlu0 %1355  ;;  %v1461_v16 = vmul.f32 %v4493_v47, %v1416_v5  ;;  %v1408_v5 = vsel %vm1395_vm1, %v1354_v24, %v4867_v31 }
 0x5df   :  { %v1417_v51 = vsel %vm1395_vm1, %v4865_v37, %v1356_v43  ;;  %v1409_v56 = vsel %vm1395_vm1, %v1356_v43, %v4873_v18 }
 0x5e0   :  { %v1465_v25 = vmul.f32 %v4493_v47, %v1417_v51  ;;  %v1386_v3 = vpop.permute.xlu1 %1385  ;;  %1538 = vrot.lane.b32.xlu0 %v4247_v8, %s3350_s24  ;;  %v1466_v47 = vmul.f32 %v4522_v29, %v1409_v56 }
 0x5e1   :  { %v1400_v49 = vsel %vm1395_vm1, %v4867_v31, %v1386_v3  ;;  %v1424_v15 = vsel %vm1395_vm1, %v1386_v3, %v4859_v61 }
 0x5e2   :  { %1681 = vrot.lane.b32.xlu1 %v4237_v6, %s3351_s25  ;;  %v1388_v43 = vpop.permute.xlu0 %1387  ;;  %v2548_v51 = vpack.c.bf16 %v1465_v25, %v1461_v16  ;;  %v1460_v11 = vmul.f32 %v4507_v0, %v1424_v15  ;;  %v1463_v61 = vmul.f32 %v4516_v7, %v1400_v49  ;;  %v1462_v15 = vmul.f32 %v4522_v29, %v1408_v5 }
 0x5e3   :  { %v1401_v9 = vsel %vm1395_vm1, %v4873_v18, %v1388_v43  ;;  %v1425_v3 = vsel %vm1395_vm1, %v1388_v43, %v4865_v37 }
 0x5e4   :  { %v1464_v24 = vmul.f32 %v4507_v0, %v1425_v3  ;;  %v1467_v31 = vmul.f32 %v4516_v7, %v1401_v9  ;;  %v5010_v2 = vpop.permute.xlu1 %1500  ;;  %2154 = vrot.lane.b32.xlu0 %v4051_v30, %s3352_s26  ;;  %2716 = vmatprep.subr.bf16.mxu1 %v2548_v51  ;;  %v2549_v49 = vpack.c.bf16 %v1466_v47, %v1462_v15  ;;  %v5058_v3 = vld [vmem:[%s7002_s8] sm:$0xff] }
 0x5e5   :  { %7402 = vst [vmem:[#allocation153_spill] sm:$0xff] %v5058_v3 }
 0x5e6   :  { %v2547_v25 = vpack.c.bf16 %v1464_v24, %v1460_v11  ;;  %1794 = vrot.lane.b32.xlu1 %v4235_v33, %s3342_s28  ;;  %v5017_v56 = vpop.permute.xlu0 %1502  ;;  %v2550_v18 = vpack.c.bf16 %v1467_v31, %v1463_v61 }
 0x5e8   :  { %v5019_v16 = vpop.permute.xlu1 %1532  ;;  %2412 = vrot.lane.b32.xlu0 %v4055_v44, %s3354_s0  ;;  %2717 = vmatpush1.bf16.msra.mxu1 %v2547_v25 }
 0x5e9   :  { %2839 = vmatprep.subr.bf16.mxu0 %v2550_v18 }
 0x5ea   :  { %2840 = vmatpush1.bf16.msra.mxu0 %v2549_v49  ;;  %1826 = vrot.lane.b32.xlu1 %v4237_v6, %s3342_s28  ;;  %v5025_v9 = vpop.permute.xlu0 %1534 }
 0x5ec   :  { %v5027_v11 = vpop.permute.xlu1 %1645  ;;  %1651 = vrot.lane.b32.xlu0 %v4245_v27, %s3351_s25 }
 0x5ed   :  { %7395 = vst [vmem:[#allocation146_spill] sm:$0xff] %v5027_v11 }
 0x5ee   :  { %1987 = vrot.lane.b32.xlu1 %v4235_v33, %s3346_s11  ;;  %v5033_v47 = vpop.permute.xlu0 %1647 }
 0x5ef   :  { %7396 = vst [vmem:[#allocation147_spill] sm:$0xff] %v5033_v47  ;;  %v7444_v47 = vld [vmem:[#allocation67_spill] sm:$0xff] }
 0x5f0   :  { %v5035_v37 = vpop.permute.xlu1 %1677  ;;  %1683 = vrot.lane.b32.xlu0 %v4247_v8, %s3351_s25 }
 0x5f1   :  { %7397 = vst [vmem:[#allocation148_spill] sm:$0xff] %v5035_v37 }
 0x5f2   :  { %2132 = vrot.lane.b32.xlu1 %v4235_v33, %s3352_s26  ;;  %v5041_v44 = vpop.permute.xlu0 %1679 }
 0x5f3   :  { %7398 = vst [vmem:[#allocation149_spill] sm:$0xff] %v5041_v44 }
 0x5f4   :  { %v5043_v5 = vpop.permute.xlu1 %1790  ;;  %2428 = vrot.lane.b32.xlu0 %v4049_v42, %s3354_s0  ;;  %v3067_v42 = vcombine.high %v5058_v3, %v5058_v3  ;;  %v5195_v3 = vld [vmem:[%s7001_s7 + $0x18] sm:$0xff] }
 0x5f5   :  { %7399 = vst [vmem:[#allocation150_spill] sm:$0xff] %v5043_v5  ;;  %7425 = vst [vmem:[#allocation176_spill] sm:$0xff] %v5195_v3  ;;  %v5269_v11 = vrot.slane %v5195_v3, %v3611_v13 }
 0x5f6   :  { %2019 = vrot.lane.b32.xlu1 %v4237_v6, %s3346_s11  ;;  %v5049_v43 = vpop.permute.xlu0 %1792  ;;  %2744 = vmatprep.mubr.bf16.mxu1 %v3067_v42 }
 0x5f7   :  { %7400 = vst [vmem:[#allocation151_spill] sm:$0xff] %v5049_v43  ;;  %2867 = vmatprep.mubr.bf16.mxu0 %v3067_v42 }
 0x5f8   :  { %v5051_v51 = vpop.permute.xlu1 %1822  ;;  %2396 = vrot.lane.b32.xlu0 %v4047_v41, %s3354_s0 }
 0x5f9   :  { %7401 = vst [vmem:[#allocation152_spill] sm:$0xff] %v5051_v51 }
 0x5fa   :  { %2277 = vrot.lane.b32.xlu1 %v4235_v33, %s3353_s27  ;;  %v5062_v61 = vpop.permute.xlu0 %1824 }
 0x5fb   :  { %7403 = vst [vmem:[#allocation154_spill] sm:$0xff] %v5062_v61  ;;  %v1557_v61 = vsel %vm1540_vm2, %v4391_v36, %v4546_v10 }
 0x5fc   :  { %v5066_v24 = vpop.permute.xlu1 %1983  ;;  %1796 = vrot.lane.b32.xlu0 %v4245_v27, %s3342_s28 }
 0x5fd   :  { %7404 = vst [vmem:[#allocation155_spill] sm:$0xff] %v5066_v24  ;;  %v5186_v24 = vld [vmem:[%s7001_s7] sm:$0xff] }
 0x5fe   :  { %2261 = vrot.lane.b32.xlu1 %v4229_v1, %s3353_s27  ;;  %v5072_v41 = vpop.permute.xlu0 %1985  ;;  %7424 = vst [vmem:[#allocation175_spill] sm:$0xff] %v5186_v24 }
 0x5ff   :  { %7405 = vst [vmem:[#allocation156_spill] sm:$0xff] %v5072_v41  ;;  %v5190_v41 = vrot.slane %v5186_v24, %v3630_v32 }
 0x600   :  { %v5074_v31 = vpop.permute.xlu1 %2128  ;;  %1828 = vrot.lane.b32.xlu0 %v4247_v8, %s3342_s28 }
 0x601   :  { %7406 = vst [vmem:[#allocation157_spill] sm:$0xff] %v5074_v31 }
 0x602   :  { %2152 = vrot.lane.b32.xlu1 %v4041_v40, %s3352_s26  ;;  %v5080_v15 = vpop.permute.xlu0 %2130 }
 0x603   :  { %7407 = vst [vmem:[#allocation158_spill] sm:$0xff] %v5080_v15 }
 0x604   :  { %v5082_v25 = vpop.permute.xlu1 %2015  ;;  %2158 = vrot.lane.b32.xlu0 %v4115_v63, %s3352_s26 }
 0x605   :  { %7408 = vst [vmem:[#allocation159_spill] sm:$0xff] %v5082_v25  ;;  %v5163_v25 = vld [vmem:[%s7001_s7 + $0x8] sm:$0xff] }
 0x606   :  { %2410 = vrot.lane.b32.xlu1 %v4045_v38, %s3354_s0  ;;  %v5088_v18 = vpop.permute.xlu0 %2017  ;;  %7422 = vst [vmem:[#allocation173_spill] sm:$0xff] %v5163_v25  ;;  %v5211_v5 = vrot.slane %v5163_v25, %v3575_v35 }
 0x607   :  { %7409 = vst [vmem:[#allocation160_spill] sm:$0xff] %v5088_v18  ;;  %v1550_v18 = vsel %vm1540_vm2, %v4553_v50, %v4413_v23 }
 0x608   :  { %v5090_v49 = vpop.permute.xlu1 %2273  ;;  %2416 = vrot.lane.b32.xlu0 %v4119_v28, %s3354_s0 }
 0x609   :  { %7410 = vst [vmem:[#allocation161_spill] sm:$0xff] %v5090_v49 }
 0x60a   :  { %2426 = vrot.lane.b32.xlu1 %v4031_v26, %s3354_s0  ;;  %v5096_v42 = vpop.permute.xlu0 %2275 }
 0x60b   :  { %7411 = vst [vmem:[#allocation162_spill] sm:$0xff] %v5096_v42 }
 0x60c   :  { %v5098_v31 = vpop.permute.xlu1 %1341  ;;  %2432 = vrot.lane.b32.xlu0 %v4113_v62, %s3354_s0 }
 0x60e   :  { %2394 = vrot.lane.b32.xlu1 %v4029_v4, %s3354_s0  ;;  %v5104_v38 = vpop.permute.xlu0 %1343 }
 0x610   :  { %v5106_v15 = vpop.permute.xlu1 %1373  ;;  %2400 = vrot.lane.b32.xlu0 %v4111_v59, %s3354_s0 }
 0x612   :  { %2156 = vrot.lane.b32.xlu1 %v4105_v58, %s3352_s26  ;;  %v5112_v26 = vpop.permute.xlu0 %1375 }
 0x614   :  { %v5114_v28 = vpop.permute.xlu1 %1488  ;;  %2162 = vrot.lane.b32.xlu0 %v4183_v14, %s3352_s26 }
 0x616   :  { %2414 = vrot.lane.b32.xlu1 %v4109_v21, %s3354_s0  ;;  %v5120_v4 = vpop.permute.xlu0 %1490 }
 0x617   :  { %7412 = vst [vmem:[#allocation163_spill] sm:$0xff] %v5120_v4 }
 0x618   :  { %v5122_v62 = vpop.permute.xlu1 %1633  ;;  %2420 = vrot.lane.b32.xlu0 %v4181_v20, %s3354_s0 }
 0x619   :  { %7413 = vst [vmem:[#allocation164_spill] sm:$0xff] %v5122_v62 }
 0x61a   :  { %2430 = vrot.lane.b32.xlu1 %v4103_v54, %s3354_s0  ;;  %v5128_v59 = vpop.permute.xlu0 %1635 }
 0x61b   :  { %7414 = vst [vmem:[#allocation165_spill] sm:$0xff] %v5128_v59 }
 0x61c   :  { %v5130_v49 = vpop.permute.xlu1 %1520  ;;  %2436 = vrot.lane.b32.xlu0 %v4177_v52, %s3354_s0 }
 0x61d   :  { %7415 = vst [vmem:[#allocation166_spill] sm:$0xff] %v5130_v49  ;;  %v7461_v49 = vld [vmem:[#allocation49_spill] sm:$0xff] }
 0x61e   :  { %2398 = vrot.lane.b32.xlu1 %v4101_v57, %s3354_s0  ;;  %v5136_v21 = vpop.permute.xlu0 %1522 }
 0x61f   :  { %7416 = vst [vmem:[#allocation167_spill] sm:$0xff] %v5136_v21  ;;  %v7462_v21 = vld [vmem:[#allocation85_spill] sm:$0xff] }
 0x620   :  { %v5138_v42 = vpop.permute.xlu1 %1778  ;;  %1989 = vrot.lane.b32.xlu0 %v4245_v27, %s3346_s11 }
 0x621   :  { %7417 = vst [vmem:[#allocation168_spill] sm:$0xff] %v5138_v42  ;;  %v7437_v42 = vld [vmem:[#allocation63_spill] sm:$0xff] }
 0x622   :  { %2160 = vrot.lane.b32.xlu1 %v4173_v34, %s3352_s26  ;;  %v5144_v54 = vpop.permute.xlu0 %1780 }
 0x623   :  { %7418 = vst [vmem:[#allocation169_spill] sm:$0xff] %v5144_v54  ;;  %v5199_v54 = vrot.slane %v5195_v3, %v3630_v32 }
 0x624   :  { %v5146_v20 = vpop.permute.xlu1 %1665  ;;  %2404 = vrot.lane.b32.xlu0 %v4175_v19, %s3354_s0  ;;  %v5167_v19 = vrot.slane %v5163_v25, %v3630_v32 }
 0x625   :  { %7419 = vst [vmem:[#allocation170_spill] sm:$0xff] %v5146_v20  ;;  %v5235_v20 = vrot.slane %v5163_v25, %v3611_v13 }
 0x626   :  { %2418 = vrot.lane.b32.xlu1 %v4171_v17, %s3354_s0  ;;  %v5152_v57 = vpop.permute.xlu0 %1667  ;;  %v5173_v17 = vld [vmem:[%s7001_s7 + $0x10] sm:$0xff] }
 0x627   :  { %7420 = vst [vmem:[#allocation171_spill] sm:$0xff] %v5152_v57  ;;  %7423 = vst [vmem:[#allocation174_spill] sm:$0xff] %v5173_v17  ;;  %v5215_v43 = vrot.slane %v5173_v17, %v3575_v35  ;;  %v5231_v57 = vrot.slane %v5195_v3, %v3575_v35  ;;  %v5254_v25 = vrot.slane %v5173_v17, %v3611_v13  ;;  %v7439_v3 = vld [vmem:[#allocation64_spill] sm:$0xff] }
 0x628   :  { %v5155_v52 = vpop.permute.xlu1 %1810  ;;  %2440 = vrot.lane.b32.xlu0 %v4241_v22, %s3354_s0  ;;  %v5177_v22 = vrot.slane %v5173_v17, %v3630_v32  ;;  %v5219_v32 = vrot.slane %v5186_v24, %v3575_v35  ;;  %7427 = vst [vmem:[#allocation178_spill] sm:$0xff] %v5235_v20  ;;  %v1566_v35 = vsel %vm1540_vm2, %v4561_v55, %v4397_v53 }
 0x629   :  { %7421 = vst [vmem:[#allocation172_spill] sm:$0xff] %v5155_v52  ;;  %7429 = vst [vmem:[#allocation180_spill] sm:$0xff] %v5254_v25  ;;  %v7440_v52 = vld [vmem:[#allocation43_spill] sm:$0xff] }
 0x62a   :  { %2434 = vrot.lane.b32.xlu1 %v4167_v12, %s3354_s0  ;;  %v5203_v51 = vpop.permute.xlu0 %1812  ;;  %v1549_v12 = vsel %vm1540_vm2, %v4546_v10, %v4407_v45  ;;  %v5242_v10 = vmul.f32 %v5177_v22, %v1550_v18  ;;  %v7431_v18 = vld [vmem:[#allocation65_spill] sm:$0xff] }
 0x62b   :  { %7426 = vst [vmem:[#allocation177_spill] sm:$0xff] %v5203_v51  ;;  %v1558_v51 = vsel %vm1540_vm2, %v4397_v53, %v4553_v50  ;;  %v1542_v50 = vsel %vm1540_vm2, %v4413_v23, %v4561_v55  ;;  %v5265_v23 = vrot.slane %v5186_v24, %v3611_v13  ;;  %7433 = vst [vmem:[#allocation65_spill] sm:$0xff] %v5269_v11  ;;  %v7434_v53 = vld [vmem:[#allocation21_spill] sm:$0xff] }
 0x62c   :  { %v5237_v59 = vpop.permute.xlu1 %2003  ;;  %2408 = vrot.lane.b32.xlu0 %v4239_v60, %s3354_s0  ;;  %v7430_v60 = vld [vmem:[#allocation47_spill] sm:$0xff]  ;;  %v5279_v17 = vmul.f32 %v5167_v19, %v1558_v51  ;;  %v1541_v24 = vsel %vm1540_vm2, %v4407_v45, %v7437_v42  ;;  %v1565_v13 = vsel %vm1540_vm2, %v7437_v42, %v4391_v36  ;;  %v1703_v45 = vsel %vm1685_vm3, %v7440_v52, %v7431_v18  ;;  %v7442_v42 = vld [vmem:[#allocation42_spill] sm:$0xff] }
 0x62d   :  { %7428 = vst [vmem:[#allocation179_spill] sm:$0xff] %v5237_v59  ;;  %v5257_v59 = vmul.f32 %v5167_v19, %v1557_v61  ;;  %v1695_v37 = vsel %vm1685_vm3, %v7431_v18, %v7430_v60  ;;  %7432 = vst [vmem:[#allocation47_spill] sm:$0xff] %v5265_v23  ;;  %v5276_v61 = vmul.f32 %v5177_v22, %v1549_v12  ;;  %v7438_v12 = vld [vmem:[#allocation46_spill] sm:$0xff] }
 0x62e   :  { %2402 = vrot.lane.b32.xlu1 %v7434_v53, %s3354_s0  ;;  %v5273_v55 = vpop.permute.xlu0 %2005  ;;  %v5290_v53 = vmul.f32 %v5190_v41, %v1566_v35  ;;  %v1694_v51 = vsel %vm1685_vm3, %v7439_v3, %v7438_v12  ;;  %v5314_v35 = vmul.f32 %v5215_v43, %v1695_v37  ;;  %v1711_v18 = vsel %vm1685_vm3, %v7444_v47, %v7440_v52  ;;  %v7445_v36 = vld [vmem:[#allocation66_spill] sm:$0xff] }
 0x62f   :  { %7435 = vst [vmem:[#allocation21_spill] sm:$0xff] %v5273_v55  ;;  %7436 = vst [vmem:[#allocation181_spill] sm:$0xff] %v5276_v61  ;;  %v5293_v55 = vmul.f32 %v5199_v54, %v1542_v50  ;;  %v1702_v50 = vsel %vm1685_vm3, %v7442_v42, %v7439_v3  ;;  %v5324_v14 = vmul.f32 %v5199_v54, %v1541_v24 }
 0x630   :  { %v5303_v44 = vpop.permute.xlu1 %1971  ;;  %2134 = vrot.lane.b32.xlu0 %v4245_v27, %s3352_s26  ;;  %7443 = vst [vmem:[#allocation46_spill] sm:$0xff] %v5314_v35  ;;  %v1686_v34 = vsel %vm1685_vm3, %v7438_v12, %v7445_v36  ;;  %v1710_v37 = vsel %vm1685_vm3, %v7445_v36, %v7442_v42  ;;  %v5339_v52 = vmul.f32 %v5215_v43, %v1694_v51  ;;  %v7453_v36 = vld [vmem:[#allocation68_spill] sm:$0xff] }
 0x631   :  { %7441 = vst [vmem:[#allocation63_spill] sm:$0xff] %v5303_v44  ;;  %v5321_v44 = vmul.f32 %v5190_v41, %v1565_v13  ;;  %v5342_v24 = vmul.f32 %v5211_v5, %v1703_v45  ;;  %v1687_v13 = vsel %vm1685_vm3, %v7430_v60, %v7444_v47  ;;  %v5353_v42 = vmul.f32 %v5211_v5, %v1702_v50  ;;  %v7457_v60 = vld [vmem:[#allocation69_spill] sm:$0xff] }
 0x632   :  { %2164 = vrot.lane.b32.xlu1 %v4237_v6, %s3352_s26  ;;  %v5336_v3 = vpop.permute.xlu0 %1973  ;;  %7447 = vst [vmem:[#allocation43_spill] sm:$0xff] %v5339_v52  ;;  %v5356_v51 = vmul.f32 %v5219_v32, %v1711_v18  ;;  %v5367_v45 = vmul.f32 %v5219_v32, %v1710_v37  ;;  %v5370_v50 = vmul.f32 %v5231_v57, %v1686_v34  ;;  %v7454_v18 = vld [vmem:[#allocation44_spill] sm:$0xff]  ;;  %v7458_v52 = vld [vmem:[#allocation45_spill] sm:$0xff]  ;;  %v7459_v34 = vld [vmem:[#allocation71_spill] sm:$0xff] }
 0x633   :  { %7446 = vst [vmem:[#allocation64_spill] sm:$0xff] %v5336_v3  ;;  %7448 = vst [vmem:[#allocation42_spill] sm:$0xff] %v5353_v42  ;;  %v1847_v12 = vsel %vm1830_vm4, %v7454_v18, %v7453_v36  ;;  %v7456_v6 = vld [vmem:[#allocation48_spill] sm:$0xff]  ;;  %v1848_v37 = vsel %vm1830_vm4, %v7458_v52, %v7457_v60  ;;  %v1856_v35 = vsel %vm1830_vm4, %v7459_v34, %v7458_v52 }
 0x634   :  { %7449 = vst [vmem:[#allocation67_spill] sm:$0xff] %v5356_v51  ;;  %v5358_v3 = vpop.permute.xlu1 %2148  ;;  %2299 = vrot.lane.b32.xlu0 %v4051_v30, %s3353_s27  ;;  %7451 = vst [vmem:[#allocation182_spill] sm:$0xff] %v5367_v45  ;;  %v1839_v47 = vsel %vm1830_vm4, %v7453_v36, %v7456_v6  ;;  %v1840_v36 = vsel %vm1830_vm4, %v7457_v60, %v7461_v49  ;;  %v1832_v62 = vsel %vm1830_vm4, %v7461_v49, %v7459_v34  ;;  %v7464_v60 = vld [vmem:[#allocation70_spill] sm:$0xff] }
 0x635   :  { %7450 = vst [vmem:[#allocation66_spill] sm:$0xff] %v5358_v3  ;;  %7452 = vst [vmem:[#allocation183_spill] sm:$0xff] %v5370_v50  ;;  %v5377_v3 = vmul.f32 %v5231_v57, %v1687_v13  ;;  %v1552_v52 = vsel %vm1540_vm2, %v4785_v39, %v7462_v21  ;;  %v5412_v4 = vmul.f32 %v5235_v20, %v1847_v12 }
 0x636   :  { %2422 = vrot.lane.b32.xlu1 %v4235_v33, %s3354_s0  ;;  %v5393_v13 = vpop.permute.xlu0 %2150  ;;  %v1831_v61 = vsel %vm1830_vm4, %v7456_v6, %v7464_v60  ;;  %v1855_v49 = vsel %vm1830_vm4, %v7464_v60, %v7454_v18  ;;  %v5430_v12 = vmul.f32 %v5235_v20, %v1848_v37  ;;  %v5433_v33 = vmul.f32 %v5265_v23, %v1856_v35  ;;  %v7469_v6 = vld [vmem:[#allocation84_spill] sm:$0xff] }
 0x637   :  { %7455 = vst [vmem:[#allocation68_spill] sm:$0xff] %v5377_v3  ;;  %7460 = vst [vmem:[#allocation44_spill] sm:$0xff] %v5393_v13  ;;  %v5427_v13 = vmul.f32 %v5254_v25, %v1839_v47  ;;  %v1551_v45 = vsel %vm1540_vm2, %v4778_v46, %v7469_v6  ;;  %v5440_v18 = vmul.f32 %v5254_v25, %v1840_v36  ;;  %v7472_v47 = vld [vmem:[#allocation32_spill] sm:$0xff] }
 0x638   :  { %7463 = vst [vmem:[#allocation48_spill] sm:$0xff] %v5412_v4  ;;  %v5422_v34 = vpop.permute.xlu1 %2116  ;;  %2444 = vrot.lane.b32.xlu0 %v4051_v30, %s3354_s0  ;;  %7467 = vst [vmem:[#allocation71_spill] sm:$0xff] %v5430_v12  ;;  %v5443_v60 = vmul.f32 %v5269_v11, %v1832_v62  ;;  %v5446_v30 = vmul.f32 %v5177_v22, %v1552_v52  ;;  %v5458_v36 = vmul.f32 %v5269_v11, %v1831_v61  ;;  %v7476_v62 = vld [vmem:[#allocation80_spill] sm:$0xff]  ;;  %v7485_v4 = vld [vmem:[#allocation107_spill] sm:$0xff] }
 0x639   :  { %7465 = vst [vmem:[#allocation69_spill] sm:$0xff] %v5422_v34  ;;  %7466 = vst [vmem:[#allocation45_spill] sm:$0xff] %v5427_v13  ;;  %v5455_v34 = vmul.f32 %v5265_v23, %v1855_v49  ;;  %v1559_v52 = vsel %vm1540_vm2, %v7476_v62, %v4778_v46  ;;  %v7478_v35 = vld [vmem:[#allocation104_spill] sm:$0xff]  ;;  %v7479_v46 = vld [vmem:[#allocation105_spill] sm:$0xff] }
 0x63a   :  { %7468 = vst [vmem:[#allocation49_spill] sm:$0xff] %v5433_v33  ;;  %7470 = vst [vmem:[#allocation85_spill] sm:$0xff] %v5440_v18  ;;  %2438 = vrot.lane.b32.xlu1 %v7472_v47, %s3354_s0  ;;  %v5450_v37 = vpop.permute.xlu0 %2118  ;;  %v7477_v18 = vld [vmem:[#allocation81_spill] sm:$0xff]  ;;  %v1543_v49 = vsel %vm1540_vm2, %v7469_v6, %v7478_v35  ;;  %v1567_v61 = vsel %vm1540_vm2, %v7478_v35, %v7476_v62  ;;  %v7486_v23 = vld [vmem:[#allocation83_spill] sm:$0xff] }
 0x63b   :  { %7471 = vst [vmem:[#allocation70_spill] sm:$0xff] %v5443_v60  ;;  %7473 = vst [vmem:[#allocation84_spill] sm:$0xff] %v5450_v37  ;;  %v1560_v47 = vsel %vm1540_vm2, %v7477_v18, %v4785_v39  ;;  %v5469_v37 = vmul.f32 %v5177_v22, %v1551_v45  ;;  %v1568_v13 = vsel %vm1540_vm2, %v7479_v46, %v7477_v18 }
 0x63c   :  { %7474 = vst [vmem:[#allocation32_spill] sm:$0xff] %v5455_v34  ;;  %7475 = vst [vmem:[#allocation184_spill] sm:$0xff] %v5458_v36  ;;  %v1358_v11 = vpop.permute.xlu1 %1357  ;;  %2021 = vrot.lane.b32.xlu0 %v4247_v8, %s3346_s11  ;;  %v1544_v45 = vsel %vm1540_vm2, %v7462_v21, %v7479_v46  ;;  %v5497_v18 = vmul.f32 %v5167_v19, %v1559_v52  ;;  %v5500_v62 = vmul.f32 %v5167_v19, %v1560_v47  ;;  %v7482_v36 = vld [vmem:[#allocation106_spill] sm:$0xff] }
 0x63d   :  { %v1418_v6 = vsel %vm1395_vm1, %v5098_v31, %v1358_v11  ;;  %v5509_v34 = vmul.f32 %v5190_v41, %v1567_v61  ;;  %v5512_v35 = vmul.f32 %v5199_v54, %v1543_v49  ;;  %v5515_v52 = vmul.f32 %v5190_v41, %v1568_v13  ;;  %v7481_v13 = vld [vmem:[#allocation88_spill] sm:$0xff] }
 0x63e   :  { %2406 = vrot.lane.b32.xlu1 %v4229_v1, %s3354_s0  ;;  %v1360_v21 = vpop.permute.xlu0 %1359  ;;  %v5521_v39 = vmul.f32 %v5199_v54, %v1544_v45  ;;  %v7480_v1 = vld [vmem:[#allocation62_spill] sm:$0xff]  ;;  %v1696_v60 = vsel %vm1685_vm3, %v7482_v36, %v7481_v13  ;;  %v1705_v25 = vsel %vm1685_vm3, %v7486_v23, %v7485_v4 }
 0x63f   :  { %v1419_v47 = vsel %vm1395_vm1, %v5104_v38, %v1360_v21  ;;  %v1469_v33 = vmul.f32 %v7480_v1, %v1418_v6  ;;  %v1411_v61 = vsel %vm1395_vm1, %v1360_v21, %v5112_v26  ;;  %v7483_v45 = vld [vmem:[#allocation82_spill] sm:$0xff] }
 0x640   :  { %v1473_v46 = vmul.f32 %v7480_v1, %v1419_v47  ;;  %v1390_v49 = vpop.permute.xlu1 %1389  ;;  %2279 = vrot.lane.b32.xlu0 %v4245_v27, %s3353_s27  ;;  %v1704_v6 = vsel %vm1685_vm3, %v7483_v45, %v7482_v36  ;;  %v7484_v1 = vld [vmem:[#allocation89_spill] sm:$0xff]  ;;  %v1410_v36 = vsel %vm1395_vm1, %v1358_v11, %v5106_v15 }
 0x641   :  { %v1402_v21 = vsel %vm1395_vm1, %v5106_v15, %v1390_v49  ;;  %v1426_v47 = vsel %vm1395_vm1, %v1390_v49, %v5098_v31  ;;  %v1697_v12 = vsel %vm1685_vm3, %v7485_v4, %v7484_v1  ;;  %v1474_v31 = vmul.f32 %v4522_v29, %v1411_v61 }
 0x642   :  { %2297 = vrot.lane.b32.xlu1 %v4041_v40, %s3353_s27  ;;  %v1392_v20 = vpop.permute.xlu0 %1391  ;;  %v2552_v51 = vpack.c.bf16 %v1473_v46, %v1469_v33  ;;  %v1468_v49 = vmul.f32 %v4507_v0, %v1426_v47  ;;  %v1471_v3 = vmul.f32 %v4516_v7, %v1402_v21  ;;  %v2559_v33 = vpack.c.bf16 %v5515_v52, %v5509_v34  ;;  %v7495_v21 = vld [vmem:[#allocation122_spill] sm:$0xff] }
 0x643   :  { %v1403_v50 = vsel %vm1395_vm1, %v5112_v26, %v1392_v20  ;;  %v1427_v4 = vsel %vm1395_vm1, %v1392_v20, %v5104_v38  ;;  %v5575_v26 = vmul.f32 %v5211_v5, %v1704_v6  ;;  %v5578_v38 = vmul.f32 %v5215_v43, %v1697_v12  ;;  %v7494_v6 = vld [vmem:[#allocation126_spill] sm:$0xff] }
 0x644   :  { %v1472_v11 = vmul.f32 %v4507_v0, %v1427_v4  ;;  %v1475_v15 = vmul.f32 %v4516_v7, %v1403_v50  ;;  %v5568_v42 = vpop.permute.xlu1 %2293  ;;  %2303 = vrot.lane.b32.xlu0 %v4115_v63, %s3353_s27  ;;  %2718 = vmatprep.subr.bf16.mxu1 %v2552_v51  ;;  %v2560_v0 = vpack.c.bf16 %v5500_v62, %v5497_v18  ;;  %v7488_v7 = vld [vmem:[#allocation108_spill] sm:$0xff]  ;;  %v7490_v62 = vld [vmem:[#allocation127_spill] sm:$0xff] }
 0x645   :  { %7487 = vst [vmem:[#allocation80_spill] sm:$0xff] %v5568_v42  ;;  %v1712_v20 = vsel %vm1685_vm3, %v7488_v7, %v7483_v45  ;;  %v1470_v50 = vmul.f32 %v4522_v29, %v1410_v36  ;;  %v5592_v12 = vmul.f32 %v5215_v43, %v1696_v60  ;;  %v5595_v52 = vmul.f32 %v5211_v5, %v1705_v25 }
 0x646   :  { %v2551_v51 = vpack.c.bf16 %v1472_v11, %v1468_v49  ;;  %2442 = vrot.lane.b32.xlu1 %v4041_v40, %s3354_s0  ;;  %v5589_v34 = vpop.permute.xlu0 %2295  ;;  %v2554_v46 = vpack.c.bf16 %v1475_v15, %v1471_v3  ;;  %v1688_v18 = vsel %vm1685_vm3, %v7481_v13, %v7488_v7  ;;  %v2562_v29 = vpack.c.bf16 %v5521_v39, %v5512_v35  ;;  %v7491_v3 = vld [vmem:[#allocation123_spill] sm:$0xff]  ;;  %v7492_v35 = vld [vmem:[#allocation109_spill] sm:$0xff] }
 0x647   :  { %7489 = vst [vmem:[#allocation81_spill] sm:$0xff] %v5589_v34  ;;  %v1554_v40 = vsel %vm1540_vm2, %v5017_v56, %v7490_v62  ;;  %v1562_v60 = vsel %vm1540_vm2, %v7491_v3, %v5017_v56  ;;  %v2553_v25 = vpack.c.bf16 %v1474_v31, %v1470_v50  ;;  %v2577_v13 = vpack.c.bf16 %v5578_v38, %v5592_v12  ;;  %v7710_v34 = vld [vmem:[#allocation142_spill] sm:$0xff] }
 0x648   :  { %v1505_v61 = vpop.permute.xlu1 %1504  ;;  %2448 = vrot.lane.b32.xlu0 %v4115_v63, %s3354_s0  ;;  %2719 = vmatpush1.bf16.msra.mxu1 %v2551_v51  ;;  %v5616_v39 = vmul.f32 %v5219_v32, %v1712_v20  ;;  %v1713_v45 = vsel %vm1685_vm3, %v7492_v35, %v7486_v23  ;;  %v7493_v56 = vpack.c.bf16 %v5279_v17, %v5257_v59 }
 0x649   :  { %2841 = vmatprep.subr.bf16.mxu0 %v2554_v46  ;;  %v1553_v63 = vsel %vm1540_vm2, %v5010_v2, %v7494_v6  ;;  %v1561_v47 = vsel %vm1540_vm2, %v7495_v21, %v5010_v2  ;;  %v1546_v23 = vsel %vm1540_vm2, %v7490_v62, %v5025_v9  ;;  %v1689_v17 = vsel %vm1685_vm3, %v7484_v1, %v7492_v35  ;;  %v7501_v62 = vld [vmem:[#allocation163_spill] sm:$0xff] }
 0x64a   :  { %2720 = vmatprep.subr.bf16.mxu1 %v7493_v56  ;;  %2842 = vmatpush1.bf16.msra.mxu0 %v2553_v25  ;;  %v5639_v59 = vpop.permute.xlu0 %2263  ;;  %v1610_v36 = vmul.f32 %v5167_v19, %v1562_v60  ;;  %v1611_v2 = vmul.f32 %v5177_v22, %v1554_v40  ;;  %v1570_v31 = vsel %vm1540_vm2, %v5025_v9, %v7491_v3  ;;  %v7503_v56 = vld [vmem:[#allocation164_spill] sm:$0xff] }
 0x64b   :  { %2301 = vrot.lane.b32.xlu1 %v4105_v58, %s3353_s27  ;;  %7496 = vst [vmem:[#allocation104_spill] sm:$0xff] %v5639_v59  ;;  %v7497_v49 = vpack.c.bf16 %v5293_v55, %v5324_v14  ;;  %v5655_v4 = vmul.f32 %v5231_v57, %v1688_v18  ;;  %v5658_v11 = vmul.f32 %v5219_v32, %v1713_v45 }
 0x64c   :  { %v1545_v1 = vsel %vm1540_vm2, %v7494_v6, %v5019_v16  ;;  %v1537_v15 = vpop.permute.xlu1 %1536  ;;  %2166 = vrot.lane.b32.xlu0 %v4247_v8, %s3352_s26  ;;  %v7498_v9 = vpack.c.bf16 %v5290_v53, %v5321_v44  ;;  %v1606_v14 = vmul.f32 %v5167_v19, %v1561_v47  ;;  %v1607_v55 = vmul.f32 %v5177_v22, %v1553_v63  ;;  %v7499_v53 = vld [vmem:[#allocation181_spill] sm:$0xff]  ;;  %v7506_v47 = vld [vmem:[#allocation22_spill] sm:$0xff] }
 0x64d   :  { %2843 = vmatprep.subr.bf16.mxu0 %v7497_v49  ;;  %v1569_v7 = vsel %vm1540_vm2, %v5019_v16, %v7495_v21  ;;  %v1612_v20 = vmul.f32 %v5199_v54, %v1546_v23  ;;  %v5677_v50 = vmul.f32 %v5231_v57, %v1689_v17  ;;  %v1609_v51 = vmul.f32 %v5190_v41, %v1570_v31  ;;  %v7504_v21 = vld [vmem:[#allocation166_spill] sm:$0xff] }
 0x64e   :  { %2721 = vmatpush1.bf16.msra.mxu1 %v7498_v9  ;;  %v1563_v44 = vsel %vm1540_vm2, %v5114_v28, %v1505_v61  ;;  %v7500_v46 = vpack.c.bf16 %v5242_v10, %v7499_v53  ;;  %v1507_v16 = vpop.permute.xlu0 %1506  ;;  %v2565_v18 = vpack.c.bf16 %v1611_v2, %v1607_v55  ;;  %v2564_v3 = vpack.c.bf16 %v1610_v36, %v1606_v14  ;;  %v7509_v9 = vld [vmem:[#allocation110_spill] sm:$0xff] }
 0x64f   :  { %2722 = vmatprep.subr.bf16.mxu1 %v2560_v0  ;;  %2446 = vrot.lane.b32.xlu1 %v4105_v58, %s3354_s0  ;;  %v1608_v0 = vmul.f32 %v5199_v54, %v1545_v1  ;;  %v1564_v40 = vsel %vm1540_vm2, %v7501_v62, %v1507_v16  ;;  %v1605_v60 = vmul.f32 %v5190_v41, %v1569_v7  ;;  %v7507_v1 = vld [vmem:[#allocation23_spill] sm:$0xff] }
 0x650   :  { %2844 = vmatpush1.bf16.msra.mxu0 %v7500_v46  ;;  %v1571_v10 = vsel %vm1540_vm2, %v1537_v15, %v5114_v28  ;;  %v1618_v25 = vmul.f32 %v5167_v19, %v1564_v40  ;;  %v5697_v35 = vpop.permute.xlu1 %1649  ;;  %2424 = vrot.lane.b32.xlu0 %v4245_v27, %s3354_s0  ;;  %v1614_v58 = vmul.f32 %v5167_v19, %v1563_v44 }
 0x651   :  { %2845 = vmatprep.subr.bf16.mxu0 %v2562_v29  ;;  %v7502_v29 = vld [vmem:[#allocation167_spill] sm:$0xff]  ;;  %v5709_v6 = vsel %vm1685_vm3, %v7503_v56, %v5697_v35  ;;  %v2566_v28 = vpack.c.bf16 %v1612_v20, %v1608_v0  ;;  %v2563_v63 = vpack.c.bf16 %v1609_v51, %v1605_v60  ;;  %v1555_v27 = vsel %vm1540_vm2, %v1505_v61, %v7504_v21  ;;  %v7510_v20 = vld [vmem:[#allocation86_spill] sm:$0xff] }
 0x652   :  { %2723 = vmatpush1.bf16.msra.mxu1 %v2559_v33  ;;  %v1556_v45 = vsel %vm1540_vm2, %v1507_v16, %v7502_v29  ;;  %v1547_v19 = vsel %vm1540_vm2, %v7504_v21, %v1537_v15  ;;  %v7505_v33 = vpack.c.bf16 %v5446_v30, %v5469_v37  ;;  %v1539_v23 = vpop.permute.xlu0 %1538  ;;  %v1613_v17 = vmul.f32 %v5190_v41, %v1571_v10  ;;  %v7508_v15 = vld [vmem:[#allocation90_spill] sm:$0xff]  ;;  %v7512_v16 = vld [vmem:[#allocation57_spill] sm:$0xff]  ;;  %v7516_v10 = vld [vmem:[#allocation131_spill] sm:$0xff] }
 0x653   :  { %2724 = vmatprep.subr.bf16.mxu1 %v2564_v3  ;;  %2305 = vrot.lane.b32.xlu1 %v7506_v47, %s3353_s27  ;;  %v1548_v36 = vsel %vm1540_vm2, %v7502_v29, %v1539_v23  ;;  %v1572_v61 = vsel %vm1540_vm2, %v1539_v23, %v7501_v62  ;;  %v2568_v2 = vpack.c.bf16 %v1618_v25, %v1614_v58  ;;  %v7513_v62 = vld [vmem:[#allocation147_spill] sm:$0xff]  ;;  %v7517_v58 = vld [vmem:[#allocation172_spill] sm:$0xff] }
 0x654   :  { %2846 = vmatpush1.bf16.msra.mxu0 %v7505_v33  ;;  %v1619_v31 = vmul.f32 %v5177_v22, %v1556_v45  ;;  %v1617_v30 = vmul.f32 %v5190_v41, %v1572_v61  ;;  %v1620_v37 = vmul.f32 %v5199_v54, %v1548_v36  ;;  %v5732_v49 = vpop.permute.xlu1 %1681  ;;  %2307 = vrot.lane.b32.xlu0 %v7507_v1, %s3353_s27  ;;  %v7518_v45 = vld [vmem:[#allocation168_spill] sm:$0xff]  ;;  %v7524_v33 = vld [vmem:[#allocation146_spill] sm:$0xff] }
 0x655   :  { %2847 = vmatprep.subr.bf16.mxu0 %v2566_v28  ;;  %v5740_v14 = vsel %vm1830_vm4, %v7509_v9, %v7508_v15  ;;  %v1616_v55 = vmul.f32 %v5199_v54, %v1547_v19  ;;  %v5747_v41 = vsel %vm1685_vm3, %v5732_v49, %v7503_v56  ;;  %v2576_v7 = vpack.c.bf16 %v5595_v52, %v5575_v26  ;;  %v7511_v26 = vld [vmem:[#allocation55_spill] sm:$0xff]  ;;  %v7519_v28 = vld [vmem:[#allocation42_spill] sm:$0xff] }
 0x656   :  { %2725 = vmatpush1.bf16.msra.mxu1 %v2563_v63  ;;  %v5756_v51 = vsel %vm1830_vm4, %v7510_v20, %v7509_v9  ;;  %v1615_v54 = vmul.f32 %v5177_v22, %v1555_v27  ;;  %v2567_v44 = vpack.c.bf16 %v1617_v30, %v1613_v17  ;;  %v2155_v53 = vpop.permute.xlu0 %2154  ;;  %v2575_v46 = vpack.c.bf16 %v5658_v11, %v5616_v39  ;;  %v7515_v11 = vld [vmem:[#allocation149_spill] sm:$0xff]  ;;  %v7523_v27 = vld [vmem:[#allocation87_spill] sm:$0xff] }
 0x657   :  { %2726 = vmatprep.subr.bf16.mxu1 %v2568_v2  ;;  %2450 = vrot.lane.b32.xlu1 %v7506_v47, %s3354_s0  ;;  %v5766_v52 = vsel %vm2168_vm5, %v7511_v26, %v2155_v53  ;;  %v5771_v0 = vsel %vm2168_vm5, %v2155_v53, %v7512_v16  ;;  %v2570_v22 = vpack.c.bf16 %v1620_v37, %v1616_v55  ;;  %v7525_v47 = vld [vmem:[#allocation124_spill] sm:$0xff]  ;;  %v7530_v9 = vld [vmem:[#allocation183_spill] sm:$0xff] }
 0x658   :  { %2848 = vmatpush1.bf16.msra.mxu0 %v2565_v18  ;;  %v7514_v18 = vld [vmem:[#allocation125_spill] sm:$0xff]  ;;  %v2569_v3 = vpack.c.bf16 %v1619_v31, %v1615_v54  ;;  %v1795_v60 = vpop.permute.xlu1 %1794  ;;  %2452 = vrot.lane.b32.xlu0 %v7507_v1, %s3354_s0  ;;  %v2578_v39 = vpack.c.bf16 %v5677_v50, %v5655_v4  ;;  %v1691_v25 = vsel %vm1685_vm3, %v7516_v10, %v7515_v11  ;;  %v7521_v4 = vld [vmem:[#allocation91_spill] sm:$0xff]  ;;  %v7527_v2 = vld [vmem:[#allocation148_spill] sm:$0xff] }
 0x659   :  { %v1707_v40 = vsel %vm1685_vm3, %v7514_v18, %v7513_v62  ;;  %v5788_v29 = vsel %vm1830_vm4, %v1795_v60, %v7517_v58  ;;  %v5793_v56 = vsel %vm1830_vm4, %v7518_v45, %v1795_v60  ;;  %2849 = vmatprep.subr.bf16.mxu0 %v2570_v22  ;;  %v7520_v63 = vpack.c.bf16 %v5342_v24, %v7519_v28  ;;  %v7522_v50 = vld [vmem:[#allocation111_spill] sm:$0xff]  ;;  %v7526_v24 = vld [vmem:[#allocation33_spill] sm:$0xff]  ;;  %v7528_v31 = vld [vmem:[#allocation130_spill] sm:$0xff] }
 0x65a   :  { %2727 = vmatpush1.bf16.msra.mxu1 %v2567_v44  ;;  %v5802_v21 = vsel %vm1830_vm4, %v7522_v50, %v7521_v4  ;;  %v5808_v19 = vsel %vm1830_vm4, %v7523_v27, %v7522_v50  ;;  %v1706_v23 = vsel %vm1685_vm3, %v7525_v47, %v7524_v33  ;;  %v5816_v17 = vpop.permute.xlu0 %2412  ;;  %v1699_v36 = vsel %vm1685_vm3, %v7513_v62, %v7516_v10  ;;  %v7529_v1 = vld [vmem:[#allocation68_spill] sm:$0xff]  ;;  %v7532_v62 = vld [vmem:[#allocation67_spill] sm:$0xff] }
 0x65b   :  { %2728 = vmatprep.subr.bf16.mxu1 %v7520_v63  ;;  %2309 = vrot.lane.b32.xlu1 %v7526_v24, %s3353_s27  ;;  %v1755_v61 = vmul.f32 %v5211_v5, %v1707_v40  ;;  %v1690_v30 = vsel %vm1685_vm3, %v7528_v31, %v7527_v2  ;;  %v1715_v37 = vsel %vm1685_vm3, %v7515_v11, %v7514_v18  ;;  %v7533_v18 = vld [vmem:[#allocation182_spill] sm:$0xff] }
 0x65c   :  { %2850 = vmatpush1.bf16.msra.mxu0 %v2569_v3  ;;  %v7531_v55 = vpack.c.bf16 %v7529_v1, %v7530_v9  ;;  %v1698_v54 = vsel %vm1685_vm3, %v7524_v33, %v7528_v31  ;;  %v1714_v44 = vsel %vm1685_vm3, %v7527_v2, %v7525_v47  ;;  %v1757_v53 = vmul.f32 %v5231_v57, %v1691_v25  ;;  %v1827_v22 = vpop.permute.xlu1 %1826  ;;  %v7535_v3 = vld [vmem:[#allocation112_spill] sm:$0xff]  ;;  %v7537_v33 = vld [vmem:[#allocation43_spill] sm:$0xff]  ;;  %v2686_v31 = vld [vmem:[%s7003_s9] sm:$0xff] }
 0x65d   :  { %2311 = vrot.lane.b32.xlu0 %v4247_v8, %s3353_s27  ;;  %v7534_v40 = vpack.c.bf16 %v7532_v62, %v7533_v18  ;;  %v1857_v60 = vsel %vm1830_vm4, %v7535_v3, %v7510_v20  ;;  %v1751_v11 = vmul.f32 %v5211_v5, %v1706_v23  ;;  %v5856_v10 = vsel %vm1830_vm4, %v7517_v58, %v1827_v22  ;;  %v7536_v20 = vld [vmem:[#allocation46_spill] sm:$0xff]  ;;  %v7541_v9 = vld [vmem:[#allocation171_spill] sm:$0xff] }
 0x65e   :  { %2851 = vmatprep.subr.bf16.mxu0 %v7531_v55  ;;  %v5861_v25 = vsel %vm1830_vm4, %v1827_v22, %v7518_v45  ;;  %v1756_v28 = vmul.f32 %v5215_v43, %v1699_v36  ;;  %v1753_v63 = vmul.f32 %v5231_v57, %v1690_v30  ;;  %v1754_v50 = vmul.f32 %v5219_v32, %v1715_v37  ;;  %v1652_v58 = vpop.permute.xlu0 %1651  ;;  %v7540_v1 = vld [vmem:[#allocation170_spill] sm:$0xff] }
 0x65f   :  { %2729 = vmatpush1.bf16.msra.mxu1 %v7534_v40  ;;  %v7538_v47 = vpack.c.bf16 %v7536_v20, %v7537_v33  ;;  %2454 = vrot.lane.b32.xlu1 %v7526_v24, %s3354_s0  ;;  %v1752_v23 = vmul.f32 %v5215_v43, %v1698_v54  ;;  %v1750_v45 = vmul.f32 %v5219_v32, %v1714_v44  ;;  %v7542_v54 = vld [vmem:[#allocation179_spill] sm:$0xff]  ;;  %v7545_v20 = vld [vmem:[#allocation113_spill] sm:$0xff] }
 0x660   :  { %2730 = vmatprep.subr.bf16.mxu1 %v2576_v7  ;;  %v7539_v7 = vld [vmem:[#allocation165_spill] sm:$0xff]  ;;  %v2580_v2 = vpack.c.bf16 %v1755_v61, %v1751_v11  ;;  %v1759_v24 = vmul.f32 %v5211_v5, %v5709_v6  ;;  %v1988_v37 = vpop.permute.xlu1 %1987  ;;  %v1692_v61 = vsel %vm1685_vm3, %v7540_v1, %v5732_v49  ;;  %v1701_v55 = vsel %vm1685_vm3, %v1652_v58, %v7541_v9 }
 0x661   :  { %2852 = vmatpush1.bf16.msra.mxu0 %v7538_v47  ;;  %v1709_v36 = vsel %vm1685_vm3, %v7539_v7, %v1652_v58  ;;  %2456 = vrot.lane.b32.xlu0 %v4247_v8, %s3354_s0  ;;  %v5895_v6 = vsel %vm2023_vm6, %v1988_v37, %v7542_v54  ;;  %v2579_v44 = vpack.c.bf16 %v1754_v50, %v1750_v45  ;;  %v7549_v45 = vld [vmem:[#allocation151_spill] sm:$0xff] }
 0x662   :  { %2853 = vmatprep.subr.bf16.mxu0 %v2578_v39  ;;  %v1763_v30 = vmul.f32 %v5211_v5, %v1709_v36  ;;  %v2582_v39 = vpack.c.bf16 %v1757_v53, %v1753_v63  ;;  %v7543_v5 = vld [vmem:[#allocation63_spill] sm:$0xff]  ;;  %v1700_v49 = vsel %vm1685_vm3, %v5697_v35, %v7540_v1  ;;  %v1684_v53 = vpop.permute.xlu0 %1683  ;;  %v1758_v22 = vmul.f32 %v5219_v32, %v5747_v41  ;;  %v7544_v41 = vld [vmem:[#allocation178_spill] sm:$0xff] }
 0x663   :  { %2731 = vmatpush1.bf16.msra.mxu1 %v2575_v46  ;;  %v5900_v8 = vsel %vm2023_vm6, %v7543_v5, %v1988_v37  ;;  %v2581_v46 = vpack.c.bf16 %v1756_v28, %v1752_v23  ;;  %2689 = vperm.xlu1 %3217, %v2686_v31   ;;  %v1693_v62 = vsel %vm1685_vm3, %v7541_v9, %v1684_v53  ;;  %v7552_v37 = vld [vmem:[#allocation71_spill] sm:$0xff]  ;;  %v7556_v9 = vld [vmem:[#allocation128_spill] sm:$0xff] }
 0x664   :  { %2732 = vmatprep.subr.bf16.mxu1 %v2580_v2  ;;  %v1717_v18 = vsel %vm1685_vm3, %v1684_v53, %v7539_v7  ;;  %v2584_v40 = vpack.c.bf16 %v1763_v30, %v1759_v24  ;;  %v1761_v35 = vmul.f32 %v5231_v57, %v1692_v61  ;;  %v1764_v38 = vmul.f32 %v5215_v43, %v1701_v55  ;;  %v5922_v11 = vpop.permute.xlu1 %2132  ;;  %v7550_v7 = vld [vmem:[#allocation129_spill] sm:$0xff]  ;;  %v7555_v61 = vld [vmem:[#allocation150_spill] sm:$0xff] }
 0x665   :  { %2854 = vmatpush1.bf16.msra.mxu0 %v2577_v13  ;;  %v1762_v12 = vmul.f32 %v5219_v32, %v1717_v18  ;;  %v1765_v13 = vmul.f32 %v5231_v57, %v1693_v62  ;;  %v1888_v28 = vmul.f32 %v7544_v41, %v5756_v51  ;;  %v1892_v63 = vmul.f32 %v7544_v41, %v5808_v19  ;;  %v7559_v62 = vld [vmem:[#allocation152_spill] sm:$0xff] }
 0x666   :  { %2855 = vmatprep.subr.bf16.mxu0 %v2582_v39  ;;  %v1833_v50 = vsel %vm1830_vm4, %v7508_v15, %v7535_v3  ;;  %v1858_v32 = vsel %vm1830_vm4, %v7545_v20, %v7523_v27  ;;  %v1834_v57 = vsel %vm1830_vm4, %v7521_v4, %v7545_v20  ;;  %v1760_v51 = vmul.f32 %v5215_v43, %v1700_v49  ;;  %v5941_v19 = vpop.permute.xlu0 %2428  ;;  %v7547_v15 = vld [vmem:[#allocation180_spill] sm:$0xff]  ;;  %v7548_v27 = vld [vmem:[#allocation47_spill] sm:$0xff] }
 0x667   :  { %2733 = vmatpush1.bf16.msra.mxu1 %v2579_v44  ;;  %v2583_v33 = vpack.c.bf16 %v1762_v12, %v1758_v22  ;;  %7546 = vst [vmem:[#allocation105_spill] sm:$0xff] %v5941_v19  ;;  %v2586_v47 = vpack.c.bf16 %v1765_v13, %v1761_v35  ;;  %v1889_v3 = vmul.f32 %v7547_v15, %v5740_v14  ;;  %v7553_v39 = vld [vmem:[#allocation48_spill] sm:$0xff]  ;;  %v7558_v44 = vld [vmem:[#allocation154_spill] sm:$0xff] }
 0x668   :  { %2734 = vmatprep.subr.bf16.mxu1 %v2584_v40  ;;  %v1893_v58 = vmul.f32 %v7547_v15, %v5802_v21  ;;  %v1887_v23 = vmul.f32 %v7548_v27, %v1857_v60  ;;  %v5952_v4 = vsel %vm2458_vm7, %v5816_v17, %v5941_v19  ;;  %v1891_v43 = vmul.f32 %v7548_v27, %v1858_v32  ;;  %v2020_v2 = vpop.permute.xlu1 %2019  ;;  %v7551_v21 = vld [vmem:[#allocation65_spill] sm:$0xff]  ;;  %v7560_v35 = vld [vmem:[#allocation70_spill] sm:$0xff]  ;;  %v7665_v19 = vld [vmem:[#allocation36_spill] sm:$0xff] }
 0x669   :  { %2856 = vmatpush1.bf16.msra.mxu0 %v2581_v46  ;;  %v1852_v14 = vsel %vm1830_vm4, %v7550_v7, %v7549_v45  ;;  %v2585_v36 = vpack.c.bf16 %v1764_v38, %v1760_v51  ;;  %v1890_v60 = vmul.f32 %v7551_v21, %v1833_v50  ;;  %v1894_v31 = vmul.f32 %v7551_v21, %v1834_v57  ;;  %v7557_v46 = vld [vmem:[#allocation133_spill] sm:$0xff]  ;;  %v7561_v38 = vld [vmem:[#allocation184_spill] sm:$0xff] }
 0x66a   :  { %2857 = vmatprep.subr.bf16.mxu0 %v2586_v47  ;;  %v5965_v24 = vsel %vm2023_vm6, %v7542_v54, %v2020_v2  ;;  %v5970_v30 = vsel %vm2023_vm6, %v2020_v2, %v7543_v5  ;;  %v7554_v1 = vpack.c.bf16 %v7552_v37, %v7553_v39  ;;  %v1851_v55 = vsel %vm1830_vm4, %v7556_v9, %v7555_v61  ;;  %v5987_v49 = vpop.permute.xlu0 %2396  ;;  %v7565_v57 = vld [vmem:[#allocation132_spill] sm:$0xff]  ;;  %v7566_v47 = vld [vmem:[#allocation49_spill] sm:$0xff] }
 0x66b   :  { %2735 = vmatpush1.bf16.msra.mxu1 %v2583_v33  ;;  %v1844_v54 = vsel %vm1830_vm4, %v7549_v45, %v7557_v46  ;;  %v1836_v5 = vsel %vm1830_vm4, %v7557_v46, %v7558_v44  ;;  %v2592_v53 = vpack.c.bf16 %v1892_v63, %v1888_v28  ;;  %v1900_v22 = vmul.f32 %v7544_v41, %v1852_v14  ;;  %v7563_v28 = vld [vmem:[#allocation45_spill] sm:$0xff]  ;;  %v7567_v45 = vld [vmem:[#allocation32_spill] sm:$0xff] }
 0x66c   :  { %2736 = vmatprep.subr.bf16.mxu1 %v7554_v1  ;;  %v1859_v18 = vsel %vm1830_vm4, %v7559_v62, %v7556_v9  ;;  %v1860_v40 = vsel %vm1830_vm4, %v7558_v44, %v7550_v7  ;;  %v7562_v12 = vpack.c.bf16 %v7560_v35, %v7561_v38  ;;  %v6005_v13 = vsel %vm2458_vm7, %v5987_v49, %v5816_v17  ;;  %v7564_v63 = vld [vmem:[#allocation85_spill] sm:$0xff]  ;;  %v2278_v33 = vpop.permute.xlu1 %2277 }
 0x66d   :  { %2858 = vmatpush1.bf16.msra.mxu0 %v2585_v36  ;;  %v2589_v50 = vpack.c.bf16 %v7564_v63, %v7563_v28  ;;  %v2593_v20 = vpack.c.bf16 %v1893_v58, %v1889_v3  ;;  %v2591_v32 = vpack.c.bf16 %v1891_v43, %v1887_v23  ;;  %v1835_v51 = vsel %vm1830_vm4, %v7565_v57, %v7559_v62  ;;  %v7569_v1 = vld [vmem:[#allocation177_spill] sm:$0xff]  ;;  %v7572_v62 = vld [vmem:[#allocation2_spill] sm:$0xff]  ;;  %v7574_v28 = vld [vmem:[#allocation176_spill] sm:$0xff] }
 0x66e   :  { %2859 = vmatprep.subr.bf16.mxu0 %v7562_v12  ;;  %v7568_v7 = vpack.c.bf16 %v7566_v47, %v7567_v45  ;;  %v1896_v14 = vmul.f32 %v7544_v41, %v1851_v55  ;;  %v1902_v17 = vmul.f32 %v7551_v21, %v1836_v5  ;;  %v6021_v36 = vsel %vm2313_vm8, %v2278_v33, %v5568_v42  ;;  %v1797_v37 = vpop.permute.xlu0 %1796  ;;  %v7576_v45 = vld [vmem:[#allocation54_spill] sm:$0xff] }
 0x66f   :  { %v2594_v3 = vpack.c.bf16 %v1894_v31, %v1890_v60  ;;  %v1843_v58 = vsel %vm1830_vm4, %v7555_v61, %v7565_v57  ;;  %v1901_v23 = vmul.f32 %v7547_v15, %v1844_v54  ;;  %v1895_v43 = vmul.f32 %v7548_v27, %v1859_v18  ;;  %v7570_v31 = vld [vmem:[#allocation169_spill] sm:$0xff]  ;;  %v7573_v18 = vld [vmem:[#allocation174_spill] sm:$0xff] }
 0x670   :  { %2737 = vmatpush1.bf16.msra.mxu1 %v7568_v7  ;;  %v1899_v2 = vmul.f32 %v7548_v27, %v1860_v40  ;;  %v1898_v39 = vmul.f32 %v7551_v21, %v1835_v51  ;;  %v1846_v60 = vsel %vm1830_vm4, %v1797_v37, %v7569_v1  ;;  %v1854_v9 = vsel %vm1830_vm4, %v7570_v31, %v1797_v37  ;;  %v6043_v5 = vpop.permute.xlu1 %2261 }
 0x671   :  { %2738 = vmatprep.subr.bf16.mxu1 %v2592_v53  ;;  %2860 = vmatpush1.bf16.msra.mxu0 %v2589_v50  ;;  %v2596_v61 = vpack.c.bf16 %v1900_v22, %v1896_v14  ;;  %v1904_v55 = vmul.f32 %v7544_v41, %v5793_v56  ;;  %v1905_v46 = vmul.f32 %v7547_v15, %v5788_v29  ;;  %v7577_v14 = vld [vmem:[#allocation56_spill] sm:$0xff] }
 0x672   :  { %2861 = vmatprep.subr.bf16.mxu0 %v2594_v3  ;;  %v1908_v54 = vmul.f32 %v7544_v41, %v1854_v9  ;;  %v1909_v44 = vmul.f32 %v7547_v15, %v1846_v60  ;;  %7571 = vst [vmem:[#allocation62_spill] sm:$0xff] %v6043_v5  ;;  %v1897_v53 = vmul.f32 %v7547_v15, %v1843_v58  ;;  %v1829_v35 = vpop.permute.xlu0 %1828 }
 0x673   :  { %v6048_v40 = vrot.slane %v7573_v18, %v7572_v62  ;;  %v6053_v56 = vsel %vm2313_vm8, %v6043_v5, %v2278_v33  ;;  %v2598_v29 = vpack.c.bf16 %v1902_v17, %v1898_v39  ;;  %v2595_v22 = vpack.c.bf16 %v1899_v2, %v1895_v43  ;;  %v7582_v2 = vld [vmem:[#allocation153_spill] sm:$0xff] }
 0x674   :  { %2739 = vmatpush1.bf16.msra.mxu1 %v2591_v32  ;;  %v2601_v41 = vpack.c.bf16 %v1909_v44, %v1905_v46  ;;  %v2600_v38 = vpack.c.bf16 %v1908_v54, %v1904_v55  ;;  %v2597_v12 = vpack.c.bf16 %v1901_v23, %v1897_v53  ;;  %v6057_v15 = vrot.slane %v7574_v28, %v7572_v62  ;;  %v2153_v33 = vpop.permute.xlu1 %2152  ;;  %v7581_v23 = vld [vmem:[#allocation97_spill] sm:$0xff]  ;;  %v6120_v46 = vld [vmem:[%s7001_s7 + $0x28] ss:$0 sm:$0xff]  ;;  %v7586_v54 = vld [vmem:[#allocation12_spill] sm:$0xff] }
 0x675   :  { %2740 = vmatprep.subr.bf16.mxu1 %v2596_v61  ;;  %2862 = vmatpush1.bf16.msra.mxu0 %v2593_v20  ;;  %v1838_v63 = vsel %vm1830_vm4, %v7569_v1, %v1829_v35  ;;  %v1862_v50 = vsel %vm1830_vm4, %v1829_v35, %v7570_v31  ;;  %v1903_v32 = vmul.f32 %v7548_v27, %v5861_v25  ;;  %v7584_v31 = vld [vmem:[#allocation9_spill] sm:$0xff]  ;;  %v7587_v44 = vld [vmem:[#allocation11_spill] sm:$0xff]  ;;  %v7632_v61 = vld [vmem:[#allocation30_spill] sm:$0xff] }
 0x676   :  { %2863 = vmatprep.subr.bf16.mxu0 %v2598_v29  ;;  %v1906_v20 = vmul.f32 %v7551_v21, %v5856_v10  ;;  %v1907_v57 = vmul.f32 %v7548_v27, %v1862_v50  ;;  %v1910_v51 = vmul.f32 %v7551_v21, %v1838_v63  ;;  %v6073_v47 = vmul.f32 %v6048_v40, %v5766_v52  ;;  %v6084_v10 = vld [vmem:[%s7002_s8 + $0x8] sm:$0xff]  ;;  %v6092_v17 = vpop.permute.xlu0 %2158  ;;  %v7591_v35 = vld [vmem:[#allocation5_spill] sm:$0xff] }
 0x677   :  { %v2169_v7 = vsel %vm2168_vm5, %v7576_v45, %v2153_v33  ;;  %v2193_v25 = vsel %vm2168_vm5, %v2153_v33, %v7577_v14  ;;  %v6096_v58 = vmul.f32 %v6057_v15, %v5771_v0  ;;  %v6102_v43 = vsel %vm2168_vm5, %v7581_v23, %v6092_v17  ;;  %v7583_v0 = vld [vmem:[#allocation10_spill] sm:$0xff]  ;;  %v7595_v50 = vld [vmem:[#allocation73_spill] sm:$0xff] }
 0x678   :  { %2741 = vmatpush1.bf16.msra.mxu1 %v2595_v22  ;;  %7575 = vst [vmem:[#allocation88_spill] sm:$0xff] %v6073_v47  ;;  %v2599_v27 = vpack.c.bf16 %v1907_v57, %v1903_v32  ;;  %v6087_v21 = vmul.f32 %v6048_v40, %v2169_v7  ;;  %v6090_v52 = vmul.f32 %v6057_v15, %v2193_v25  ;;  %v2411_v1 = vpop.permute.xlu1 %2410  ;;  %v7590_v22 = vld [vmem:[#allocation6_spill] sm:$0xff]  ;;  %v7596_v32 = vld [vmem:[#allocation53_spill] sm:$0xff]  ;;  %v7600_v25 = vld [vmem:[#allocation72_spill] sm:$0xff] }
 0x679   :  { %2742 = vmatprep.subr.bf16.mxu1 %v2600_v38  ;;  %2864 = vmatpush1.bf16.msra.mxu0 %v2597_v12  ;;  %v2602_v3 = vpack.c.bf16 %v1910_v51, %v1906_v20  ;;  %7580 = vst [vmem:[#allocation89_spill] sm:$0xff] %v6096_v58  ;;  %v3066_v37 = vcombine.low %v7582_v2, %v7582_v2  ;;  %v7594_v12 = vld [vmem:[#allocation175_spill] sm:$0xff]  ;;  %v7597_v51 = vld [vmem:[#allocation18_spill] sm:$0xff]  ;;  %v7598_v33 = vld [vmem:[#allocation17_spill] sm:$0xff] }
 0x67a   :  { %7578 = vst [vmem:[#allocation106_spill] sm:$0xff] %v6087_v21  ;;  %7579 = vst [vmem:[#allocation82_spill] sm:$0xff] %v6090_v52  ;;  %v3069_v60 = vcombine.high %v6084_v10, %v6084_v10  ;;  %v7585_v9 = vpack.c.bf16 %v7583_v0, %v7584_v31  ;;  %v6115_v55 = vpop.permute.xlu0 %2416  ;;  %v7588_v53 = vpack.c.bf16 %v7586_v54, %v7587_v44  ;;  %v7604_v31 = vld [vmem:[#allocation8_spill] sm:$0xff]  ;;  %v7629_v39 = vld [vmem:[#allocation93_spill] sm:$0xff] }
 0x67b   :  { %2865 = vmatprep.subr.bf16.mxu0 %v2602_v3  ;;  %v7592_v38 = vpack.c.bf16 %v7590_v22, %v7591_v35  ;;  %v2041_v20 = vsel %vm2023_vm6, %v7596_v32, %v7595_v50  ;;  %v7599_v7 = vpack.c.bf16 %v7597_v51, %v7598_v33  ;;  %v6150_v2 = vmul.f32 %v6120_v46, %v5952_v4  ;;  %v6171_v4 = vld [vmem:[%s7001_s7 + $0x20] ss:$0 sm:$0xff]  ;;  %v7609_v35 = vld [vmem:[#allocation20_spill] sm:$0xff]  ;;  %v7613_v33 = vld [vmem:[#allocation77_spill] sm:$0xff] }
 0x67c   :  { %2743 = vmatpush1.bf16.msra.mxu1 %v2599_v27  ;;  %v6125_v29 = vpop.permute.xlu1 %2426  ;;  %v7601_v27 = vld [vmem:[#allocation52_spill] sm:$0xff]  ;;  %7608 = vst [vmem:[#allocation127_spill] sm:$0xff] %v6171_v4  ;;  %v7648_v21 = vld [vmem:[#allocation26_spill] sm:$0xff] }
 0x67d   :  { %2753 = vmatprep.subr.bf16.mxu1 %v7585_v9  ;;  %2866 = vmatpush1.bf16.msra.mxu0 %v2601_v41  ;;  %7589 = vst [vmem:[#allocation107_spill] sm:$0xff] %v6125_v29  ;;  %v7593_v41 = vld [vmem:[#allocation4_spill] sm:$0xff]  ;;  %v2467_v57 = vsel %vm2458_vm7, %v2411_v1, %v6125_v29  ;;  %v2040_v3 = vsel %vm2023_vm6, %v7601_v27, %v7600_v25  ;;  %7602 = vst [vmem:[#allocation83_spill] sm:$0xff] %v6150_v2  ;;  %v7605_v9 = vld [vmem:[#allocation7_spill] sm:$0xff] }
 0x67e   :  { %2876 = vmatprep.subr.bf16.mxu0 %v7588_v53  ;;  %v6132_v63 = vrot.slane %v7594_v12, %v7593_v41  ;;  %v6153_v0 = vmul.f32 %v6120_v46, %v2467_v57  ;;  %v7606_v54 = vpack.c.bf16 %v7604_v31, %v7605_v9  ;;  %v6158_v44 = vpop.permute.xlu0 %2432  ;;  %v6166_v22 = vrot.slane %v7573_v18, %v7593_v41  ;;  %v7612_v57 = vld [vmem:[#allocation51_spill] sm:$0xff]  ;;  %v7615_v31 = vld [vmem:[#allocation14_spill] sm:$0xff]  ;;  %v7616_v9 = vld [vmem:[#allocation13_spill] sm:$0xff] }
 0x67f   :  { %2745 = vmatmul.mubr.bf16.vlgmr.msra.gmra.mrb[32].mxu1 %v3066_v37  ;;  %v2025_v18 = vsel %vm2023_vm6, %v7612_v57, %v7613_v33  ;;  %v7647_v2 = vld [vmem:[#allocation27_spill] sm:$0xff]  ;;  %v7656_v58 = vld [vmem:[#allocation156_spill] sm:$0xff] }
 0x680   :  { %2754 = vmatpush1.bf16.msra.mxu1 %v7592_v38  ;;  %2785 = vmatprep.mubr.bf16.mxu1 %v3069_v60  ;;  %7603 = vst [vmem:[#allocation108_spill] sm:$0xff] %v6153_v0  ;;  %v7610_v38 = vld [vmem:[#allocation19_spill] sm:$0xff]  ;;  %v6181_v51 = vmul.f32 %v6132_v63, %v2041_v20  ;;  %v6199_v20 = vmul.f32 %v6132_v63, %v2040_v3 }
 0x681   :  { %2755 = vmatprep.subr.bf16.mxu1 %v7599_v7  ;;  %2868 = vmatmul.mubr.bf16.vlgmr.msra.gmra.mrb[40].mxu0 %v3066_v37  ;;  %v7607_v37 = vld [vmem:[#allocation173_spill] sm:$0xff]  ;;  %v7611_v12 = vpack.c.bf16 %v7609_v35, %v7610_v38  ;;  %v6187_v7 = vpop.permute.xlu1 %2394  ;;  %v7618_v35 = vld [vmem:[#allocation50_spill] sm:$0xff]  ;;  %v6203_v38 = vrot.slane %v7574_v28, %v7593_v41  ;;  %v2049_v3 = vsel %vm2023_vm6, %v7613_v33, %v7596_v32  ;;  %v7630_v32 = vld [vmem:[#allocation115_spill] sm:$0xff] }
 0x682   :  { %2877 = vmatpush1.bf16.msra.mxu0 %v7606_v54  ;;  %2908 = vmatprep.mubr.bf16.mxu0 %v3069_v60  ;;  %v6162_v53 = vrot.slane %v7607_v37, %v7593_v41  ;;  %v2033_v60 = vsel %vm2023_vm6, %v7595_v50, %v7612_v57  ;;  %7614 = vst [vmem:[#allocation123_spill] sm:$0xff] %v6187_v7  ;;  %v7619_v57 = vld [vmem:[#allocation29_spill] sm:$0xff]  ;;  %v7625_v41 = vld [vmem:[#allocation16_spill] sm:$0xff]  ;;  %v7631_v33 = vld [vmem:[#allocation31_spill] sm:$0xff] }
 0x683   :  { %2878 = vmatprep.subr.bf16.mxu0 %v7611_v12  ;;  %v7617_v54 = vpack.c.bf16 %v7615_v31, %v7616_v9  ;;  %v2032_v50 = vsel %vm2023_vm6, %v7600_v25, %v7618_v35  ;;  %v2475_v12 = vsel %vm2458_vm7, %v6187_v7, %v2411_v1  ;;  %v7620_v31 = vld [vmem:[#allocation28_spill] sm:$0xff]  ;;  %v6221_v28 = vmul.f32 %v6171_v4, %v6005_v13 }
 0x684   :  { %v7621_v9 = vpack.c.bf16 %v7619_v57, %v7620_v31  ;;  %v6224_v1 = vmul.f32 %v6171_v4, %v2475_v12  ;;  %v7626_v57 = vld [vmem:[#allocation15_spill] sm:$0xff]  ;;  %v6233_v37 = vmul.f32 %v6166_v22, %v2025_v18  ;;  %v2035_v13 = vsel %vm2023_vm6, %v7630_v32, %v7629_v39  ;;  %v7651_v7 = vld [vmem:[#allocation40_spill] sm:$0xff] }
 0x685   :  { %2756 = vmatpush1.bf16.msra.mxu1 %v7617_v54  ;;  %v7622_v54 = vld [vmem:[#allocation76_spill] sm:$0xff]  ;;  %7623 = vst [vmem:[#allocation109_spill] sm:$0xff] %v6221_v28  ;;  %v7627_v31 = vpack.c.bf16 %v7625_v41, %v7626_v57  ;;  %v7633_v12 = vpack.c.bf16 %v7631_v33, %v7632_v61  ;;  %v2619_v18 = vpack.c.bf16 %v6181_v51, %v6199_v20  ;;  %v7634_v33 = vld [vmem:[#allocation25_spill] sm:$0xff]  ;;  %v7638_v51 = vld [vmem:[#allocation114_spill] sm:$0xff] }
 0x686   :  { %2757 = vmatprep.subr.bf16.mxu1 %v7621_v9  ;;  %v2024_v25 = vsel %vm2023_vm6, %v7618_v35, %v7622_v54  ;;  %7624 = vst [vmem:[#allocation126_spill] sm:$0xff] %v6224_v1  ;;  %v6229_v9 = vpop.permute.xlu0 %2400  ;;  %v2077_v35 = vmul.f32 %v6162_v53, %v2033_v60  ;;  %v2073_v60 = vmul.f32 %v6162_v53, %v2032_v50  ;;  %v7640_v61 = vld [vmem:[#allocation39_spill] sm:$0xff]  ;;  %v7641_v1 = vld [vmem:[#allocation38_spill] sm:$0xff] }
 0x687   :  { %2879 = vmatpush1.bf16.msra.mxu0 %v7627_v31  ;;  %7628 = vst [vmem:[#allocation122_spill] sm:$0xff] %v6229_v9  ;;  %v6246_v41 = vsel %vm2458_vm7, %v6229_v9, %v6115_v55  ;;  %v2048_v57 = vsel %vm2023_vm6, %v7622_v54, %v7601_v27  ;;  %v6257_v31 = vpop.permute.xlu1 %2156  ;;  %v2074_v42 = vmul.f32 %v6166_v22, %v2024_v25  ;;  %v7637_v9 = vld [vmem:[#allocation92_spill] sm:$0xff]  ;;  %v7644_v25 = vld [vmem:[#allocation119_spill] sm:$0xff] }
 0x688   :  { %2880 = vmatprep.subr.bf16.mxu0 %v7633_v12  ;;  %v7635_v12 = vld [vmem:[#allocation24_spill] sm:$0xff]  ;;  %v2079_v50 = vmul.f32 %v6203_v38, %v2049_v3  ;;  %v2034_v20 = vsel %vm2023_vm6, %v7638_v51, %v7637_v9  ;;  %v7642_v28 = vpack.c.bf16 %v7640_v61, %v7641_v1  ;;  %v7649_v47 = vpack.c.bf16 %v7647_v2, %v7648_v21  ;;  %v7653_v21 = vld [vmem:[#allocation94_spill] sm:$0xff] }
 0x689   :  { %v7636_v5 = vpack.c.bf16 %v7634_v33, %v7635_v12  ;;  %v7639_v27 = vld [vmem:[#allocation96_spill] sm:$0xff]  ;;  %v7643_v33 = vld [vmem:[#allocation95_spill] sm:$0xff]  ;;  %v6282_v12 = vmul.f32 %v6048_v40, %v6102_v43  ;;  %v7650_v43 = vld [vmem:[#allocation41_spill] sm:$0xff]  ;;  %v2081_v52 = vmul.f32 %v6162_v53, %v2034_v20  ;;  %v2027_v20 = vsel %vm2023_vm6, %v7629_v39, %v7644_v25 }
 0x68a   :  { %v2171_v54 = vsel %vm2168_vm5, %v7639_v27, %v6257_v31  ;;  %v2051_v3 = vsel %vm2023_vm6, %v7644_v25, %v7643_v33  ;;  %v6290_v1 = vpop.permute.xlu0 %2162  ;;  %v2043_v61 = vsel %vm2023_vm6, %v7643_v33, %v7630_v32  ;;  %v7652_v29 = vpack.c.bf16 %v7650_v43, %v7651_v7  ;;  %v7657_v7 = vld [vmem:[#allocation35_spill] sm:$0xff] }
 0x68b   :  { %2758 = vmatpush1.bf16.msra.mxu1 %v7636_v5  ;;  %v2085_v5 = vmul.f32 %v6162_v53, %v2035_v13  ;;  %7645 = vst [vmem:[#allocation181_spill] sm:$0xff] %v6282_v12  ;;  %v6285_v0 = vmul.f32 %v6048_v40, %v2171_v54  ;;  %2881 = vmatpush1.bf16.msra.mxu0 %v7649_v47  ;;  %v7654_v47 = vld [vmem:[#allocation118_spill] sm:$0xff]  ;;  %v6312_v32 = vpop.permute.xlu1 %2414  ;;  %v7661_v12 = vld [vmem:[#allocation155_spill] sm:$0xff] }
 0x68c   :  { %2759 = vmatprep.subr.bf16.mxu1 %v7642_v28  ;;  %v2075_v28 = vmul.f32 %v6203_v38, %v2048_v57  ;;  %v2621_v13 = vpack.c.bf16 %v6233_v37, %v2074_v42  ;;  %2882 = vmatprep.subr.bf16.mxu0 %v7652_v29  ;;  %v2620_v54 = vpack.c.bf16 %v2077_v35, %v2073_v60  ;;  %v7655_v57 = vld [vmem:[#allocation135_spill] sm:$0xff]  ;;  %v7658_v29 = vld [vmem:[#allocation34_spill] sm:$0xff] }
 0x68d   :  { %7646 = vst [vmem:[#allocation163_spill] sm:$0xff] %v6285_v0  ;;  %v2050_v2 = vsel %vm2023_vm6, %v7654_v47, %v7653_v21  ;;  %v2037_v42 = vsel %vm2023_vm6, %v7656_v58, %v7655_v57  ;;  %v7659_v35 = vpack.c.bf16 %v7657_v7, %v7658_v29  ;;  %v2042_v60 = vsel %vm2023_vm6, %v7653_v21, %v7638_v51  ;;  %v7660_v0 = vld [vmem:[#allocation134_spill] sm:$0xff]  ;;  %v7662_v29 = vld [vmem:[#allocation137_spill] sm:$0xff] }
 0x68e   :  { %v2087_v33 = vmul.f32 %v6203_v38, %v2051_v3  ;;  %v2622_v43 = vpack.c.bf16 %v2079_v50, %v2075_v28  ;;  %v2084_v37 = vmul.f32 %v6132_v63, %v2043_v61  ;;  %v2036_v7 = vsel %vm2023_vm6, %v7661_v12, %v7660_v0  ;;  %v7664_v21 = vld [vmem:[#allocation37_spill] sm:$0xff]  ;;  %v6338_v39 = vpop.permute.xlu0 %2420 }
 0x68f   :  { %2760 = vmatpush1.bf16.msra.mxu1 %v7659_v35  ;;  %v7663_v35 = vld [vmem:[#allocation160_spill] sm:$0xff]  ;;  %v7666_v59 = vpack.c.bf16 %v7664_v21, %v7665_v19  ;;  %v2624_v25 = vpack.c.bf16 %v2085_v5, %v2081_v52  ;;  %v2026_v50 = vsel %vm2023_vm6, %v7637_v9, %v7654_v47  ;;  %v2083_v3 = vmul.f32 %v6203_v38, %v2050_v2  ;;  %v7668_v5 = vld [vmem:[#allocation159_spill] sm:$0xff]  ;;  %v6360_v47 = vpop.permute.xlu1 %2430 }
 0x690   :  { %2761 = vmatprep.subr.bf16.mxu1 %v2620_v54  ;;  %v2053_v51 = vsel %vm2023_vm6, %v7663_v35, %v7662_v29  ;;  %v2045_v28 = vsel %vm2023_vm6, %v7662_v29, %v7656_v58  ;;  %v2093_v61 = vmul.f32 %v6162_v53, %v2037_v42  ;;  %v2086_v19 = vmul.f32 %v6166_v22, %v2027_v20  ;;  %v7667_v52 = vld [vmem:[#allocation136_spill] sm:$0xff] }
 0x691   :  { %2883 = vmatpush1.bf16.msra.mxu0 %v7666_v59  ;;  %v2080_v59 = vmul.f32 %v6132_v63, %v2042_v60  ;;  %v2052_v54 = vsel %vm2023_vm6, %v7668_v5, %v7667_v52  ;;  %v2029_v9 = vsel %vm2023_vm6, %v7655_v57, %v7663_v35  ;;  %v2044_v58 = vsel %vm2023_vm6, %v7667_v52, %v7661_v12  ;;  %v7669_v12 = vld [vmem:[#allocation75_spill] sm:$0xff] }
 0x692   :  { %2884 = vmatprep.subr.bf16.mxu0 %v2622_v43  ;;  %v2089_v2 = vmul.f32 %v6162_v53, %v2036_v7  ;;  %v2095_v42 = vmul.f32 %v6203_v38, %v2053_v51  ;;  %v2626_v60 = vpack.c.bf16 %v2087_v33, %v2083_v3  ;;  %v2082_v43 = vmul.f32 %v6166_v22, %v2026_v50  ;;  %v6374_v57 = vpop.permute.xlu0 %2436  ;;  %v3335_v51 = vld [vmem:[%s7001_s7 + $0x8] sm:$0xff] }
 0x693   :  { %2762 = vmatpush1.bf16.msra.mxu1 %v2619_v18  ;;  %v2623_v20 = vpack.c.bf16 %v2084_v37, %v2080_v59  ;;  %v2092_v29 = vmul.f32 %v6132_v63, %v2045_v28  ;;  %v2028_v18 = vsel %vm2023_vm6, %v7660_v0, %v7668_v5  ;;  %v2178_v7 = vsel %vm2168_vm5, %v7669_v12, %v7511_v26  ;;  %v6393_v50 = vpop.permute.xlu1 %2398 }
 0x694   :  { %2763 = vmatprep.subr.bf16.mxu1 %v2624_v25  ;;  %v2091_v33 = vmul.f32 %v6203_v38, %v2052_v54  ;;  %v2094_v37 = vmul.f32 %v6166_v22, %v2029_v9  ;;  %v2628_v35 = vpack.c.bf16 %v2093_v61, %v2089_v2  ;;  %v6386_v0 = vrot.slane %v3335_v51, %v7572_v62 }
 0x695   :  { %2885 = vmatpush1.bf16.msra.mxu0 %v2621_v13  ;;  %v7670_v13 = vld [vmem:[#allocation74_spill] sm:$0xff]  ;;  %v2625_v25 = vpack.c.bf16 %v2086_v19, %v2082_v43  ;;  %v2088_v26 = vmul.f32 %v6132_v63, %v2044_v58  ;;  %7671 = vst [vmem:[#allocation167_spill] sm:$0xff] %v6393_v50  ;;  %v2186_v3 = vsel %vm2168_vm5, %v7512_v16, %v7669_v12  ;;  %v7674_v58 = vld [vmem:[#allocation21_spill] sm:$0xff] }
 0x696   :  { %2886 = vmatprep.subr.bf16.mxu0 %v2626_v60  ;;  %v2177_v21 = vsel %vm2168_vm5, %v7670_v13, %v7576_v45  ;;  %v2090_v28 = vmul.f32 %v6166_v22, %v2028_v18  ;;  %v2477_v61 = vsel %vm2458_vm7, %v6393_v50, %v6312_v32  ;;  %v2630_v45 = vpack.c.bf16 %v2095_v42, %v2091_v33  ;;  %v1990_v16 = vpop.permute.xlu0 %1989  ;;  %v7675_v42 = vld [vmem:[#allocation64_spill] sm:$0xff]  ;;  %v3336_v18 = vld [vmem:[%s7001_s7] sm:$0xff] }
 0x697   :  { %2764 = vmatpush1.bf16.msra.mxu1 %v2623_v20  ;;  %v2222_v59 = vmul.f32 %v6386_v0, %v2178_v7  ;;  %v2627_v19 = vpack.c.bf16 %v2092_v29, %v2088_v26  ;;  %v6407_v52 = vmul.f32 %v6171_v4, %v6246_v41  ;;  %v6410_v5 = vmul.f32 %v6171_v4, %v2477_v61  ;;  %v7676_v7 = vld [vmem:[#allocation117_spill] sm:$0xff]  ;;  %v7708_v4 = vld [vmem:[#allocation44_spill] sm:$0xff] }
 0x698   :  { %2765 = vmatprep.subr.bf16.mxu1 %v2628_v35  ;;  %v2629_v54 = vpack.c.bf16 %v2094_v37, %v2090_v28  ;;  %v2096_v9 = vmul.f32 %v6132_v63, %v5900_v8  ;;  %v2039_v2 = vsel %vm2023_vm6, %v1990_v16, %v7674_v58  ;;  %v2047_v60 = vsel %vm2023_vm6, %v7675_v42, %v1990_v16  ;;  %v6426_v8 = vpop.permute.xlu1 %2160 }
 0x699   :  { %7672 = vst [vmem:[#allocation164_spill] sm:$0xff] %v6407_v52  ;;  %7673 = vst [vmem:[#allocation166_spill] sm:$0xff] %v6410_v5  ;;  %2887 = vmatpush1.bf16.msra.mxu0 %v2625_v25  ;;  %v2097_v41 = vmul.f32 %v6162_v53, %v5895_v6  ;;  %v2100_v43 = vmul.f32 %v6132_v63, %v2047_v60  ;;  %v2101_v29 = vmul.f32 %v6162_v53, %v2039_v2  ;;  %v7678_v25 = vld [vmem:[#allocation116_spill] sm:$0xff]  ;;  %v7684_v60 = vld [vmem:[#allocation138_spill] sm:$0xff] }
 0x69a   :  { %2888 = vmatprep.subr.bf16.mxu0 %v2630_v45  ;;  %v6432_v12 = vrot.slane %v3336_v18, %v7572_v62  ;;  %v2180_v6 = vsel %vm2168_vm5, %v7676_v7, %v7581_v23  ;;  %v2185_v63 = vsel %vm2168_vm5, %v7577_v14, %v7670_v13  ;;  %v2218_v53 = vmul.f32 %v6386_v0, %v2177_v21  ;;  %v6443_v37 = vpop.permute.xlu0 %2404  ;;  %v7679_v23 = vld [vmem:[#allocation99_spill] sm:$0xff]  ;;  %v7695_v52 = vld [vmem:[#allocation60_spill] sm:$0xff] }
 0x69b   :  { %2766 = vmatpush1.bf16.msra.mxu1 %v2627_v19  ;;  %v2631_v33 = vpack.c.bf16 %v2100_v43, %v2096_v9  ;;  %7677 = vst [vmem:[#allocation22_spill] sm:$0xff] %v6443_v37  ;;  %v2632_v35 = vpack.c.bf16 %v2101_v29, %v2097_v41  ;;  %v2179_v26 = vsel %vm2168_vm5, %v7678_v25, %v7639_v27  ;;  %v7680_v45 = vld [vmem:[#allocation139_spill] sm:$0xff]  ;;  %v7682_v27 = vld [vmem:[#allocation98_spill] sm:$0xff]  ;;  %v7685_v41 = vld [vmem:[#allocation157_spill] sm:$0xff] }
 0x69c   :  { %v2221_v62 = vmul.f32 %v6432_v12, %v2186_v3  ;;  %v2188_v28 = vsel %vm2168_vm5, %v7679_v23, %v7676_v7  ;;  %v2230_v14 = vmul.f32 %v6386_v0, %v2180_v6  ;;  %v6455_v13 = vpop.permute.xlu1 %2418  ;;  %v2636_v21 = vpack.c.bf16 %v2222_v59, %v2218_v53  ;;  %v7681_v3 = vld [vmem:[#allocation158_spill] sm:$0xff]  ;;  %v7686_v29 = vld [vmem:[#allocation141_spill] sm:$0xff]  ;;  %v7687_v6 = vld [vmem:[#allocation3_spill] sm:$0xff] }
 0x69d   :  { %2889 = vmatpush1.bf16.msra.mxu0 %v2629_v54  ;;  %2767 = vmatprep.subr.bf16.mxu1 %v2632_v35  ;;  %v2217_v61 = vmul.f32 %v6432_v12, %v2185_v63  ;;  %v2182_v19 = vsel %vm2168_vm5, %v7681_v3, %v7680_v45  ;;  %v2187_v16 = vsel %vm2168_vm5, %v7682_v27, %v7678_v25  ;;  %v7689_v25 = vld [vmem:[#allocation78_spill] sm:$0xff] }
 0x69e   :  { %v2226_v54 = vmul.f32 %v6386_v0, %v2179_v26  ;;  %v6467_v9 = vpop.permute.xlu0 %2440  ;;  %v2229_v59 = vmul.f32 %v6432_v12, %v2188_v28  ;;  %v2181_v43 = vsel %vm2168_vm5, %v7685_v41, %v7684_v60  ;;  %v2190_v7 = vsel %vm2168_vm5, %v7686_v29, %v7681_v3  ;;  %v7690_v28 = vld [vmem:[#allocation79_spill] sm:$0xff] }
 0x69f   :  { %2768 = vmatpush1.bf16.msra.mxu1 %v2631_v33  ;;  %7683 = vst [vmem:[#allocation23_spill] sm:$0xff] %v6467_v9  ;;  %v2635_v2 = vpack.c.bf16 %v2221_v62, %v2217_v61  ;;  %v6479_v63 = vrot.slane %v3335_v51, %v7687_v6  ;;  %v2238_v53 = vmul.f32 %v6386_v0, %v2182_v19  ;;  %v7688_v62 = vld [vmem:[#allocation58_spill] sm:$0xff]  ;;  %v7692_v51 = vld [vmem:[#allocation140_spill] sm:$0xff] }
 0x6a0   :  { %2769 = vmatprep.subr.bf16.mxu1 %v2636_v21  ;;  %v6482_v33 = vpop.permute.xlu1 %2434  ;;  %v2640_v35 = vpack.c.bf16 %v2230_v14, %v2226_v54  ;;  %v2322_v26 = vsel %vm2313_vm8, %v7689_v25, %v7688_v62  ;;  %v7691_v21 = vld [vmem:[#allocation61_spill] sm:$0xff]  ;;  %v2225_v3 = vmul.f32 %v6432_v12, %v2187_v16  ;;  %v2189_v19 = vsel %vm2168_vm5, %v7692_v51, %v7685_v41  ;;  %v7693_v54 = vld [vmem:[#allocation59_spill] sm:$0xff] }
 0x6a1   :  { %v2331_v61 = vsel %vm2313_vm8, %v7691_v21, %v7690_v28  ;;  %v6498_v14 = vrot.slane %v3336_v18, %v7687_v6  ;;  %v2323_v20 = vsel %vm2313_vm8, %v7690_v28, %v7693_v54  ;;  %v2234_v9 = vmul.f32 %v6386_v0, %v2181_v43  ;;  %v7699_v21 = vld [vmem:[#allocation66_spill] sm:$0xff] }
 0x6a2   :  { %v2237_v5 = vmul.f32 %v6432_v12, %v2190_v7  ;;  %v6506_v16 = vpop.permute.xlu0 %2408  ;;  %v2639_v41 = vpack.c.bf16 %v2229_v59, %v2225_v3  ;;  %v2363_v18 = vmul.f32 %v6479_v63, %v2322_v26  ;;  %v2233_v28 = vmul.f32 %v6432_v12, %v2189_v19  ;;  %v7704_v19 = vld [vmem:[#allocation103_spill] sm:$0xff] }
 0x6a3   :  { %2770 = vmatpush1.bf16.msra.mxu1 %v2635_v2  ;;  %7694 = vst [vmem:[#allocation90_spill] sm:$0xff] %v6506_v16  ;;  %v2330_v2 = vsel %vm2313_vm8, %v7695_v52, %v7689_v25  ;;  %v6514_v50 = vmul.f32 %v6498_v14, %v2331_v61  ;;  %v2644_v43 = vpack.c.bf16 %v2238_v53, %v2234_v9  ;;  %v7698_v16 = vld [vmem:[#allocation120_spill] sm:$0xff]  ;;  %v7700_v25 = vld [vmem:[#allocation69_spill] sm:$0xff]  ;;  %v7701_v9 = vld [vmem:[#allocation102_spill] sm:$0xff] }
 0x6a4   :  { %2771 = vmatprep.subr.bf16.mxu1 %v2640_v35  ;;  %v6517_v54 = vpop.permute.xlu1 %2402  ;;  %v2367_v7 = vmul.f32 %v6479_v63, %v2323_v20  ;;  %v7697_v35 = vld [vmem:[#allocation100_spill] sm:$0xff]  ;;  %v2183_v59 = vsel %vm2168_vm5, %v5922_v11, %v7699_v21  ;;  %v2191_v26 = vsel %vm2168_vm5, %v7700_v25, %v5922_v11  ;;  %v2332_v20 = vsel %vm2313_vm8, %v7701_v9, %v7698_v16  ;;  %v7702_v53 = vld [vmem:[#allocation101_spill] sm:$0xff]  ;;  %v7705_v11 = vld [vmem:[#allocation143_spill] sm:$0xff] }
 0x6a5   :  { %7696 = vst [vmem:[#allocation110_spill] sm:$0xff] %v6517_v54  ;;  %v2324_v62 = vsel %vm2313_vm8, %v7698_v16, %v7697_v35  ;;  %v7703_v61 = vld [vmem:[#allocation121_spill] sm:$0xff]  ;;  %v2643_v52 = vpack.c.bf16 %v2237_v5, %v2233_v28  ;;  %v7709_v54 = vld [vmem:[#allocation84_spill] sm:$0xff]  ;;  %v2241_v28 = vmul.f32 %v6432_v12, %v2191_v26 }
 0x6a6   :  { %v2325_v3 = vsel %vm2313_vm8, %v7703_v61, %v7702_v53  ;;  %v2333_v35 = vsel %vm2313_vm8, %v7704_v19, %v7703_v61  ;;  %v2135_v21 = vpop.permute.xlu0 %2134  ;;  %v7707_v16 = vld [vmem:[#allocation145_spill] sm:$0xff] }
 0x6a7   :  { %2772 = vmatpush1.bf16.msra.mxu1 %v2639_v41  ;;  %v7706_v41 = vld [vmem:[#allocation162_spill] sm:$0xff]  ;;  %v2184_v53 = vsel %vm2168_vm5, %v2135_v21, %v7708_v4  ;;  %v2192_v5 = vsel %vm2168_vm5, %v7709_v54, %v2135_v21  ;;  %v7711_v4 = vld [vmem:[#allocation161_spill] sm:$0xff]  ;;  %v7712_v21 = vld [vmem:[#allocation144_spill] sm:$0xff] }
 0x6a8   :  { %2773 = vmatprep.subr.bf16.mxu1 %v2644_v43  ;;  %v2327_v25 = vsel %vm2313_vm8, %v7706_v41, %v7705_v11  ;;  %v2335_v9 = vsel %vm2313_vm8, %v7707_v16, %v7706_v41  ;;  %v2242_v43 = vmul.f32 %v6386_v0, %v2183_v59  ;;  %v2245_v61 = vmul.f32 %v6432_v12, %v2192_v5  ;;  %v6562_v19 = vpop.permute.xlu1 %2164 }
 0x6a9   :  { %v2246_v11 = vmul.f32 %v6386_v0, %v2184_v53  ;;  %v2374_v41 = vmul.f32 %v6498_v14, %v2333_v35  ;;  %v2375_v16 = vmul.f32 %v6479_v63, %v2325_v3  ;;  %v2326_v37 = vsel %vm2313_vm8, %v7711_v4, %v7710_v34 }
 0x6aa   :  { %v2334_v59 = vsel %vm2313_vm8, %v7712_v21, %v7711_v4  ;;  %v6575_v12 = vmul.f32 %v6498_v14, %v2335_v9  ;;  %v2383_v0 = vmul.f32 %v6479_v63, %v2327_v25  ;;  %v2647_v26 = vpack.c.bf16 %v2245_v61, %v2241_v28  ;;  %v6578_v35 = vpop.permute.xlu0 %2299 }
 0x6ab   :  { %2774 = vmatpush1.bf16.msra.mxu1 %v2643_v52  ;;  %v2648_v53 = vpack.c.bf16 %v2246_v11, %v2242_v43  ;;  %v2362_v3 = vmul.f32 %v6498_v14, %v2330_v2  ;;  %v2370_v5 = vmul.f32 %v6498_v14, %v2332_v20  ;;  %v2371_v34 = vmul.f32 %v6479_v63, %v2324_v62 }
 0x6ac   :  { %v6584_v54 = vmul.f32 %v6498_v14, %v2334_v59  ;;  %v2379_v4 = vmul.f32 %v6479_v63, %v2326_v37  ;;  %v6587_v52 = vpop.permute.xlu1 %2422  ;;  %v2652_v9 = vpack.c.bf16 %v2367_v7, %v2363_v18  ;;  %v2196_v62 = vsel %vm2168_vm5, %v6092_v17, %v7679_v23  ;;  %v3338_v17 = vld [vmem:[%s7001_s7 + $0x18] sm:$0xff] }
 0x6ad   :  { %2775 = vmatprep.subr.bf16.mxu1 %v2648_v53  ;;  %v2651_v25 = vpack.c.bf16 %v6514_v50, %v2362_v3  ;;  %v2655_v28 = vpack.c.bf16 %v2374_v41, %v2370_v5  ;;  %v2656_v11 = vpack.c.bf16 %v2375_v16, %v2371_v34  ;;  %v2195_v18 = vsel %vm2168_vm5, %v6257_v31, %v7682_v27  ;;  %v3337_v50 = vld [vmem:[%s7001_s7 + $0x10] sm:$0xff] }
 0x6ae   :  { %v2659_v2 = vpack.c.bf16 %v6575_v12, %v6584_v54  ;;  %v2445_v20 = vpop.permute.xlu0 %2444  ;;  %v2660_v37 = vpack.c.bf16 %v2383_v0, %v2379_v4  ;;  %v6604_v7 = vrot.slane %v3337_v50, %v7687_v6  ;;  %v6610_v23 = vrot.slane %v3338_v17, %v7687_v6  ;;  %v7716_v17 = vld [vmem:[#allocation110_spill] sm:$0xff] }
 0x6af   :  { %2776 = vmatpush1.bf16.msra.mxu1 %v2647_v26  ;;  %v6615_v34 = vsel %vm2458_vm7, %v2445_v20, %v5987_v49  ;;  %v2098_v31 = vmul.f32 %v6166_v22, %v5965_v24  ;;  %v2099_v27 = vmul.f32 %v6203_v38, %v5970_v30  ;;  %v2470_v16 = vsel %vm2458_vm7, %v6115_v55, %v6158_v44 }
 0x6b0   :  { %2777 = vmatprep.subr.bf16.mxu1 %v2652_v9  ;;  %v6625_v43 = vpop.permute.xlu1 %2438  ;;  %v6629_v6 = vcombine.low %v6084_v10, %v6084_v10  ;;  %v6633_v49 = vmul.f32 %v6479_v63, %v6021_v36  ;;  %v6637_v24 = vmul.f32 %v6498_v14, %v6053_v56  ;;  %v6640_v30 = vmul.f32 %v6057_v15, %v2196_v62  ;;  %v7713_v9 = vld [vmem:[#allocation22_spill] sm:$0xff] }
 0x6b1   :  { %v2174_v55 = vsel %vm2168_vm5, %v7680_v45, %v6290_v1  ;;  %v6647_v10 = vmul.f32 %v6057_v15, %v2195_v18  ;;  %v2198_v36 = vsel %vm2168_vm5, %v6290_v1, %v7686_v29  ;;  %v2469_v56 = vsel %vm2458_vm7, %v6312_v32, %v6360_v47  ;;  %v7715_v18 = vld [vmem:[#allocation104_spill] sm:$0xff] }
 0x6b2   :  { %v2173_v61 = vsel %vm2168_vm5, %v7684_v60, %v6426_v8  ;;  %v2022_v45 = vpop.permute.xlu0 %2021  ;;  %v6662_v41 = vmul.f32 %v6120_v46, %v2470_v16  ;;  %v2197_v1 = vsel %vm2168_vm5, %v6426_v8, %v7692_v51  ;;  %v6675_v60 = vmul.f32 %v6048_v40, %v2174_v55  ;;  %v6730_v55 = vld [vmem:[%s7001_s7 + $0x30] ss:$0 sm:$0xff] }
 0x6b3   :  { %2778 = vmatpush1.bf16.msra.mxu1 %v2651_v25  ;;  %v2031_v29 = vsel %vm2023_vm6, %v7674_v58, %v2022_v45  ;;  %v2055_v32 = vsel %vm2023_vm6, %v2022_v45, %v7675_v42  ;;  %v2471_v59 = vsel %vm2458_vm7, %v6455_v13, %v6482_v33  ;;  %v6686_v58 = vmul.f32 %v6057_v15, %v2198_v36  ;;  %v7718_v36 = vld [vmem:[#allocation127_spill] sm:$0xff]  ;;  %v7719_v45 = vld [vmem:[#allocation89_spill] sm:$0xff] }
 0x6b4   :  { %2779 = vmatprep.subr.bf16.mxu1 %v2656_v11  ;;  %v2102_v0 = vmul.f32 %v6166_v22, %v2031_v29  ;;  %v2103_v8 = vmul.f32 %v6203_v38, %v2055_v32  ;;  %v6683_v51 = vpop.permute.xlu1 %2406  ;;  %v6689_v26 = vmul.f32 %v6120_v46, %v2469_v56  ;;  %v2472_v42 = vsel %vm2458_vm7, %v6338_v39, %v6374_v57  ;;  %v7714_v11 = vld [vmem:[#allocation81_spill] sm:$0xff] }
 0x6b5   :  { %v6696_v53 = vmul.f32 %v6048_v40, %v2173_v61  ;;  %v6699_v22 = vmul.f32 %v6057_v15, %v2197_v1  ;;  %v2642_v4 = vpack.c.bf16 %v6640_v30, %v6647_v10  ;;  %v2480_v25 = vsel %vm2458_vm7, %v7713_v9, %v6338_v39  ;;  %v6735_v10 = vld [vmem:[%s7001_s7 + $0x38] ss:$0 sm:$0xff]  ;;  %v7720_v1 = vld [vmem:[#allocation82_spill] sm:$0xff] }
 0x6b6   :  { %v2633_v38 = vpack.c.bf16 %v2102_v0, %v2098_v31  ;;  %v2280_v3 = vpop.permute.xlu0 %2279  ;;  %v2634_v5 = vpack.c.bf16 %v2103_v8, %v2099_v27  ;;  %v6708_v62 = vmul.f32 %v6120_v46, %v2471_v59  ;;  %v6717_v50 = vmul.f32 %v6120_v46, %v2472_v42  ;;  %v7725_v42 = vld [vmem:[#allocation60_spill] sm:$0xff] }
 0x6b7   :  { %2780 = vmatpush1.bf16.msra.mxu1 %v2655_v28  ;;  %v2329_v28 = vsel %vm2313_vm8, %v2280_v3, %v7714_v11  ;;  %v2479_v31 = vsel %vm2458_vm7, %v7716_v17, %v6455_v13  ;;  %v2645_v30 = vpack.c.bf16 %v6675_v60, %v6696_v53  ;;  %v7717_v13 = vld [vmem:[#allocation105_spill] sm:$0xff]  ;;  %v6746_v56 = vmul.f32 %v7718_v36, %v2480_v25  ;;  %v7727_v25 = vld [vmem:[#allocation123_spill] sm:$0xff]  ;;  %v7754_v53 = vld [vmem:[#allocation90_spill] sm:$0xff] }
 0x6b8   :  { %2781 = vmatprep.subr.bf16.mxu1 %v2660_v37  ;;  %v2337_v37 = vsel %vm2313_vm8, %v7715_v18, %v2280_v3  ;;  %v2391_v27 = vmul.f32 %v6479_v63, %v2329_v28  ;;  %v2298_v16 = vpop.permute.xlu1 %2297  ;;  %2890 = vmatprep.subr.bf16.mxu0 %v2634_v5  ;;  %v2672_v63 = vpack.c.bf16 %v6662_v41, %v6689_v26  ;;  %v7726_v3 = vld [vmem:[#allocation107_spill] sm:$0xff]  ;;  %v7729_v28 = vld [vmem:[#allocation106_spill] sm:$0xff] }
 0x6b9   :  { %v2390_v39 = vmul.f32 %v6498_v14, %v2337_v37  ;;  %v2460_v14 = vsel %vm2458_vm7, %v7717_v13, %v2445_v20  ;;  %2891 = vmatpush1.bf16.msra.mxu0 %v2633_v38  ;;  %v7721_v29 = vpack.c.bf16 %v7719_v45, %v7720_v1  ;;  %v2646_v54 = vpack.c.bf16 %v6686_v58, %v6699_v22  ;;  %v7732_v13 = vld [vmem:[#allocation108_spill] sm:$0xff]  ;;  %v7734_v45 = vld [vmem:[#allocation58_spill] sm:$0xff] }
 0x6ba   :  { %v6752_v32 = vpop.permute.xlu0 %2303  ;;  %v2664_v20 = vpack.c.bf16 %v2391_v27, %v6633_v49  ;;  %v6758_v12 = vmul.f32 %v7718_v36, %v2479_v31  ;;  %v2676_v0 = vpack.c.bf16 %v6717_v50, %v6708_v62  ;;  %v7724_v49 = vld [vmem:[#allocation61_spill] sm:$0xff]  ;;  %v6775_v58 = vmul.f32 %v6730_v55, %v2460_v14  ;;  %v7728_v62 = vld [vmem:[#allocation88_spill] sm:$0xff]  ;;  %v7731_v27 = vld [vmem:[#allocation83_spill] sm:$0xff] }
 0x6bb   :  { %2782 = vmatpush1.bf16.msra.mxu1 %v2659_v2  ;;  %v2663_v61 = vpack.c.bf16 %v2390_v39, %v6637_v24  ;;  %2892 = vmatprep.subr.bf16.mxu0 %v7721_v29  ;;  %v7722_v2 = vld [vmem:[#allocation66_spill] sm:$0xff]  ;;  %v7723_v24 = vld [vmem:[#allocation69_spill] sm:$0xff]  ;;  %v2339_v8 = vsel %vm2313_vm8, %v6578_v35, %v7724_v49  ;;  %v6779_v26 = vmul.f32 %v6735_v10, %v6615_v34 }
 0x6bc   :  { %v2175_v41 = vsel %vm2168_vm5, %v7722_v2, %v6562_v19  ;;  %v2199_v59 = vsel %vm2168_vm5, %v6562_v19, %v7723_v24  ;;  %v2338_v22 = vsel %vm2313_vm8, %v2298_v16, %v7725_v42  ;;  %v2443_v19 = vpop.permute.xlu1 %2442  ;;  %2783 = vmatprep.subr.bf16.mxu1 %v2664_v20  ;;  %v2473_v38 = vsel %vm2458_vm7, %v6587_v52, %v6625_v43  ;;  %v7735_v20 = vld [vmem:[#allocation122_spill] sm:$0xff] }
 0x6bd   :  { %v2459_v5 = vsel %vm2458_vm7, %v7726_v3, %v2443_v19  ;;  %v2483_v34 = vsel %vm2458_vm7, %v2443_v19, %v7727_v25  ;;  %v7730_v37 = vpack.c.bf16 %v7728_v62, %v7729_v28  ;;  %v2481_v50 = vsel %vm2458_vm7, %v6683_v51, %v6587_v52  ;;  %v7741_v25 = vld [vmem:[#allocation163_spill] sm:$0xff] }
 0x6be   :  { %v6802_v31 = vmul.f32 %v6730_v55, %v2459_v5  ;;  %v6805_v39 = vmul.f32 %v6735_v10, %v2483_v34  ;;  %v7733_v14 = vpack.c.bf16 %v7731_v27, %v7732_v13  ;;  %v2314_v1 = vsel %vm2313_vm8, %v7734_v45, %v2298_v16  ;;  %v7740_v5 = vld [vmem:[#allocation181_spill] sm:$0xff]  ;;  %v7744_v27 = vld [vmem:[#allocation44_spill] sm:$0xff] }
 0x6bf   :  { %2784 = vmatpush1.bf16.msra.mxu1 %v2663_v61  ;;  %2893 = vmatpush1.bf16.msra.mxu0 %v7730_v37  ;;  %v2449_v61 = vpop.permute.xlu0 %2448  ;;  %v2365_v29 = vmul.f32 %v6610_v23, %v2338_v22  ;;  %v2675_v24 = vpack.c.bf16 %v6746_v56, %v6758_v12  ;;  %v7736_v22 = vld [vmem:[#allocation59_spill] sm:$0xff]  ;;  %v2369_v56 = vmul.f32 %v6610_v23, %v2339_v8  ;;  %v7737_v12 = vld [vmem:[#allocation109_spill] sm:$0xff] }
 0x6c0   :  { %2794 = vmatprep.subr.bf16.mxu1 %v7733_v14  ;;  %2894 = vmatprep.subr.bf16.mxu0 %v2642_v4  ;;  %v2462_v52 = vsel %vm2458_vm7, %v6158_v44, %v2449_v61  ;;  %v2486_v2 = vsel %vm2458_vm7, %v2449_v61, %v7735_v20  ;;  %v2243_v4 = vmul.f32 %v6048_v40, %v2175_v41  ;;  %v2302_v42 = vpop.permute.xlu1 %2301  ;;  %v7738_v41 = vld [vmem:[#allocation126_spill] sm:$0xff]  ;;  %v7745_v14 = vld [vmem:[#allocation84_spill] sm:$0xff] }
 0x6c1   :  { %v2669_v49 = vpack.c.bf16 %v6775_v58, %v6802_v31  ;;  %v2670_v16 = vpack.c.bf16 %v6779_v26, %v6805_v39  ;;  %v2244_v44 = vmul.f32 %v6057_v15, %v2199_v59  ;;  %v2315_v19 = vsel %vm2313_vm8, %v7736_v22, %v6578_v35  ;;  %v7743_v35 = vld [vmem:[#allocation103_spill] sm:$0xff] }
 0x6c2   :  { %2786 = vmatmul.mubr.bf16.vlgmr.msra.gmra.mrb[32].mxu1 %v6629_v6  ;;  %v7739_v3 = vpack.c.bf16 %v7737_v12, %v7738_v41  ;;  %v7742_v34 = vpack.c.bf16 %v7740_v5, %v7741_v25  ;;  %v2532_v62 = vmul.f32 %v6120_v46, %v2473_v38  ;;  %v2531_v28 = vmul.f32 %v7718_v36, %v2481_v50  ;;  %v7749_v41 = vld [vmem:[#allocation164_spill] sm:$0xff] }
 0x6c3   :  { %v2364_v59 = vmul.f32 %v6604_v7, %v2314_v1  ;;  %v2167_v37 = vpop.permute.xlu0 %2166  ;;  %v2341_v8 = vsel %vm2313_vm8, %v6752_v32, %v7743_v35  ;;  %v2654_v61 = vpack.c.bf16 %v2369_v56, %v2365_v29  ;;  %v7746_v50 = vmov 0   ;;  %v7748_v56 = vld [vmem:[#allocation167_spill] sm:$0xff] }
 0x6c4   :  { %2795 = vmatpush1.bf16.msra.mxu1 %v7739_v3  ;;  %2895 = vmatpush1.bf16.msra.mxu0 %v7742_v34  ;;  %v2176_v13 = vsel %vm2168_vm5, %v7744_v27, %v2167_v37  ;;  %v2200_v38 = vsel %vm2168_vm5, %v2167_v37, %v7745_v14  ;;  %v2447_v22 = vpop.permute.xlu1 %2446  ;;  %v6863_v12 = vmul.f32 %v6735_v10, %v2486_v2  ;;  %v7750_v3 = vld [vmem:[#allocation166_spill] sm:$0xff]  ;;  %v7752_v34 = vld [vmem:[#allocation100_spill] sm:$0xff]  ;;  %v7753_v27 = vld [vmem:[#allocation23_spill] sm:$0xff] }
 0x6c5   :  { %2796 = vmatprep.subr.bf16.mxu1 %v2672_v63  ;;  %2896 = vmatprep.subr.bf16.mxu0 %v2646_v54  ;;  %v6855_v63 = vmul.f32 %v6730_v55, %v2462_v52  ;;  %v7747_v54 = vld [vmem:[#allocation102_spill] sm:$0xff]  ;;  %v2247_v1 = vmul.f32 %v6048_v40, %v2176_v13  ;;  %v2248_v20 = vmul.f32 %v6057_v15, %v2200_v38  ;;  %v7755_v38 = vld [vmem:[#allocation101_spill] sm:$0xff] }
 0x6c6   :  { %2826 = vmatprep.mubr.bf16.mxu1 %v7746_v50  ;;  %v2340_v45 = vsel %vm2313_vm8, %v2302_v42, %v7747_v54  ;;  %v2461_v29 = vsel %vm2458_vm7, %v6360_v47, %v2447_v22  ;;  %v2485_v52 = vsel %vm2458_vm7, %v2447_v22, %v7748_v56  ;;  %v7751_v5 = vpack.c.bf16 %v7749_v41, %v7750_v3 }
 0x6c7   :  { %v2649_v40 = vpack.c.bf16 %v2247_v1, %v2243_v4  ;;  %v6878_v15 = vmul.f32 %v6730_v55, %v2461_v29  ;;  %v2518_v2 = vmul.f32 %v6735_v10, %v2485_v52  ;;  %v2425_v47 = vpop.permute.xlu0 %2424  ;;  %v2650_v25 = vpack.c.bf16 %v2248_v20, %v2244_v44  ;;  %v7758_v52 = vld [vmem:[#allocation142_spill] sm:$0xff] }
 0x6c8   :  { %2797 = vmatpush1.bf16.msra.mxu1 %v7751_v5  ;;  %2897 = vmatpush1.bf16.msra.mxu0 %v2645_v30  ;;  %v2316_v37 = vsel %vm2313_vm8, %v7752_v34, %v2302_v42  ;;  %v2373_v35 = vmul.f32 %v6610_v23, %v2340_v45  ;;  %v2474_v60 = vsel %vm2458_vm7, %v2425_v47, %v7753_v27  ;;  %v2306_v13 = vpop.permute.xlu1 %2305 }
 0x6c9   :  { %2798 = vmatprep.subr.bf16.mxu1 %v2676_v0  ;;  %v2482_v30 = vsel %vm2458_vm7, %v7754_v53, %v2425_v47  ;;  %v2673_v4 = vpack.c.bf16 %v6855_v63, %v6878_v15  ;;  %v2536_v44 = vmul.f32 %v6120_v46, %v2474_v60  ;;  %2898 = vmatprep.subr.bf16.mxu0 %v2650_v25 }
 0x6ca   :  { %v2535_v0 = vmul.f32 %v7718_v36, %v2482_v30  ;;  %v2674_v42 = vpack.c.bf16 %v6863_v12, %v2518_v2  ;;  %v2368_v14 = vmul.f32 %v6604_v7, %v2315_v19  ;;  %v2317_v54 = vsel %vm2313_vm8, %v7755_v38, %v6752_v32  ;;  %v7756_v12 = vld [vmem:[#allocation145_spill] sm:$0xff]  ;;  %v6912_v32 = vld [vmem:[%s7002_s8 + $0x10] ss:$0 sps:$4 sm:$0xff]  }
 0x6cb   :  { %v2377_v45 = vmul.f32 %v6610_v23, %v2341_v8  ;;  %v2372_v1 = vmul.f32 %v6604_v7, %v2316_v37  ;;  %v2308_v46 = vpop.permute.xlu0 %2307  ;;  %v2680_v20 = vpack.c.bf16 %v2536_v44, %v2532_v62  ;;  %v2342_v19 = vsel %vm2313_vm8, %v2306_v13, %v7712_v21  ;;  %v7759_v37 = vld [vmem:[#allocation80_spill] sm:$0xff] }
 0x6cc   :  { %2799 = vmatpush1.bf16.msra.mxu1 %v2675_v24  ;;  %2899 = vmatpush1.bf16.msra.mxu0 %v2649_v40  ;;  %v2679_v36 = vpack.c.bf16 %v2535_v0, %v2531_v28  ;;  %v2653_v22 = vpack.c.bf16 %v2368_v14, %v2364_v59  ;;  %v2343_v29 = vsel %vm2313_vm8, %v2308_v46, %v7756_v12  ;;  %v7757_v28 = vld [vmem:[#allocation143_spill] sm:$0xff]  ;;  %v2451_v8 = vpop.permute.xlu1 %2450 }
 0x6cd   :  { %2900 = vmatprep.subr.bf16.mxu0 %v2654_v61  ;;  %v2376_v24 = vmul.f32 %v6604_v7, %v2317_v54  ;;  %v2319_v62 = vsel %vm2313_vm8, %v7757_v28, %v2308_v46  ;;  %v2385_v59 = vmul.f32 %v6610_v23, %v2343_v29  ;;  %2800 = vmatprep.subr.bf16.mxu1 %v2680_v20 }
 0x6ce   :  { %v2658_v21 = vpack.c.bf16 %v2377_v45, %v2373_v35  ;;  %v2463_v61 = vsel %vm2458_vm7, %v6482_v33, %v2451_v8  ;;  %v2318_v41 = vsel %vm2313_vm8, %v7758_v52, %v2306_v13  ;;  %v2381_v3 = vmul.f32 %v6610_v23, %v2342_v19  ;;  %v7760_v35 = vld [vmem:[#allocation62_spill] sm:$0xff] }
 0x6cf   :  { %v2657_v56 = vpack.c.bf16 %v2376_v24, %v2372_v1  ;;  %v2453_v5 = vpop.permute.xlu0 %2452  ;;  %v2384_v40 = vmul.f32 %v6604_v7, %v2319_v62  ;;  %v2487_v33 = vsel %vm2458_vm7, %v2451_v8, %v7716_v17  ;;  %v2525_v25 = vmul.f32 %v6730_v55, %v2463_v61 }
 0x6d0   :  { %2801 = vmatpush1.bf16.msra.mxu1 %v2679_v36  ;;  %2901 = vmatpush1.bf16.msra.mxu0 %v2653_v22  ;;  %v2464_v2 = vsel %vm2458_vm7, %v6374_v57, %v2453_v5  ;;  %v2488_v47 = vsel %vm2458_vm7, %v2453_v5, %v7713_v9  ;;  %v2662_v34 = vpack.c.bf16 %v2385_v59, %v2381_v3 }
 0x6d1   :  { %2902 = vmatprep.subr.bf16.mxu0 %v2658_v21  ;;  %2917 = vmatprep.subr.bf16.mxu1 %v2670_v16  ;;  %v2529_v26 = vmul.f32 %v6730_v55, %v2464_v2  ;;  %v2530_v39 = vmul.f32 %v6735_v10, %v2488_v47  ;;  %v2310_v16 = vpop.permute.xlu1 %2309  ;;  %v2380_v17 = vmul.f32 %v6604_v7, %v2318_v41 }
 0x6d2   :  { %v2320_v57 = vsel %vm2313_vm8, %v7759_v37, %v2310_v16  ;;  %v2344_v9 = vsel %vm2313_vm8, %v2310_v16, %v7760_v35  ;;  %v2526_v60 = vmul.f32 %v6735_v10, %v2487_v33 }
 0x6d3   :  { %3071 = vmatmul.mubr.msk.bf16.vlgmr.msra.gmra.mrb[32].mxu1 %vm85_vm0, %v6912_v32  ;;  %v2677_v30 = vpack.c.bf16 %v2529_v26, %v2525_v25  ;;  %v2312_v0 = vpop.permute.xlu0 %2311  ;;  %v2661_v44 = vpack.c.bf16 %v2384_v40, %v2380_v17  ;;  %v2388_v13 = vmul.f32 %v6604_v7, %v2320_v57  ;;  %v2389_v58 = vmul.f32 %v6610_v23, %v2344_v9 }
 0x6d4   :  { %2903 = vmatpush1.bf16.msra.mxu0 %v2657_v56  ;;  %2918 = vmatpush1.bf16.msra.mxu1 %v2669_v49  ;;  %v2321_v14 = vsel %vm2313_vm8, %v7714_v11, %v2312_v0  ;;  %v2345_v38 = vsel %vm2313_vm8, %v2312_v0, %v7715_v18  ;;  %v2678_v54 = vpack.c.bf16 %v2530_v39, %v2526_v60 }
 0x6d5   :  { %2904 = vmatprep.subr.bf16.mxu0 %v2662_v34  ;;  %2919 = vmatprep.subr.bf16.mxu1 %v2674_v42  ;;  %v2392_v31 = vmul.f32 %v6604_v7, %v2321_v14  ;;  %v2393_v49 = vmul.f32 %v6610_v23, %v2345_v38  ;;  %v2455_v42 = vpop.permute.xlu1 %2454 }
 0x6d6   :  { %2949 = vmatprep.mubr.bf16.mxu1 %v7746_v50  ;;  %v2465_v45 = vsel %vm2458_vm7, %v6625_v43, %v2455_v42  ;;  %v2489_v11 = vsel %vm2458_vm7, %v2455_v42, %v6683_v51 }
 0x6d7   :  { %v2665_v18 = vpack.c.bf16 %v2392_v31, %v2388_v13  ;;  %v2457_v7 = vpop.permute.xlu0 %2456  ;;  %v2666_v50 = vpack.c.bf16 %v2393_v49, %v2389_v58  ;;  %v2533_v1 = vmul.f32 %v6730_v55, %v2465_v45  ;;  %v2534_v51 = vmul.f32 %v6735_v10, %v2489_v11 }
 0x6d8   :  { %2905 = vmatpush1.bf16.msra.mxu0 %v2661_v44  ;;  %2920 = vmatpush1.bf16.msra.mxu1 %v2673_v4  ;;  %v2466_v23 = vsel %vm2458_vm7, %v7753_v27, %v2457_v7  ;;  %v2490_v43 = vsel %vm2458_vm7, %v2457_v7, %v7754_v53 }
 0x6d9   :  { %2921 = vmatprep.subr.bf16.mxu1 %v2678_v54  ;;  %v2537_v36 = vmul.f32 %v6730_v55, %v2466_v23  ;;  %v2538_v63 = vmul.f32 %v6735_v10, %v2490_v43  ;;  %2906 = vmatprep.subr.bf16.mxu0 %v2666_v50 }
 0x6db   :  { %v2681_v15 = vpack.c.bf16 %v2537_v36, %v2533_v1  ;;  %v2682_v4 = vpack.c.bf16 %v2538_v63, %v2534_v51 }
 0x6dc   :  { %2907 = vmatpush1.bf16.msra.mxu0 %v2665_v18  ;;  %2922 = vmatpush1.bf16.msra.mxu1 %v2677_v30 }
 0x6dd   :  { %2923 = vmatprep.subr.bf16.mxu1 %v2682_v4 }
 0x6df   :  { %2909 = vmatmul.mubr.bf16.vlgmr.msra.gmra.mrb[40].mxu0 %v6629_v6 }
 0x6e0   :  { %2924 = vmatpush1.bf16.msra.mxu1 %v2681_v15 }
 0x6e2   :  { %v2690_v48 = vpop.permute.xlu1 %2689 }
 0x6e3   :  { %3072 = vmatmul.mubr.msk.bf16.vlgmr.msra.gmra.mrb[36].mxu1 %vm85_vm0, %v6912_v32 }
 0x7a6   :  { %v2828_v27 = vpop.f32.mrb[32].mxu1 }
 0x7a7   :  { %v3182_v53 = vadd.f32 %v2828_v27, %v2690_v48  ;;  %v2830_v46 = vpop.f32.mrb[33].mxu1 }
 0x7a8   :  { %v3183_v20 = vadd.f32 %v2830_v46, %v2690_v48  ;;  %v2832_v55 = vpop.f32.mrb[34].mxu1 }
 0x7a9   :  { %v3073_v22 = vmul.f32 -1.442695, %v3182_v53  ;;  %v2833_v10 = vpop.f32.mrb[35].mxu1 }
 0x7aa   :  { %v3074_v19 = vmul.f32 -1.442695, %v3183_v20 }
 0x7ab   :  { %3315 = vpow2.f32 %v3073_v22 }
 0x7ac   :  { %3317 = vpow2.f32 %v3074_v19 }
 0x7b2   :  { %v2910_v12 = vpop.f32.mrb[40].mxu0 }
 0x7b3   :  { %v2912_v29 = vpop.f32.mrb[41].mxu0  ;;  %v3184_v28 = vadd.f32 %v2910_v12, %v2690_v48 }
 0x7b4   :  { %v2914_v24 = vpop.f32.mrb[42].mxu0  ;;  %v3186_v32 = vadd.f32 %v2912_v29, %v2690_v48 }
 0x7b5   :  { %v3316_v6 = vpop.eup %3315  ;;  %v2915_v62 = vpop.f32.mrb[43].mxu0 }
 0x7b6   :  { %v3318_v59 = vpop.eup %3317  ;;  %v2970_v8 = vadd.f32 1.0, %v3316_v6  ;;  %v2951_v21 = vpop.f32.mrb[36].mxu1 }
 0x7b7   :  { %v2971_v61 = vadd.f32 1.0, %v3318_v59  ;;  %v3185_v56 = vadd.f32 %v3184_v28, %v2951_v21  ;;  %v2953_v52 = vpop.f32.mrb[37].mxu1 }
 0x7b8   :  { %3319 = vrcp.f32 %v2970_v8  ;;  %v3187_v41 = vadd.f32 %v3186_v32, %v2953_v52  ;;  %v2955_v3 = vpop.f32.mrb[38].mxu1 }
 0x7b9   :  { %3321 = vrcp.f32 %v2971_v61  ;;  %v3075_v5 = vmul.f32 -1.442695, %v3185_v56  ;;  %v2956_v40 = vpop.f32.mrb[39].mxu1 }
 0x7ba   :  { %v3076_v33 = vmul.f32 -1.442695, %v3187_v41 }
 0x7bb   :  { %3323 = vpow2.f32 %v3075_v5 }
 0x7bc   :  { %3325 = vpow2.f32 %v3076_v33 }
 0x7c2   :  { %v3320_v2 = vpop.eup %3319 }
 0x7c3   :  { %v3322_v47 = vpop.eup %3321 }
 0x7c4   :  { %v2984_v25 = vcombine.low %v3320_v2, %v3322_v47 }
 0x7c5   :  { %v3324_v26 = vpop.eup %3323 }
 0x7c6   :  { %v3326_v39 = vpop.eup %3325  ;;  %2986 = vst [vmem:[%s7004_s10] sm:$0x77] %v2984_v25  ;;  %v2972_v16 = vadd.f32 1.0, %v3324_v26 }
 0x7c7   :  { %v2973_v34 = vadd.f32 1.0, %v3326_v39 }
 0x7c8   :  { %3327 = vrcp.f32 %v2972_v16 }
 0x7c9   :  { %3329 = vrcp.f32 %v2973_v34 }
 0x7d2   :  { %v3328_v17 = vpop.eup %3327 }
 0x7d3   :  { %v3330_v37 = vpop.eup %3329 }
 0x7d4   :  { %v2989_v57 = vcombine.low %v3328_v17, %v3330_v37 }
 0x7d6   :  { %3077 = vst [vmem:[%s7004_s10 + $0x8] sm:$0x77] %v2989_v57 }

</bundles_post_ra>
